<compile_context>
chip_gen: v5e
topology: v5e:2x2
jax: 0.10.0
libtpu: 0.0.40
codegen_flags: <defaults>
</compile_context>

<pallas_src>
import functools

import jax
import jax.numpy as jnp
from jax.experimental import pallas as pl
from jax.experimental.pallas import tpu as pltpu

LANE = 128


def _round_up(x, m):
    return ((x + m - 1) // m) * m


def _resblock_kernel(x_ref, mask_ref, w1_ref, b1_ref, w2_ref, b2_ref,
                     o_ref, pad_ref, *, H, W, Cp, C2p, slack):
    """One grid step = one ResBlock unit applied to one image.

    x_ref   : (1, F, Cp)      f32   zero-padded, flattened NHWC input image
    mask_ref: (F, 1)          f32   1.0 at interior pixels, 0.0 on the border
    w1_ref  : (1, Cp, C2p)    bf16  1x1 conv weight (BN scale folded in)
    b1_ref  : (1, 1, C2p)     f32   folded BN bias
    w2_ref  : (1, 9, C2p, Cp) bf16  3x3 conv taps (BN scale folded in)
    b2_ref  : (1, 1, Cp)      f32   folded BN bias
    o_ref   : (1, F, Cp)      f32   activation state; resident across units
    pad_ref : (F + 2*slack, C2p) bf16  scratch holding y1 in padded layout
    """
    P = W + 2                       # padded row width
    F = (H + 2) * P                 # flattened padded image size
    u = pl.program_id(1)

    # The slack rows around the y1 buffer are only read when computing the
    # (masked-out) border outputs; zero them once per image so they can never
    # inject NaN/Inf.  Also (re)start the residual state from the input image.
    @pl.when(u == 0)
    def _init():
        zeros = jnp.zeros((slack, C2p), jnp.bfloat16)
        pad_ref[pl.ds(0, slack), :] = zeros
        pad_ref[pl.ds(slack + F, slack), :] = zeros
        o_ref[...] = x_ref[...]

    state = o_ref[0]                                       # (F, Cp)  f32
    mask = mask_ref[...]                                   # (F, 1)   f32

    # ---- CNNBlock 1: 1x1 conv (channel matmul) + bias + LeakyReLU(0.1) -----
    y1 = jnp.dot(state.astype(jnp.bfloat16), w1_ref[0],
                 preferred_element_type=jnp.float32)       # (F, C2p) f32
    y1 = y1 + b1_ref[0]
    y1 = jnp.where(y1 > 0, y1, 0.1 * y1)
    # Border mask keeps the 1-pixel spatial border exactly zero (this *is* the
    # 3x3 conv's zero padding).  Single aligned contiguous store, bf16.
    pad_ref[pl.ds(slack, F), :] = (y1 * mask).astype(jnp.bfloat16)

    # ---- CNNBlock 2: 3x3 conv (pad=1) as 9 contiguous shifted matmuls ------
    acc = jnp.zeros((F, Cp), jnp.float32)
    for k in range(9):
        kh, kw = k // 3, k % 3
        start = slack + (kh - 1) * P + (kw - 1)            # static offset
        win = pad_ref[pl.ds(start, F), :]                  # (F, C2p) bf16
        acc = acc + jnp.dot(win, w2_ref[0, k],
                            preferred_element_type=jnp.float32)
    y2 = acc + b2_ref[0]
    y2 = jnp.where(y2 > 0, y2, 0.1 * y2)

    # ---- residual add; masked so the padded border of the state stays 0 ----
    o_ref[0] = y2 * mask + state


def _prepare_inputs(x_nchw, params_list):
    """NCHW f32 input + per-unit params -> padded/flattened kernel operands."""
    N, C, H, W = x_nchw.shape
    C2 = params_list[0][0].shape[1]
    Cp = _round_up(C, LANE)
    C2p = _round_up(C2, LANE)
    P, R = W + 2, H + 2
    F = R * P

    # NCHW -> NHWC, zero-pad 1 pixel spatially + channels to lane width,
    # then flatten the padded spatial grid: (N, F, Cp).
    x = jnp.transpose(x_nchw, (0, 2, 3, 1)).astype(jnp.float32)
    x = jnp.pad(x, ((0, 0), (1, 1), (1, 1), (0, Cp - C)))
    x_flat = x.reshape(N, F, Cp)

    # Interior mask over the flattened padded grid (hoisted out of the kernel).
    ri = jnp.arange(R)[:, None]
    ci = jnp.arange(P)[None, :]
    mask = ((ri >= 1) & (ri <= H) & (ci >= 1) & (ci <= W))
    mask = mask.astype(jnp.float32).reshape(F, 1)

    # Fold BN scales into the conv weights, zero-pad channels, stack units.
    w1s, b1s, w2s, b2s = [], [], [], []
    for (w1, s1, b1, w2, s2, b2) in params_list:
        w1f = jnp.zeros((Cp, C2p), jnp.float32).at[:C, :C2].set(w1 * s1)
        b1f = jnp.zeros((1, C2p), jnp.float32).at[:, :C2].set(b1)
        w2f = jnp.zeros((9, C2p, Cp), jnp.float32).at[:, :C2, :C].set(
            w2 * s2[:, None, :])
        b2f = jnp.zeros((1, Cp), jnp.float32).at[:, :C].set(b2)
        w1s.append(w1f.astype(jnp.bfloat16))
        b1s.append(b1f)
        w2s.append(w2f.astype(jnp.bfloat16))
        b2s.append(b2f)

    return (x_flat, mask, jnp.stack(w1s), jnp.stack(b1s), jnp.stack(w2s),
            jnp.stack(b2s), (N, C, H, W, len(params_list), Cp, C2p, F))


def resblock_forward(x_nchw, params_list):
    """Full ResBlock (n units) forward, NCHW in / NCHW out."""
    (x_flat, mask, W1, B1, W2, B2,
     (N, C, H, W, U, Cp, C2p, F)) = _prepare_inputs(x_nchw, params_list)
    P = W + 2
    slack = _round_up(P + 1, 8)

    kernel = functools.partial(_resblock_kernel, H=H, W=W, Cp=Cp, C2p=C2p,
                               slack=slack)

    # Advisory cost estimate for the XLA scheduler.
    flops = 2 * N * U * F * (Cp * C2p + 9 * C2p * Cp)
    bytes_accessed = (2 * N * F * Cp * 4 + F * 4
                      + N * U * (10 * Cp * C2p * 2 + (Cp + C2p) * 4))

    # Explicit scoped-VMEM budget: double-buffered image blocks + scratch +
    # weights + headroom for f32 intermediates, clamped to a safe range.
    img_bytes = F * Cp * 4
    est = (4 * img_bytes                                   # x + out, 2x buffered
           + (F + 2 * slack) * C2p * 2                     # y1 pad scratch
           + 4 * (10 * Cp * C2p * 2 + (Cp + C2p) * 4)      # weights
           + 8 * F * max(Cp, C2p) * 4)                     # temporaries headroom
    vmem_limit = int(max(32 * 2**20, min(est, 64 * 2**20)))

    out_flat = pl.pallas_call(
        kernel,
        out_shape=jax.ShapeDtypeStruct((N, F, Cp), jnp.float32),
        grid_spec=pltpu.PrefetchScalarGridSpec(
            num_scalar_prefetch=0,
            grid=(N, U),
            in_specs=[
                pl.BlockSpec((1, F, Cp), lambda n, u: (n, 0, 0)),        # x
                pl.BlockSpec((F, 1), lambda n, u: (0, 0)),               # mask
                pl.BlockSpec((1, Cp, C2p), lambda n, u: (u, 0, 0)),      # w1
                pl.BlockSpec((1, 1, C2p), lambda n, u: (u, 0, 0)),       # b1
                pl.BlockSpec((1, 9, C2p, Cp), lambda n, u: (u, 0, 0, 0)),  # w2
                pl.BlockSpec((1, 1, Cp), lambda n, u: (u, 0, 0)),        # b2
            ],
            out_specs=pl.BlockSpec((1, F, Cp), lambda n, u: (n, 0, 0)),
            scratch_shapes=[pltpu.VMEM((F + 2 * slack, C2p), jnp.bfloat16)],
        ),
        compiler_params=pltpu.CompilerParams(
            dimension_semantics=("parallel", "arbitrary"),
            vmem_limit_bytes=vmem_limit),
        cost_estimate=pl.CostEstimate(flops=flops, transcendentals=0,
                                      bytes_accessed=bytes_accessed),
    )(x_flat, mask, W1, B1, W2, B2)

    out = out_flat.reshape(N, H + 2, W + 2, Cp)[:, 1:H + 1, 1:W + 1, :C]
    return jnp.transpose(out, (0, 3, 1, 2))                # back to NCHW


def init_unit_params(key, channels):
    """Deterministic params for one ResBlock unit, with BN folded (eval mode)."""
    C, C2 = channels, 2 * channels
    eps = 1e-5
    ks = jax.random.split(key, 12)
    # CNNBlock 1: conv1x1 C -> C2
    w1 = 0.2 * jax.random.normal(ks[0], (C, C2), jnp.float32)
    cb1 = 0.1 * jax.random.normal(ks[1], (C2,), jnp.float32)
    g1 = 1.0 + 0.1 * jax.random.normal(ks[2], (C2,), jnp.float32)
    be1 = 0.1 * jax.random.normal(ks[3], (C2,), jnp.float32)
    m1 = 0.1 * jax.random.normal(ks[4], (C2,), jnp.float32)
    v1 = 0.5 + jnp.abs(jax.random.normal(ks[5], (C2,), jnp.float32))
    s1 = g1 / jnp.sqrt(v1 + eps)
    b1 = be1 + (cb1 - m1) * s1
    # CNNBlock 2: conv3x3 C2 -> C (HWIO -> (9, C2, C))
    w2_hwio = 0.2 * jax.random.normal(ks[6], (3, 3, C2, C), jnp.float32)
    cb2 = 0.1 * jax.random.normal(ks[7], (C,), jnp.float32)
    g2 = 1.0 + 0.1 * jax.random.normal(ks[8], (C,), jnp.float32)
    be2 = 0.1 * jax.random.normal(ks[9], (C,), jnp.float32)
    m2 = 0.1 * jax.random.normal(ks[10], (C,), jnp.float32)
    v2 = 0.5 + jnp.abs(jax.random.normal(ks[11], (C,), jnp.float32))
    s2 = g2 / jnp.sqrt(v2 + eps)
    b2 = be2 + (cb2 - m2) * s2
    return (w1, s1.reshape(1, C2), b1.reshape(1, C2),
            w2_hwio.reshape(9, C2, C), s2.reshape(1, C), b2.reshape(1, C))


def resblock_reference(x_nchw, params_list):
    """Pure-JAX f32 reference (same folded-BN math)."""
    x = jnp.transpose(x_nchw, (0, 2, 3, 1))
    for (w1, s1, b1, w2, s2, b2) in params_list:
        C2 = w1.shape[1]
        C = w2.shape[2]
        res = x
        z = jnp.einsum('nhwc,cd->nhwd', x, w1) * s1[0] + b1[0]
        z = jnp.where(z > 0, z, 0.1 * z)
        z2 = jax.lax.conv_general_dilated(
            z, w2.reshape(3, 3, C2, C), (1, 1), 'SAME',
            dimension_numbers=('NHWC', 'HWIO', 'NHWC'))
        z2 = z2 * s2[0] + b2[0]
        z2 = jnp.where(z2 > 0, z2, 0.1 * z2)
        x = z2 + res
    return jnp.transpose(x, (0, 3, 1, 2))


if __name__ == "__main__":
    N, C, H, W = 2, 4, 16, 16
    n_units = 2

    key = jax.random.PRNGKey(0)
    kx, kp = jax.random.split(key)
    x = jax.random.normal(kx, (N, C, H, W), jnp.float32)

    params = [init_unit_params(k, C) for k in jax.random.split(kp, n_units)]

    out = resblock_forward(x, params)
    out = jax.block_until_ready(out)

    ref = resblock_reference(x, params)
    assert out.shape == (N, C, H, W)
    # bf16 MXU inputs (f32 accumulation) vs. the f32 reference.
    assert jnp.allclose(out, ref, atol=5e-2, rtol=5e-2), "mismatch vs reference"

    print("KERNEL_OK")
</pallas_src>

<mosaic_0001>
module attributes {stable_mosaic.version = 11 : i64} {
  func.func @_resblock_kernel(%arg0: i32, %arg1: i32, %arg2: memref<1x324x128xf32, #tpu.memory_space<vmem>>, %arg3: memref<324x1xf32, #tpu.memory_space<vmem>>, %arg4: memref<1x128x128xbf16, #tpu.memory_space<vmem>>, %arg5: memref<1x1x128xf32, #tpu.memory_space<vmem>>, %arg6: memref<1x9x128x128xbf16, #tpu.memory_space<vmem>>, %arg7: memref<1x1x128xf32, #tpu.memory_space<vmem>>, %arg8: memref<1x324x128xf32, #tpu.memory_space<vmem>>, %arg9: memref<372x128xbf16, #tpu.memory_space<vmem>>) attributes {dimension_semantics = [#tpu.dimension_semantics<parallel>, #tpu.dimension_semantics<arbitrary>], iteration_bounds = array<i64: 2, 2>, scalar_prefetch = 0 : i64, scratch_operands = 1 : i64, tpu.core_type = #tpu.core_type<tc>, window_params = [{transform_indices = @transform_0, window_bounds = array<i64: 1, 324, 128>}, {pipeline_mode = #tpu.pipeline_mode<synchronous>, transform_indices = @transform_1, window_bounds = array<i64: 324, 1>}, {transform_indices = @transform_2, window_bounds = array<i64: 1, 128, 128>}, {transform_indices = @transform_3, window_bounds = array<i64: 1, 1, 128>}, {transform_indices = @transform_4, window_bounds = array<i64: 1, 9, 128, 128>}, {transform_indices = @transform_5, window_bounds = array<i64: 1, 1, 128>}, {transform_indices = @transform_6, window_bounds = array<i64: 1, 324, 128>}]} {
    %c0_i32 = arith.constant 0 : i32
    %0 = arith.cmpi eq, %arg1, %c0_i32 : i32
    %1 = arith.extui %0 : i1 to i32
    %c0_i32_0 = arith.constant 0 : i32
    %2 = arith.cmpi ne, %1, %c0_i32_0 : i32
    scf.if %2 {
      %cst_73 = arith.constant 0.000000e+00 : bf16
      %84 = vector.broadcast %cst_73 : bf16 to vector<24x128xbf16>
      %c0_74 = arith.constant 0 : index
      %c0_75 = arith.constant 0 : index
      %85 = vector.load %arg9[%c0_74, %c0_75] : memref<372x128xbf16, #tpu.memory_space<vmem>>, vector<24x128xbf16>
      tpu.vector_store %arg9[%c0_74, %c0_75], %84 {strides = array<i32>} : memref<372x128xbf16, #tpu.memory_space<vmem>>, vector<24x128xbf16>,
      %c348 = arith.constant 348 : index
      %c0_76 = arith.constant 0 : index
      %86 = vector.load %arg9[%c348, %c0_76] : memref<372x128xbf16, #tpu.memory_space<vmem>>, vector<24x128xbf16>
      tpu.vector_store %arg9[%c348, %c0_76], %84 {strides = array<i32>} : memref<372x128xbf16, #tpu.memory_space<vmem>>, vector<24x128xbf16>,
      %c0_77 = arith.constant 0 : index
      %c0_78 = arith.constant 0 : index
      %c0_79 = arith.constant 0 : index
      %87 = vector.load %arg2[%c0_77, %c0_78, %c0_79] : memref<1x324x128xf32, #tpu.memory_space<vmem>>, vector<1x324x128xf32>
      %c0_80 = arith.constant 0 : index
      %c0_81 = arith.constant 0 : index
      %c0_82 = arith.constant 0 : index
      %88 = vector.load %arg8[%c0_80, %c0_81, %c0_82] : memref<1x324x128xf32, #tpu.memory_space<vmem>>, vector<1x324x128xf32>
      tpu.vector_store %arg8[%c0_80, %c0_81, %c0_82], %87 {strides = array<i32>} : memref<1x324x128xf32, #tpu.memory_space<vmem>>, vector<1x324x128xf32>,
    } else {
    }
    %c0 = arith.constant 0 : index
    %c0_1 = arith.constant 0 : index
    %c0_2 = arith.constant 0 : index
    %3 = vector.load %arg8[%c0, %c0_1, %c0_2] : memref<1x324x128xf32, #tpu.memory_space<vmem>>, vector<1x324x128xf32>
    %4 = vector.shape_cast %3 : vector<1x324x128xf32> to vector<324x128xf32>
    %c0_3 = arith.constant 0 : index
    %c0_4 = arith.constant 0 : index
    %5 = vector.load %arg3[%c0_3, %c0_4] : memref<324x1xf32, #tpu.memory_space<vmem>>, vector<324x1xf32>
    %6 = arith.truncf %4 : vector<324x128xf32> to vector<324x128xbf16>
    %c0_5 = arith.constant 0 : index
    %c0_6 = arith.constant 0 : index
    %c0_7 = arith.constant 0 : index
    %7 = vector.load %arg4[%c0_5, %c0_6, %c0_7] : memref<1x128x128xbf16, #tpu.memory_space<vmem>>, vector<1x128x128xbf16>
    %8 = vector.shape_cast %7 : vector<1x128x128xbf16> to vector<128x128xbf16>
    %cst = arith.constant dense<0.000000e+00> : vector<324x128xf32>
    %9 = tpu.matmul %6, %8, %cst {dimension_numbers = #tpu.dot_dimension_numbers<[1], [0], [0], [1], [0, 0, 1, 1], [], []>} : vector<324x128xbf16>, vector<128x128xbf16>, vector<324x128xf32> -> vector<324x128xf32>
    %c0_8 = arith.constant 0 : index
    %c0_9 = arith.constant 0 : index
    %c0_10 = arith.constant 0 : index
    %10 = vector.load %arg5[%c0_8, %c0_9, %c0_10] : memref<1x1x128xf32, #tpu.memory_space<vmem>>, vector<1x1x128xf32>
    %11 = vector.shape_cast %10 : vector<1x1x128xf32> to vector<1x128xf32>
    %12 = vector.broadcast %11 : vector<1x128xf32> to vector<324x128xf32>
    %13 = arith.addf %9, %12 : vector<324x128xf32>
    %cst_11 = arith.constant 0.000000e+00 : f32
    %14 = vector.broadcast %cst_11 : f32 to vector<324x128xf32>
    %15 = arith.cmpf ogt, %13, %14 : vector<324x128xf32>
    %cst_12 = arith.constant 1.000000e-01 : f32
    %16 = vector.broadcast %cst_12 : f32 to vector<324x128xf32>
    %17 = arith.mulf %16, %13 : vector<324x128xf32>
    %18 = arith.select %15, %13, %17 : vector<324x128xi1>, vector<324x128xf32>
    %19 = vector.broadcast %5 : vector<324x1xf32> to vector<324x128xf32>
    %20 = arith.mulf %18, %19 : vector<324x128xf32>
    %21 = arith.truncf %20 : vector<324x128xf32> to vector<324x128xbf16>
    %c24 = arith.constant 24 : index
    %c0_13 = arith.constant 0 : index
    %22 = vector.load %arg9[%c24, %c0_13] : memref<372x128xbf16, #tpu.memory_space<vmem>>, vector<324x128xbf16>
    tpu.vector_store %arg9[%c24, %c0_13], %21 {strides = array<i32>} : memref<372x128xbf16, #tpu.memory_space<vmem>>, vector<324x128xbf16>,
    %cst_14 = arith.constant 0.000000e+00 : f32
    %23 = vector.broadcast %cst_14 : f32 to vector<324x128xf32>
    %c5 = arith.constant 5 : index
    %c0_15 = arith.constant 0 : index
    %24 = vector.load %arg9[%c5, %c0_15] : memref<372x128xbf16, #tpu.memory_space<vmem>>, vector<324x128xbf16>
    %c0_16 = arith.constant 0 : index
    %c0_17 = arith.constant 0 : index
    %c0_18 = arith.constant 0 : index
    %c0_19 = arith.constant 0 : index
    %25 = vector.load %arg6[%c0_16, %c0_17, %c0_18, %c0_19] : memref<1x9x128x128xbf16, #tpu.memory_space<vmem>>, vector<1x1x128x128xbf16>
    %26 = vector.shape_cast %25 : vector<1x1x128x128xbf16> to vector<128x128xbf16>
    %cst_20 = arith.constant dense<0.000000e+00> : vector<324x128xf32>
    %27 = tpu.matmul %24, %26, %cst_20 {dimension_numbers = #tpu.dot_dimension_numbers<[1], [0], [0], [1], [0, 0, 1, 1], [], []>} : vector<324x128xbf16>, vector<128x128xbf16>, vector<324x128xf32> -> vector<324x128xf32>
    %28 = arith.addf %23, %27 : vector<324x128xf32>
    %c6 = arith.constant 6 : index
    %c0_21 = arith.constant 0 : index
    %29 = vector.load %arg9[%c6, %c0_21] : memref<372x128xbf16, #tpu.memory_space<vmem>>, vector<324x128xbf16>
    %c0_22 = arith.constant 0 : index
    %c1 = arith.constant 1 : index
    %c0_23 = arith.constant 0 : index
    %c0_24 = arith.constant 0 : index
    %30 = vector.load %arg6[%c0_22, %c1, %c0_23, %c0_24] : memref<1x9x128x128xbf16, #tpu.memory_space<vmem>>, vector<1x1x128x128xbf16>
    %31 = vector.shape_cast %30 : vector<1x1x128x128xbf16> to vector<128x128xbf16>
    %cst_25 = arith.constant dense<0.000000e+00> : vector<324x128xf32>
    %32 = tpu.matmul %29, %31, %cst_25 {dimension_numbers = #tpu.dot_dimension_numbers<[1], [0], [0], [1], [0, 0, 1, 1], [], []>} : vector<324x128xbf16>, vector<128x128xbf16>, vector<324x128xf32> -> vector<324x128xf32>
    %33 = arith.addf %28, %32 : vector<324x128xf32>
    %c7 = arith.constant 7 : index
    %c0_26 = arith.constant 0 : index
    %34 = vector.load %arg9[%c7, %c0_26] : memref<372x128xbf16, #tpu.memory_space<vmem>>, vector<324x128xbf16>
    %c0_27 = arith.constant 0 : index
    %c2 = arith.constant 2 : index
    %c0_28 = arith.constant 0 : index
    %c0_29 = arith.constant 0 : index
    %35 = vector.load %arg6[%c0_27, %c2, %c0_28, %c0_29] : memref<1x9x128x128xbf16, #tpu.memory_space<vmem>>, vector<1x1x128x128xbf16>
    %36 = vector.shape_cast %35 : vector<1x1x128x128xbf16> to vector<128x128xbf16>
    %cst_30 = arith.constant dense<0.000000e+00> : vector<324x128xf32>
    %37 = tpu.matmul %34, %36, %cst_30 {dimension_numbers = #tpu.dot_dimension_numbers<[1], [0], [0], [1], [0, 0, 1, 1], [], []>} : vector<324x128xbf16>, vector<128x128xbf16>, vector<324x128xf32> -> vector<324x128xf32>
    %38 = arith.addf %33, %37 : vector<324x128xf32>
    %c23 = arith.constant 23 : index
    %c0_31 = arith.constant 0 : index
    %39 = vector.load %arg9[%c23, %c0_31] : memref<372x128xbf16, #tpu.memory_space<vmem>>, vector<324x128xbf16>
    %c0_32 = arith.constant 0 : index
    %c3 = arith.constant 3 : index
    %c0_33 = arith.constant 0 : index
    %c0_34 = arith.constant 0 : index
    %40 = vector.load %arg6[%c0_32, %c3, %c0_33, %c0_34] : memref<1x9x128x128xbf16, #tpu.memory_space<vmem>>, vector<1x1x128x128xbf16>
    %41 = vector.shape_cast %40 : vector<1x1x128x128xbf16> to vector<128x128xbf16>
    %cst_35 = arith.constant dense<0.000000e+00> : vector<324x128xf32>
    %42 = tpu.matmul %39, %41, %cst_35 {dimension_numbers = #tpu.dot_dimension_numbers<[1], [0], [0], [1], [0, 0, 1, 1], [], []>} : vector<324x128xbf16>, vector<128x128xbf16>, vector<324x128xf32> -> vector<324x128xf32>
    %43 = arith.addf %38, %42 : vector<324x128xf32>
    %c24_36 = arith.constant 24 : index
    %c0_37 = arith.constant 0 : index
    %44 = vector.load %arg9[%c24_36, %c0_37] : memref<372x128xbf16, #tpu.memory_space<vmem>>, vector<324x128xbf16>
    %c0_38 = arith.constant 0 : index
    %c4 = arith.constant 4 : index
    %c0_39 = arith.constant 0 : index
    %c0_40 = arith.constant 0 : index
    %45 = vector.load %arg6[%c0_38, %c4, %c0_39, %c0_40] : memref<1x9x128x128xbf16, #tpu.memory_space<vmem>>, vector<1x1x128x128xbf16>
    %46 = vector.shape_cast %45 : vector<1x1x128x128xbf16> to vector<128x128xbf16>
    %cst_41 = arith.constant dense<0.000000e+00> : vector<324x128xf32>
    %47 = tpu.matmul %44, %46, %cst_41 {dimension_numbers = #tpu.dot_dimension_numbers<[1], [0], [0], [1], [0, 0, 1, 1], [], []>} : vector<324x128xbf16>, vector<128x128xbf16>, vector<324x128xf32> -> vector<324x128xf32>
    %48 = arith.addf %43, %47 : vector<324x128xf32>
    %c25 = arith.constant 25 : index
    %c0_42 = arith.constant 0 : index
    %49 = vector.load %arg9[%c25, %c0_42] : memref<372x128xbf16, #tpu.memory_space<vmem>>, vector<324x128xbf16>
    %c0_43 = arith.constant 0 : index
    %c5_44 = arith.constant 5 : index
    %c0_45 = arith.constant 0 : index
    %c0_46 = arith.constant 0 : index
    %50 = vector.load %arg6[%c0_43, %c5_44, %c0_45, %c0_46] : memref<1x9x128x128xbf16, #tpu.memory_space<vmem>>, vector<1x1x128x128xbf16>
    %51 = vector.shape_cast %50 : vector<1x1x128x128xbf16> to vector<128x128xbf16>
    %cst_47 = arith.constant dense<0.000000e+00> : vector<324x128xf32>
    %52 = tpu.matmul %49, %51, %cst_47 {dimension_numbers = #tpu.dot_dimension_numbers<[1], [0], [0], [1], [0, 0, 1, 1], [], []>} : vector<324x128xbf16>, vector<128x128xbf16>, vector<324x128xf32> -> vector<324x128xf32>
    %53 = arith.addf %48, %52 : vector<324x128xf32>
    %c41 = arith.constant 41 : index
    %c0_48 = arith.constant 0 : index
    %54 = vector.load %arg9[%c41, %c0_48] : memref<372x128xbf16, #tpu.memory_space<vmem>>, vector<324x128xbf16>
    %c0_49 = arith.constant 0 : index
    %c6_50 = arith.constant 6 : index
    %c0_51 = arith.constant 0 : index
    %c0_52 = arith.constant 0 : index
    %55 = vector.load %arg6[%c0_49, %c6_50, %c0_51, %c0_52] : memref<1x9x128x128xbf16, #tpu.memory_space<vmem>>, vector<1x1x128x128xbf16>
    %56 = vector.shape_cast %55 : vector<1x1x128x128xbf16> to vector<128x128xbf16>
    %cst_53 = arith.constant dense<0.000000e+00> : vector<324x128xf32>
    %57 = tpu.matmul %54, %56, %cst_53 {dimension_numbers = #tpu.dot_dimension_numbers<[1], [0], [0], [1], [0, 0, 1, 1], [], []>} : vector<324x128xbf16>, vector<128x128xbf16>, vector<324x128xf32> -> vector<324x128xf32>
    %58 = arith.addf %53, %57 : vector<324x128xf32>
    %c42 = arith.constant 42 : index
    %c0_54 = arith.constant 0 : index
    %59 = vector.load %arg9[%c42, %c0_54] : memref<372x128xbf16, #tpu.memory_space<vmem>>, vector<324x128xbf16>
    %c0_55 = arith.constant 0 : index
    %c7_56 = arith.constant 7 : index
    %c0_57 = arith.constant 0 : index
    %c0_58 = arith.constant 0 : index
    %60 = vector.load %arg6[%c0_55, %c7_56, %c0_57, %c0_58] : memref<1x9x128x128xbf16, #tpu.memory_space<vmem>>, vector<1x1x128x128xbf16>
    %61 = vector.shape_cast %60 : vector<1x1x128x128xbf16> to vector<128x128xbf16>
    %cst_59 = arith.constant dense<0.000000e+00> : vector<324x128xf32>
    %62 = tpu.matmul %59, %61, %cst_59 {dimension_numbers = #tpu.dot_dimension_numbers<[1], [0], [0], [1], [0, 0, 1, 1], [], []>} : vector<324x128xbf16>, vector<128x128xbf16>, vector<324x128xf32> -> vector<324x128xf32>
    %63 = arith.addf %58, %62 : vector<324x128xf32>
    %c43 = arith.constant 43 : index
    %c0_60 = arith.constant 0 : index
    %64 = vector.load %arg9[%c43, %c0_60] : memref<372x128xbf16, #tpu.memory_space<vmem>>, vector<324x128xbf16>
    %c0_61 = arith.constant 0 : index
    %c8 = arith.constant 8 : index
    %c0_62 = arith.constant 0 : index
    %c0_63 = arith.constant 0 : index
    %65 = vector.load %arg6[%c0_61, %c8, %c0_62, %c0_63] : memref<1x9x128x128xbf16, #tpu.memory_space<vmem>>, vector<1x1x128x128xbf16>
    %66 = vector.shape_cast %65 : vector<1x1x128x128xbf16> to vector<128x128xbf16>
    %cst_64 = arith.constant dense<0.000000e+00> : vector<324x128xf32>
    %67 = tpu.matmul %64, %66, %cst_64 {dimension_numbers = #tpu.dot_dimension_numbers<[1], [0], [0], [1], [0, 0, 1, 1], [], []>} : vector<324x128xbf16>, vector<128x128xbf16>, vector<324x128xf32> -> vector<324x128xf32>
    %68 = arith.addf %63, %67 : vector<324x128xf32>
    %c0_65 = arith.constant 0 : index
    %c0_66 = arith.constant 0 : index
    %c0_67 = arith.constant 0 : index
    %69 = vector.load %arg7[%c0_65, %c0_66, %c0_67] : memref<1x1x128xf32, #tpu.memory_space<vmem>>, vector<1x1x128xf32>
    %70 = vector.shape_cast %69 : vector<1x1x128xf32> to vector<1x128xf32>
    %71 = vector.broadcast %70 : vector<1x128xf32> to vector<324x128xf32>
    %72 = arith.addf %68, %71 : vector<324x128xf32>
    %cst_68 = arith.constant 0.000000e+00 : f32
    %73 = vector.broadcast %cst_68 : f32 to vector<324x128xf32>
    %74 = arith.cmpf ogt, %72, %73 : vector<324x128xf32>
    %cst_69 = arith.constant 1.000000e-01 : f32
    %75 = vector.broadcast %cst_69 : f32 to vector<324x128xf32>
    %76 = arith.mulf %75, %72 : vector<324x128xf32>
    %77 = arith.select %74, %72, %76 : vector<324x128xi1>, vector<324x128xf32>
    %78 = vector.broadcast %5 : vector<324x1xf32> to vector<324x128xf32>
    %79 = arith.mulf %77, %78 : vector<324x128xf32>
    %80 = arith.addf %79, %4 : vector<324x128xf32>
    %c0_70 = arith.constant 0 : index
    %c0_71 = arith.constant 0 : index
    %c0_72 = arith.constant 0 : index
    %81 = vector.load %arg8[%c0_70, %c0_71, %c0_72] : memref<1x324x128xf32, #tpu.memory_space<vmem>>, vector<1x324x128xf32>
    %82 = vector.shape_cast %81 : vector<1x324x128xf32> to vector<324x128xf32>
    %83 = vector.shape_cast %80 : vector<324x128xf32> to vector<1x324x128xf32>
    tpu.vector_store %arg8[%c0_70, %c0_71, %c0_72], %83 {strides = array<i32>} : memref<1x324x128xf32, #tpu.memory_space<vmem>>, vector<1x324x128xf32>,
    return
  }
  func.func @transform_0(%arg0: i32, %arg1: i32) -> (i32, i32, i32) {
    %c0_i32 = arith.constant 0 : i32
    %c0_i32_0 = arith.constant 0 : i32
    %c0_i32_1 = arith.constant 0 : i32
    return %arg0, %c0_i32, %c0_i32_0 : i32, i32, i32
  }
  func.func @transform_1(%arg0: i32, %arg1: i32) -> (i32, i32) {
    %c0_i32 = arith.constant 0 : i32
    %c0_i32_0 = arith.constant 0 : i32
    %c0_i32_1 = arith.constant 0 : i32
    return %c0_i32, %c0_i32_0 : i32, i32
  }
  func.func @transform_2(%arg0: i32, %arg1: i32) -> (i32, i32, i32) {
    %c0_i32 = arith.constant 0 : i32
    %c0_i32_0 = arith.constant 0 : i32
    %c0_i32_1 = arith.constant 0 : i32
    return %arg1, %c0_i32, %c0_i32_0 : i32, i32, i32
  }
  func.func @transform_3(%arg0: i32, %arg1: i32) -> (i32, i32, i32) {
    %c0_i32 = arith.constant 0 : i32
    %c0_i32_0 = arith.constant 0 : i32
    %c0_i32_1 = arith.constant 0 : i32
    return %arg1, %c0_i32, %c0_i32_0 : i32, i32, i32
  }
  func.func @transform_4(%arg0: i32, %arg1: i32) -> (i32, i32, i32, i32) {
    %c0_i32 = arith.constant 0 : i32
    %c0_i32_0 = arith.constant 0 : i32
    %c0_i32_1 = arith.constant 0 : i32
    %c0_i32_2 = arith.constant 0 : i32
    return %arg1, %c0_i32, %c0_i32_0, %c0_i32_1 : i32, i32, i32, i32
  }
  func.func @transform_5(%arg0: i32, %arg1: i32) -> (i32, i32, i32) {
    %c0_i32 = arith.constant 0 : i32
    %c0_i32_0 = arith.constant 0 : i32
    %c0_i32_1 = arith.constant 0 : i32
    return %arg1, %c0_i32, %c0_i32_0 : i32, i32, i32
  }
  func.func @transform_6(%arg0: i32, %arg1: i32) -> (i32, i32, i32) {
    %c0_i32 = arith.constant 0 : i32
    %c0_i32_0 = arith.constant 0 : i32
    %c0_i32_1 = arith.constant 0 : i32
    return %arg0, %c0_i32, %c0_i32_0 : i32, i32, i32
  }
}

</mosaic_0001>

<bundles_post_ra>
// kernel: tpu_custom_call.1
= control target key start
LH: loop header
LB: loop body
LE: loop exit
PB: predicated region body
PF: predicated region fallthrough
CT: control target
= control target key end

     0   :  { %s6369_s21 = smov 0   ;;  %s6371_s22 = smov 0   ;;  %s9006_s0 = inlined_call_operand.vmem [shape: f32[2,324,128], index: 0, kind: input, shape index: {}]   ;;  %s9007_s1 = inlined_call_operand.vmem [shape: f32[324,1], index: 1, kind: input, shape index: {}]   ;;  %s9008_s2 = inlined_call_operand.vmem [shape: bf16[2,128,128], index: 2, kind: input, shape index: {}]   ;;  %s9009_s3 = inlined_call_operand.vmem [shape: f32[2,1,128], index: 3, kind: input, shape index: {}]   ;;  %s9010_s4 = inlined_call_operand.vmem [shape: bf16[2,9,128,128], index: 4, kind: input, shape index: {}]   ;;  %s9011_s5 = inlined_call_operand.vmem [shape: f32[2,1,128], index: 5, kind: input, shape index: {}]   ;;  %s9012_s6 = inlined_call_operand.vmem [shape: f32[2,324,128], index: 6, kind: output, shape index: {}]  }
   0x1   :  { %s6373_s23 = smov 0   ;;  %s6375_s24 = smov 0  }
   0x2   :  { %s6377_s25 = smov 0  }
   0x3 LB: > { %s25_s26 = sadd.s32 1, %s6322_s23  ;;  %s28_s27 = sadd.s32 1, %s6326_s24  ;;  %s6330_s25 = sphi %s6377_s25, %s16_s25   ;;  %s6326_s24 = sphi %s6375_s24, %s9599_s24   ;;  %s6322_s23 = sphi %s6373_s23, %s9598_s23   ;;  %s6318_s22 = sphi %s6371_s22, %s9597_s22   ;;  %s6314_s21 = sphi %s6369_s21, %s9596_s21  }
   0x4   : > { %p26_p0 = scmp.ge.s32.totalorder %s25_s26, 2  ;;  %p5104_p1 = scmp.ge.s32.totalorder %s6330_s25, 1 }
   0x5   : > { %p260_p2 = scmp.lt.s32.totalorder %s6330_s25, 5 }
   0x6   : > { %s9601_s26 = smov (%p26_p0, %s25_s26), 0  ;;  %s9603_s27 = smov (!%p26_p0, %s28_s27), %s6326_s24 }
   0x7   : > { %p261_p3 = pnand %p5104_p1, %p260_p2  ;;  %p30_p4 = scmp.ge.s32.totalorder %s9603_s27, 2 }
   0x9   : > { %s9605_s27 = smov (%p30_p4, %s9603_s27), 0  ;;  %264 = sbr.rel (%p261_p3) target bundleno = 1387 (0x56b), region = 44 }
   0xe   : > { %p306_p5 = scmp.lt.s32.totalorder %s6318_s22, 1  ;;  %p311_p6 = scmp.lt.s32.totalorder %s6314_s21, 1 }
   0xf   : > { %p5110_p7 = scmp.ne.s32.totalorder %s6314_s21, 0 }
  0x10   : > { %s9607_s22 = smov (!%p306_p5, %s6318_s22), 1 }
  0x11   : > { %s312_s28 = scalar_select %p311_p6, %s6314_s21, 1 }
  0x12   : > { %s6183_s29 = smul.u32 328, %s9607_s22 }
  0x13   : > { %s5713_s30 = sshll.u32 %s312_s28, 6  ;;  %s6406_s9 = scalar_lea.vmem %s9009_s3, %s312_s28 }
  0x14   : > { %s6411_s12 = scalar_lea.vmem %s9006_s0, %s6183_s29  ;;  %s6416_s15 = scalar_lea.vmem %s9008_s2, %s5713_s30 }
  0x15   : > { %s6184_s16 = smul.u32 576, %s312_s28  ;;  %s6421_s19 = scalar_lea.vmem %s9011_s5, %s312_s28 }
  0x16   : > { %s6426_s7 = scalar_lea.vmem %s9012_s6, %s6183_s29  ;;  %336 = sbr.rel (%p5110_p7) target bundleno = 75 (0x4b), region = 48 }
  0x17   : > { %s6431_s11 = scalar_lea.vmem %s9010_s4, %s6184_s16 }
  0x1b   : > { %v6332_v0 = vmov 0   ;;  %v344_v1 = vld [vmem:[%s6411_s12] sm:$0xff]  ;;  %v345_v2 = vld [vmem:[%s6411_s12 + $0x8] sm:$0xff]  ;;  %v346_v3 = vld [vmem:[%s6411_s12 + $0x10] sm:$0xff] }
  0x1c   : > { %337 = vst [vmem:[#allocation2] sm:$0xf] %v6332_v0  ;;  %v347_v4 = vld [vmem:[%s6411_s12 + $0x18] sm:$0xff]  ;;  %v348_v5 = vld [vmem:[%s6411_s12 + $0x20] sm:$0xff]  ;;  %v349_v6 = vld [vmem:[%s6411_s12 + $0x28] sm:$0xff] }
  0x1d   : > { %338 = vst [vmem:[#allocation2 + $0x4] sm:$0xf] %v6332_v0  ;;  %v350_v7 = vld [vmem:[%s6411_s12 + $0x30] sm:$0xff]  ;;  %v351_v8 = vld [vmem:[%s6411_s12 + $0x38] sm:$0xff]  ;;  %v352_v9 = vld [vmem:[%s6411_s12 + $0x40] sm:$0xff] }
  0x1e   : > { %339 = vst [vmem:[#allocation2 + $0x8] sm:$0xf] %v6332_v0  ;;  %v353_v10 = vld [vmem:[%s6411_s12 + $0x48] sm:$0xff]  ;;  %v354_v11 = vld [vmem:[%s6411_s12 + $0x50] sm:$0xff]  ;;  %v355_v12 = vld [vmem:[%s6411_s12 + $0x58] sm:$0xff] }
  0x1f   : > { %340 = vst [vmem:[#allocation2 + $0xac] sm:$0xc] %v6332_v0  ;;  %v356_v13 = vld [vmem:[%s6411_s12 + $0x60] sm:$0xff]  ;;  %v357_v14 = vld [vmem:[%s6411_s12 + $0x68] sm:$0xff]  ;;  %v358_v15 = vld [vmem:[%s6411_s12 + $0x70] sm:$0xff] }
  0x20   : > { %341 = vst [vmem:[#allocation2 + $0xb0] sm:$0xf] %v6332_v0  ;;  %v359_v16 = vld [vmem:[%s6411_s12 + $0x78] sm:$0xff]  ;;  %v360_v17 = vld [vmem:[%s6411_s12 + $0x80] sm:$0xff]  ;;  %v361_v18 = vld [vmem:[%s6411_s12 + $0x88] sm:$0xff] }
  0x21   : > { %342 = vst [vmem:[#allocation2 + $0xb4] sm:$0xf] %v6332_v0  ;;  %v362_v19 = vld [vmem:[%s6411_s12 + $0x90] sm:$0xff]  ;;  %v363_v20 = vld [vmem:[%s6411_s12 + $0x98] sm:$0xff]  ;;  %v364_v21 = vld [vmem:[%s6411_s12 + $0xa0] sm:$0xff] }
  0x22   : > { %385 = vst [vmem:[%s6426_s7] sm:$0xff] %v344_v1  ;;  %v365_v22 = vld [vmem:[%s6411_s12 + $0xa8] sm:$0xff]  ;;  %v366_v23 = vld [vmem:[%s6411_s12 + $0xb0] sm:$0xff]  ;;  %v367_v24 = vld [vmem:[%s6411_s12 + $0xb8] sm:$0xff] }
  0x23   : > { %386 = vst [vmem:[%s6426_s7 + $0x8] sm:$0xff] %v345_v2  ;;  %v368_v25 = vld [vmem:[%s6411_s12 + $0xc0] sm:$0xff]  ;;  %v369_v26 = vld [vmem:[%s6411_s12 + $0xc8] sm:$0xff]  ;;  %v370_v27 = vld [vmem:[%s6411_s12 + $0xd0] sm:$0xff] }
  0x24   : > { %387 = vst [vmem:[%s6426_s7 + $0x10] sm:$0xff] %v346_v3  ;;  %v371_v28 = vld [vmem:[%s6411_s12 + $0xd8] sm:$0xff]  ;;  %v372_v29 = vld [vmem:[%s6411_s12 + $0xe0] sm:$0xff]  ;;  %v373_v30 = vld [vmem:[%s6411_s12 + $0xe8] sm:$0xff] }
  0x25   : > { %388 = vst [vmem:[%s6426_s7 + $0x18] sm:$0xff] %v347_v4  ;;  %v374_v31 = vld [vmem:[%s6411_s12 + $0xf0] sm:$0xff]  ;;  %v375_v32 = vld [vmem:[%s6411_s12 + $0xf8] sm:$0xff]  ;;  %v376_v33 = vld [vmem:[%s6411_s12 + $0x100] sm:$0xff] }
  0x26   : > { %389 = vst [vmem:[%s6426_s7 + $0x20] sm:$0xff] %v348_v5  ;;  %v377_v34 = vld [vmem:[%s6411_s12 + $0x108] sm:$0xff]  ;;  %v378_v35 = vld [vmem:[%s6411_s12 + $0x110] sm:$0xff]  ;;  %v379_v36 = vld [vmem:[%s6411_s12 + $0x118] sm:$0xff] }
  0x27   : > { %390 = vst [vmem:[%s6426_s7 + $0x28] sm:$0xff] %v349_v6  ;;  %v380_v37 = vld [vmem:[%s6411_s12 + $0x120] sm:$0xff]  ;;  %v381_v38 = vld [vmem:[%s6411_s12 + $0x128] sm:$0xff]  ;;  %v382_v39 = vld [vmem:[%s6411_s12 + $0x130] sm:$0xff] }
  0x28   : > { %391 = vst [vmem:[%s6426_s7 + $0x30] sm:$0xff] %v350_v7  ;;  %v383_v40 = vld [vmem:[%s6411_s12 + $0x138] sm:$0xff]  ;;  %v384_v41 = vld [vmem:[%s6411_s12 + $0x140] sm:$0xf] }
  0x29   : > { %392 = vst [vmem:[%s6426_s7 + $0x38] sm:$0xff] %v351_v8 }
  0x2a   : > { %393 = vst [vmem:[%s6426_s7 + $0x40] sm:$0xff] %v352_v9 }
  0x2b   : > { %394 = vst [vmem:[%s6426_s7 + $0x48] sm:$0xff] %v353_v10 }
  0x2c   : > { %395 = vst [vmem:[%s6426_s7 + $0x50] sm:$0xff] %v354_v11 }
  0x2d   : > { %396 = vst [vmem:[%s6426_s7 + $0x58] sm:$0xff] %v355_v12 }
  0x2e   : > { %397 = vst [vmem:[%s6426_s7 + $0x60] sm:$0xff] %v356_v13 }
  0x2f   : > { %398 = vst [vmem:[%s6426_s7 + $0x68] sm:$0xff] %v357_v14 }
  0x30   : > { %399 = vst [vmem:[%s6426_s7 + $0x70] sm:$0xff] %v358_v15 }
  0x31   : > { %400 = vst [vmem:[%s6426_s7 + $0x78] sm:$0xff] %v359_v16 }
  0x32   : > { %401 = vst [vmem:[%s6426_s7 + $0x80] sm:$0xff] %v360_v17 }
  0x33   : > { %402 = vst [vmem:[%s6426_s7 + $0x88] sm:$0xff] %v361_v18 }
  0x34   : > { %403 = vst [vmem:[%s6426_s7 + $0x90] sm:$0xff] %v362_v19 }
  0x35   : > { %404 = vst [vmem:[%s6426_s7 + $0x98] sm:$0xff] %v363_v20 }
  0x36   : > { %405 = vst [vmem:[%s6426_s7 + $0xa0] sm:$0xff] %v364_v21 }
  0x37   : > { %406 = vst [vmem:[%s6426_s7 + $0xa8] sm:$0xff] %v365_v22 }
  0x38   : > { %407 = vst [vmem:[%s6426_s7 + $0xb0] sm:$0xff] %v366_v23 }
  0x39   : > { %408 = vst [vmem:[%s6426_s7 + $0xb8] sm:$0xff] %v367_v24 }
  0x3a   : > { %409 = vst [vmem:[%s6426_s7 + $0xc0] sm:$0xff] %v368_v25 }
  0x3b   : > { %410 = vst [vmem:[%s6426_s7 + $0xc8] sm:$0xff] %v369_v26 }
  0x3c   : > { %411 = vst [vmem:[%s6426_s7 + $0xd0] sm:$0xff] %v370_v27 }
  0x3d   : > { %412 = vst [vmem:[%s6426_s7 + $0xd8] sm:$0xff] %v371_v28 }
  0x3e   : > { %413 = vst [vmem:[%s6426_s7 + $0xe0] sm:$0xff] %v372_v29 }
  0x3f   : > { %414 = vst [vmem:[%s6426_s7 + $0xe8] sm:$0xff] %v373_v30 }
  0x40   : > { %415 = vst [vmem:[%s6426_s7 + $0xf0] sm:$0xff] %v374_v31 }
  0x41   : > { %416 = vst [vmem:[%s6426_s7 + $0xf8] sm:$0xff] %v375_v32 }
  0x42   : > { %417 = vst [vmem:[%s6426_s7 + $0x100] sm:$0xff] %v376_v33 }
  0x43   : > { %418 = vst [vmem:[%s6426_s7 + $0x108] sm:$0xff] %v377_v34 }
  0x44   : > { %419 = vst [vmem:[%s6426_s7 + $0x110] sm:$0xff] %v378_v35 }
  0x45   : > { %420 = vst [vmem:[%s6426_s7 + $0x118] sm:$0xff] %v379_v36 }
  0x46   : > { %421 = vst [vmem:[%s6426_s7 + $0x120] sm:$0xff] %v380_v37 }
  0x47   : > { %422 = vst [vmem:[%s6426_s7 + $0x128] sm:$0xff] %v381_v38 }
  0x48   : > { %423 = vst [vmem:[%s6426_s7 + $0x130] sm:$0xff] %v382_v39 }
  0x49   : > { %424 = vst [vmem:[%s6426_s7 + $0x138] sm:$0xff] %v383_v40 }
  0x4a   : > { %425 = vst [vmem:[%s6426_s7 + $0x140] sm:$0xf] %v384_v41 }
  0x4b PF: > { %v5721_v42 = vld [vmem:[%s6416_s15 + $0x38] sm:$0xff]  ;;  %v5720_v43 = vld [vmem:[%s6416_s15 + $0x30] sm:$0xff]  ;;  %v6333_v44 = vmov 0   ;;  %v467_v45 = vld [vmem:[%s9007_s1] sm:$0xff]  ;;  %vm1342_vm3 = vcmask 1044480  }
  0x4c   : > { %597 = vmatpush.bf16.msra.mxu0 %v5721_v42  ;;  %6167 = vmatpush.bf16.msra.mxu2 %v5721_v42  ;;  %v5719_v46 = vld [vmem:[%s6416_s15 + $0x28] sm:$0xff]  ;;  %v5718_v47 = vld [vmem:[%s6416_s15 + $0x20] sm:$0xff]  ;;  %v5717_v48 = vld [vmem:[%s6416_s15 + $0x18] sm:$0xff]  ;;  %vm1961_vm6 = vsmask.f32 4352 }
  0x4d   : > { %6227 = vset.pattern.permute.xlu0 %v6333_v44  ;;  %6228 = vset.pattern.permute.xlu1 %v6333_v44  ;;  %v487_v49 = vld [vmem:[%s9007_s1 + $0xa0] sm:$0xff]  ;;  %v486_v50 = vld [vmem:[%s9007_s1 + $0x98] sm:$0xff]  ;;  %v5716_v51 = vld [vmem:[%s6416_s15 + $0x10] sm:$0xff]  ;;  %vm1569_vm7 = vsmask.f32 5376 }
  0x4e   : > { %6229 = vset.pattern.permute.xlu2 %v6333_v44  ;;  %835 = vperm.xlu0 %6227, %v467_v45   ;;  %v5715_v52 = vld [vmem:[%s6416_s15 + $0x8] sm:$0xff]  ;;  %v469_v54 = vld [vmem:[%s9007_s1 + $0x10] sm:$0xff]  ;;  %v5714_v55 = vld [vmem:[%s6416_s15] sm:$0xff] }
  0x4f   : > { %935 = vperm.xlu1 %6228, %v487_v49   ;;  %v488_v53 = vld [vmem:[%s9007_s1 + $0xa8] sm:$0xff]  ;;  %v426_v56 = vld [vmem:[%s6426_s7] sm:$0xff]  ;;  %v448_v58 = vld [vmem:[%s6426_s7 + $0xb0] sm:$0xff] }
  0x50   : > { %598 = vmatpush.bf16.msra.mxu0 %v5720_v43  ;;  %6168 = vmatpush.bf16.msra.mxu2 %v5720_v43  ;;  %v427_v57 = vld [vmem:[%s6426_s7 + $0x8] sm:$0xff]  ;;  %v449_v59 = vld [vmem:[%s6426_s7 + $0xb8] sm:$0xff]  ;;  %v489_v62 = vld [vmem:[%s9007_s1 + $0xb0] sm:$0xff] }
  0x51   : > { %v508_v60 = vpack.c.bf16 %v427_v57, %v426_v56  ;;  %v519_v61 = vpack.c.bf16 %v449_v59, %v448_v58  ;;  %v490_v63 = vld [vmem:[%s9007_s1 + $0xb8] sm:$0xff]  ;;  %945 = vperm.xlu2 %6229, %v489_v62   ;;  %v468_v1 = vld [vmem:[%s9007_s1 + $0x8] sm:$0xff]  ;;  %v471_v2 = vld [vmem:[%s9007_s1 + $0x20] sm:$0xff] }
  0x52   : > { %v470_v0 = vld [vmem:[%s9007_s1 + $0x18] sm:$0xff]  ;;  %v428_v3 = vld [vmem:[%s6426_s7 + $0x10] sm:$0xff]  ;;  %v450_v5 = vld [vmem:[%s6426_s7 + $0xc0] sm:$0xff] }
  0x53   : > { %v429_v4 = vld [vmem:[%s6426_s7 + $0x18] sm:$0xff]  ;;  %v451_v6 = vld [vmem:[%s6426_s7 + $0xc8] sm:$0xff]  ;;  %v493_v10 = vld [vmem:[%s9007_s1 + $0xd0] sm:$0xff] }
  0x54   : > { %599 = vmatpush.bf16.msra.mxu0 %v5719_v46  ;;  %6169 = vmatpush.bf16.msra.mxu2 %v5719_v46  ;;  %v509_v7 = vpack.c.bf16 %v429_v4, %v428_v3  ;;  %v520_v8 = vpack.c.bf16 %v451_v6, %v450_v5  ;;  %v472_v9 = vld [vmem:[%s9007_s1 + $0x28] sm:$0xff]  ;;  %v430_v11 = vld [vmem:[%s6426_s7 + $0x20] sm:$0xff]  ;;  %v452_v13 = vld [vmem:[%s6426_s7 + $0xd0] sm:$0xff] }
  0x55   : > { %v431_v12 = vld [vmem:[%s6426_s7 + $0x28] sm:$0xff]  ;;  %v453_v14 = vld [vmem:[%s6426_s7 + $0xd8] sm:$0xff]  ;;  %v491_v17 = vld [vmem:[%s9007_s1 + $0xc0] sm:$0xff] }
  0x56   : > { %930 = vperm.xlu0 %6227, %v486_v50   ;;  %v510_v15 = vpack.c.bf16 %v431_v12, %v430_v11  ;;  %v521_v16 = vpack.c.bf16 %v453_v14, %v452_v13  ;;  %v494_v18 = vld [vmem:[%s9007_s1 + $0xd8] sm:$0xff]  ;;  %v495_v19 = vld [vmem:[%s9007_s1 + $0xe0] sm:$0xff]  ;;  %v492_v20 = vld [vmem:[%s9007_s1 + $0xc8] sm:$0xff] }
  0x57   : > { %940 = vperm.xlu1 %6228, %v488_v53   ;;  %v475_v21 = vld [vmem:[%s9007_s1 + $0x40] sm:$0xff]  ;;  %v432_v22 = vld [vmem:[%s6426_s7 + $0x30] sm:$0xff]  ;;  %v433_v23 = vld [vmem:[%s6426_s7 + $0x38] sm:$0xff] }
  0x58   : > { %600 = vmatpush.bf16.msra.mxu0 %v5718_v47  ;;  %6170 = vmatpush.bf16.msra.mxu2 %v5718_v47  ;;  %v454_v24 = vld [vmem:[%s6426_s7 + $0xe0] sm:$0xff]  ;;  %v455_v25 = vld [vmem:[%s6426_s7 + $0xe8] sm:$0xff]  ;;  %v511_v26 = vpack.c.bf16 %v433_v23, %v432_v22  ;;  %v473_v29 = vld [vmem:[%s9007_s1 + $0x30] sm:$0xff] }
  0x59   : > { %840 = vperm.xlu2 %6229, %v468_v1   ;;  %v522_v27 = vpack.c.bf16 %v455_v25, %v454_v24  ;;  %v496_v28 = vld [vmem:[%s9007_s1 + $0xe8] sm:$0xff]  ;;  %v477_v31 = vld [vmem:[%s9007_s1 + $0x50] sm:$0xff]  ;;  %v474_v32 = vld [vmem:[%s9007_s1 + $0x38] sm:$0xff] }
  0x5a   : > { %v476_v30 = vld [vmem:[%s9007_s1 + $0x48] sm:$0xff]  ;;  %v434_v33 = vld [vmem:[%s6426_s7 + $0x40] sm:$0xff]  ;;  %v456_v35 = vld [vmem:[%s6426_s7 + $0xf0] sm:$0xff] }
  0x5b   : > { %v435_v34 = vld [vmem:[%s6426_s7 + $0x48] sm:$0xff]  ;;  %v457_v36 = vld [vmem:[%s6426_s7 + $0xf8] sm:$0xff]  ;;  %v499_v40 = vld [vmem:[%s9007_s1 + $0x100] sm:$0xff] }
  0x5c   : > { %601 = vmatpush.bf16.msra.mxu0 %v5717_v48  ;;  %6171 = vmatpush.bf16.msra.mxu2 %v5717_v48  ;;  %v512_v37 = vpack.c.bf16 %v435_v34, %v434_v33  ;;  %v523_v38 = vpack.c.bf16 %v457_v36, %v456_v35  ;;  %v478_v39 = vld [vmem:[%s9007_s1 + $0x58] sm:$0xff]  ;;  %v436_v41 = vld [vmem:[%s6426_s7 + $0x50] sm:$0xff]  ;;  %v458_v43 = vld [vmem:[%s6426_s7 + $0x100] sm:$0xff] }
  0x5d   : > { %v437_v42 = vld [vmem:[%s6426_s7 + $0x58] sm:$0xff]  ;;  %v459_v44 = vld [vmem:[%s6426_s7 + $0x108] sm:$0xff]  ;;  %v497_v48 = vld [vmem:[%s9007_s1 + $0xf0] sm:$0xff] }
  0x5e   : > { %845 = vperm.xlu0 %6227, %v469_v54   ;;  %v513_v45 = vpack.c.bf16 %v437_v42, %v436_v41  ;;  %v524_v46 = vpack.c.bf16 %v459_v44, %v458_v43  ;;  %v5756_v47 = vld [vmem:[%s6431_s11 + $0x78] sm:$0xff]  ;;  %v500_v49 = vld [vmem:[%s9007_s1 + $0x108] sm:$0xff]  ;;  %v5755_v50 = vld [vmem:[%s6431_s11 + $0x70] sm:$0xff] }
  0x5f   : > { %950 = vperm.xlu1 %6228, %v490_v63   ;;  %1453 = vmatpush.bf16.msra.mxu1 %v5756_v47  ;;  %v460_v53 = vld [vmem:[%s6426_s7 + $0x110] sm:$0xff]  ;;  %v461_v54 = vld [vmem:[%s6426_s7 + $0x118] sm:$0xff]  ;;  %v5753_v58 = vld [vmem:[%s6431_s11 + $0x60] sm:$0xff] }
  0x60   : > { %602 = vmatpush.bf16.msra.mxu0 %v5716_v51  ;;  %6172 = vmatpush.bf16.msra.mxu2 %v5716_v51  ;;  %v438_v51 = vld [vmem:[%s6426_s7 + $0x60] sm:$0xff]  ;;  %v525_v57 = vpack.c.bf16 %v461_v54, %v460_v53  ;;  %v501_v59 = vld [vmem:[%s9007_s1 + $0x110] sm:$0xff]  ;;  %v5748_v62 = vld [vmem:[%s6431_s11 + $0x38] sm:$0xff] }
  0x61   : > { %955 = vperm.xlu2 %6229, %v491_v17   ;;  %6175 = vmatpush.bf16.msra.mxu3 %v5756_v47  ;;  %v5752_v63 = vld [vmem:[%s6431_s11 + $0x58] sm:$0xff]  ;;  %v5751_v1 = vld [vmem:[%s6431_s11 + $0x50] sm:$0xff]  ;;  %v479_v3 = vld [vmem:[%s9007_s1 + $0x60] sm:$0xff] }
  0x62   : > { %v482_v4 = vld [vmem:[%s9007_s1 + $0x78] sm:$0xff]  ;;  %v440_v5 = vld [vmem:[%s6426_s7 + $0x70] sm:$0xff]  ;;  %v5746_v6 = vld [vmem:[%s6431_s11 + $0x28] sm:$0xff] }
  0x63   : > { %1454 = vmatpush.bf16.msra.mxu1 %v5755_v50  ;;  %v5745_v11 = vld [vmem:[%s6431_s11 + $0x20] sm:$0xff]  ;;  %v5744_v17 = vld [vmem:[%s6431_s11 + $0x18] sm:$0xff]  ;;  %v5742_v22 = vld [vmem:[%s6431_s11 + $0x8] sm:$0xff] }
  0x64   : > { %603 = vmatpush.bf16.msra.mxu0 %v5715_v52  ;;  %6173 = vmatpush.bf16.msra.mxu2 %v5715_v52  ;;  %v439_v52 = vld [vmem:[%s6426_s7 + $0x68] sm:$0xff]  ;;  %v5749_v14 = vld [vmem:[%s6431_s11 + $0x40] sm:$0xff]  ;;  %v505_v36 = vld [vmem:[%s9007_s1 + $0x130] sm:$0xff] }
  0x65   : > { %6176 = vmatpush.bf16.msra.mxu3 %v5755_v50  ;;  %v514_v56 = vpack.c.bf16 %v439_v52, %v438_v51  ;;  %v5770_v23 = vld [vmem:[%s6431_s11 + $0xe8] sm:$0xff]  ;;  %v442_v24 = vld [vmem:[%s6426_s7 + $0x80] sm:$0xff]  ;;  %v506_v54 = vld [vmem:[%s9007_s1 + $0x138] sm:$0xff] }
  0x66   : > { %850 = vperm.xlu0 %6227, %v470_v0   ;;  %v5747_v0 = vld [vmem:[%s6431_s11 + $0x30] sm:$0xff]  ;;  %v443_v25 = vld [vmem:[%s6426_s7 + $0x88] sm:$0xff]  ;;  %v1162_v43 = vld [vmem:[#allocation2 + $0x4] sm:$0xf] }
  0x67   : > { %855 = vperm.xlu1 %6228, %v471_v2   ;;  %v502_v2 = vld [vmem:[%s9007_s1 + $0x118] sm:$0xff]  ;;  %v1219_v44 = vld [vmem:[#allocation2] sm:$0x8]  ;;  %v1280_v52 = vunpack.c.l.b16 %v1162_v43 }
  0x68   : > { %604 = vmatpush.bf16.msra.mxu0 %v5714_v55  ;;  %6174 = vmatpush.bf16.msra.mxu2 %v5714_v55  ;;  %v5754_v55 = vld [vmem:[%s6431_s11 + $0x68] sm:$0xff]  ;;  %v1279_v51 = vunpack.c.l.b16 %v1219_v44  ;;  %v507_v53 = vld [vmem:[%s9007_s1 + $0x140] sm:$0xf] }
  0x69   : > { %960 = vperm.xlu2 %6229, %v492_v20   ;;  %1455 = vmatpush.bf16.msra.mxu1 %v5754_v55  ;;  %v5771_v20 = vld [vmem:[%s6431_s11 + $0xf0] sm:$0xff] }
  0x6a   : > { %6177 = vmatpush.bf16.msra.mxu3 %v5754_v55 }
  0x6b   : > { %605 = vmatmul.bf16.vlgmr.msra.gmra.mxu0 %v508_v60  ;;  %660 = vmatmul.bf16.vlgmr.msra.gmra.mxu2 %v519_v61  ;;  %v498_v60 = vld [vmem:[%s9007_s1 + $0xf8] sm:$0xff]  ;;  %v481_v61 = vld [vmem:[%s9007_s1 + $0x70] sm:$0xff] }
  0x6c   : > { %1827 = vmatpush.bf16.msrb.mxu2 %v5748_v62 }
  0x6d   : > { %1456 = vmatpush.bf16.msra.mxu1 %v5753_v58 }
  0x6e   : > { %965 = vperm.xlu0 %6227, %v493_v10   ;;  %6178 = vmatpush.bf16.msra.mxu3 %v5753_v58  ;;  %v5750_v10 = vld [vmem:[%s6431_s11 + $0x48] sm:$0xff] }
  0x6f   : > { %860 = vperm.xlu1 %6228, %v472_v9   ;;  %v463_v9 = vld [vmem:[%s6426_s7 + $0x128] sm:$0xff] }
  0x70   : > { %1828 = vmatpush.bf16.msrb.mxu2 %v5747_v0  ;;  %v5766_v58 = vld [vmem:[%s6431_s11 + $0xc8] sm:$0xff] }
  0x71   : > { %865 = vperm.xlu2 %6229, %v473_v29   ;;  %1457 = vmatpush.bf16.msra.mxu1 %v5752_v63  ;;  %v5741_v29 = vld [vmem:[%s6431_s11] sm:$0xff] }
  0x72   : > { %6179 = vmatpush.bf16.msra.mxu3 %v5752_v63  ;;  %v1321_v63 = vpack.c.b16 %v1280_v52, %v1279_v51 }
  0x74   : > { %1829 = vmatpush.bf16.msrb.mxu2 %v5746_v6  ;;  %v5765_v6 = vld [vmem:[%s6431_s11 + $0xc0] sm:$0xff] }
  0x75   : > { %1458 = vmatpush.bf16.msra.mxu1 %v5751_v1 }
  0x76   : > { %970 = vperm.xlu0 %6227, %v494_v18   ;;  %6180 = vmatpush.bf16.msra.mxu3 %v5751_v1  ;;  %v5772_v18 = vld [vmem:[%s6431_s11 + $0xf8] sm:$0xff] }
  0x77   : > { %975 = vperm.xlu1 %6228, %v495_v19   ;;  %2699 = vmatpush.bf16.msrb.mxu0 %v5772_v18  ;;  %v5743_v19 = vld [vmem:[%s6431_s11 + $0x10] sm:$0xff] }
  0x78   : > { %1830 = vmatpush.bf16.msrb.mxu2 %v5745_v11  ;;  %v1343_v11 = vrot.slane %v1321_v63, 3 }
  0x79   : > { %870 = vperm.xlu2 %6229, %v474_v32   ;;  %1459 = vmatpush.bf16.msra.mxu1 %v5750_v10 }
  0x7a   : > { %6181 = vmatpush.bf16.msra.mxu3 %v5750_v10 }
  0x7b   : > { %610 = vmatmul.bf16.gmra.mxu0 %v509_v7  ;;  %665 = vmatmul.bf16.gmra.mxu2 %v520_v8  ;;  %v441_v7 = vld [vmem:[%s6426_s7 + $0x78] sm:$0xff]  ;;  %v462_v8 = vld [vmem:[%s6426_s7 + $0x120] sm:$0xff] }
  0x7c   : > { %v515_v12 = vpack.c.bf16 %v441_v7, %v440_v5  ;;  %v526_v13 = vpack.c.bf16 %v463_v9, %v462_v8  ;;  %1831 = vmatpush.bf16.msrb.mxu2 %v5744_v17  ;;  %2700 = vmatpush.bf16.msrb.mxu0 %v5771_v20  ;;  %v504_v20 = vld [vmem:[%s9007_s1 + $0x128] sm:$0xff] }
  0x7d   : > { %1460 = vmatpush.bf16.msra.mxu1 %v5749_v14 }
  0x7e   : > { %875 = vperm.xlu0 %6227, %v475_v21   ;;  %6182 = vmatpush.bf16.msra.mxu3 %v5749_v14  ;;  %v484_v21 = vld [vmem:[%s9007_s1 + $0x88] sm:$0xff]  ;;  %v1966_v14 = vshll.u32 %v1321_v63, 16 }
  0x7f   : > { %980 = vperm.xlu1 %6228, %v496_v28   ;;  %v6684_v28 = vld [vmem:[%s6406_s9] ss:$0 sm:$0xff] }
  0x80   : > { %1832 = vmatpush.bf16.msrb.mxu2 %v5743_v19  ;;  %2701 = vmatpush.bf16.msrb.mxu0 %v5770_v23 }
  0x81   : > { %985 = vperm.xlu2 %6229, %v497_v48  }
  0x84   : > { %1833 = vmatpush.bf16.msrb.mxu2 %v5742_v22 }
  0x86   : > { %880 = vperm.xlu0 %6227, %v476_v30   ;;  %v5769_v30 = vld [vmem:[%s6431_s11 + $0xe0] sm:$0xff] }
  0x87   : > { %885 = vperm.xlu1 %6228, %v477_v31   ;;  %v516_v31 = vpack.c.bf16 %v443_v25, %v442_v24  ;;  %2702 = vmatpush.bf16.msrb.mxu0 %v5769_v30 }
  0x88   : > { %1834 = vmatpush.bf16.msrb.mxu2 %v5741_v29 }
  0x89   : > { %990 = vperm.xlu2 %6229, %v498_v60   ;;  %v445_v60 = vld [vmem:[%s6426_s7 + $0x98] sm:$0xff] }
  0x8b   : > { %615 = vmatmul.bf16.gmra.mxu0 %v510_v15  ;;  %670 = vmatmul.bf16.gmra.mxu2 %v521_v16  ;;  %v483_v15 = vld [vmem:[%s9007_s1 + $0x80] sm:$0xff]  ;;  %v480_v16 = vld [vmem:[%s9007_s1 + $0x68] sm:$0xff] }
  0x8e   : > { %995 = vperm.xlu0 %6227, %v499_v40  }
  0x8f   : > { %890 = vperm.xlu1 %6228, %v478_v39   ;;  %v5768_v39 = vld [vmem:[%s6431_s11 + $0xd8] sm:$0xff] }
  0x90   : > { %2703 = vmatpush.bf16.msrb.mxu0 %v5768_v39 }
  0x91   : > { %895 = vperm.xlu2 %6229, %v479_v3  }
  0x96   : > { %1000 = vperm.xlu0 %6227, %v500_v49  }
  0x97   : > { %1005 = vperm.xlu1 %6228, %v501_v59   ;;  %v444_v59 = vld [vmem:[%s6426_s7 + $0x90] sm:$0xff] }
  0x99   : > { %900 = vperm.xlu2 %6229, %v480_v16  }
  0x9b   : > { %620 = vmatmul.bf16.gmra.mxu0 %v511_v26  ;;  %675 = vmatmul.bf16.gmra.mxu2 %v522_v27  ;;  %v464_v26 = vld [vmem:[%s6426_s7 + $0x130] sm:$0xff]  ;;  %v465_v27 = vld [vmem:[%s6426_s7 + $0x138] sm:$0xff] }
  0x9c   : > { %v527_v32 = vpack.c.bf16 %v465_v27, %v464_v26 }
  0x9e   : > { %905 = vperm.xlu0 %6227, %v481_v61   ;;  %v466_v61 = vld [vmem:[%s6426_s7 + $0x140] sm:$0xf] }
  0x9f   : > { %1010 = vperm.xlu1 %6228, %v502_v2   ;;  %v528_v5 = vpack.c.bf16 %v466_v61, %v466_v61 }
  0xa6   : > { %910 = vperm.xlu0 %6227, %v482_v4   ;;  %v517_v4 = vpack.c.bf16 %v445_v60, %v444_v59  ;;  %v446_v59 = vld [vmem:[%s6426_s7 + $0xa0] sm:$0xff]  ;;  %v447_v60 = vld [vmem:[%s6426_s7 + $0xa8] sm:$0xff] }
  0xa7   : > { %915 = vperm.xlu1 %6228, %v483_v15  }
  0xab   : > { %625 = vmatmul.bf16.gmra.mxu0 %v512_v37  ;;  %680 = vmatmul.bf16.gmra.mxu2 %v523_v38  ;;  %v6701_v49 = vpop.permute.xlu2 %945 }
  0xac   : > { %9104 = vst [vmem:[#allocation5_spill] sm:$0xff] %v6701_v49 }
  0xae   : > { %1025 = vperm.xlu0 %6227, %v505_v36  }
  0xaf   : > { %920 = vperm.xlu1 %6228, %v484_v21  }
  0xb3   : > { %v6726_v15 = vpop.permute.xlu2 %840 }
  0xb4   : > { %9107 = vst [vmem:[#allocation8_spill] sm:$0xff] %v6726_v15 }
  0xb6   : > { %1030 = vperm.xlu0 %6227, %v506_v54  }
  0xb7   : > { %1035 = vperm.xlu1 %6228, %v507_v53   ;;  %v2278_v53 = vld [vmem:[#allocation2 + $0x8] sm:$0x8] }
  0xbb   : > { %630 = vmatmul.bf16.gmra.mxu0 %v513_v45  ;;  %685 = vmatmul.bf16.gmra.mxu2 %v524_v46  ;;  %v1161_v45 = vld [vmem:[#allocation2] sm:$0xc]  ;;  %v5767_v46 = vld [vmem:[%s6431_s11 + $0xd0] sm:$0xff] }
  0xbc   : > { %2704 = vmatpush.bf16.msrb.mxu0 %v5767_v46  ;;  %v1567_v55 = vunpack.c.l.b16 %v1161_v45 }
  0xbe   : > { %v1568_v1 = vpack.c.b16 %v1280_v52, %v1567_v55  ;;  %v6750_v55 = vpop.permute.xlu2 %955 }
  0xbf   : > { %9110 = vst [vmem:[#allocation11_spill] sm:$0xff] %v6750_v55 }
  0xc0   : > { %v6688_v33 = vpop.permute.xlu0 %835  ;;  %2705 = vmatpush.bf16.msrb.mxu0 %v5766_v58  ;;  %v1574_v22 = vshll.u32 %v1568_v1, 16 }
  0xc1   : > { %9102 = vst [vmem:[#allocation3_spill] sm:$0xff] %v6688_v33  ;;  %v6694_v38 = vpop.permute.xlu1 %935 }
  0xc2   : > { %9103 = vst [vmem:[#allocation4_spill] sm:$0xff] %v6694_v38  ;;  %v1576_v43 = vrot.slane %v1574_v22, 3 }
  0xc4   : > { %2706 = vmatpush.bf16.msrb.mxu0 %v5765_v6 }
  0xc8   : > { %v6703_v50 = vpop.permute.xlu0 %930 }
  0xc9   : > { %9105 = vst [vmem:[#allocation6_spill] sm:$0xff] %v6703_v50  ;;  %v6719_v62 = vpop.permute.xlu1 %940 }
  0xca   : > { %9106 = vst [vmem:[#allocation7_spill] sm:$0xff] %v6719_v62 }
  0xcb   : > { %635 = vmatmul.bf16.gmra.mxu0 %v514_v56  ;;  %690 = vmatmul.bf16.gmra.mxu2 %v525_v57  ;;  %v503_v57 = vld [vmem:[%s9007_s1 + $0x120] sm:$0xff] }
  0xcc   : > { %1015 = vperm.xlu2 %6229, %v503_v57   ;;  %v485_v57 = vld [vmem:[%s9007_s1 + $0x90] sm:$0xff] }
  0xd0   : > { %v6728_v18 = vpop.permute.xlu0 %845 }
  0xd1   : > { %9108 = vst [vmem:[#allocation9_spill] sm:$0xff] %v6728_v18 }
  0xd4   : > { %1020 = vperm.xlu2 %6229, %v504_v20  }
  0xd8   : > { %v6771_v20 = vpop.permute.xlu0 %850 }
  0xd9   : > { %9111 = vst [vmem:[#allocation12_spill] sm:$0xff] %v6771_v20 }
  0xdb   : > { %640 = vmatmul.bf16.gmra.mxu0 %v515_v12  ;;  %695 = vmatmul.bf16.gmra.mxu2 %v526_v13  ;;  %v1571_v12 = vshrl.u32 %v1568_v1, 16  ;;  %v1963_v13 = vshrl.u32 %v1321_v63, 16 }
  0xdc   : > { %925 = vperm.xlu2 %6229, %v485_v57  }
  0xdd   : > { %v1965_v36 = vrot.slane %v1963_v13, 3 }
  0xe0   : > { %v6797_v57 = vpop.permute.xlu0 %965 }
  0xe1   : > { %9114 = vst [vmem:[#allocation15_spill] sm:$0xff] %v6797_v57 }
  0xe8   : > { %v606_v34 = vpop.f32.mrf.mxu0 }
  0xe9   : > { %v607_v35 = vadd.f32 %v6684_v28, %v606_v34  ;;  %v6742_v34 = vpop.permute.xlu1 %950 }
  0xea   : > { %9109 = vst [vmem:[#allocation10_spill] sm:$0xff] %v6742_v34 }
  0xeb   : > { %v751_v37 = vmul.f32 0.1, %v607_v35  ;;  %645 = vmatmul.bf16.gmra.mxu0 %v516_v31  ;;  %700 = vmatmul.bf16.gmra.mxu2 %v527_v32  ;;  %vm710_vm0 = vcmp.gt.f32.partialorder %v607_v35, 0.0 }
  0xed   : > { %v792_v40 = vsel %vm710_vm0, %v607_v35, %v751_v37  ;;  %v1573_v35 = vrot.slane %v1571_v12, 2  ;;  %v1968_v37 = vrot.slane %v1966_v14, 4 }
  0xee   : > { %v1038_v41 = vmul.f32 %v6688_v33, %v792_v40  ;;  %v6698_v42 = vpop.f32.mrf.mxu2 }
  0xef   : > { %v1969_v58 = vor.u32 %v1968_v37, %v1965_v36 }
  0xf0   : > { %v1079_v47 = vpack.c.bf16 %v1038_v41, %v1038_v41  ;;  %v608_v48 = vpop.f32.mrf.mxu0 }
  0xf1   : > { %v609_v56 = vadd.f32 %v6684_v28, %v608_v48 }
  0xf2   : > { %1120 = vst [vmem:[#allocation2 + $0xc] sm:$0xf] %v1079_v47 }
  0xf3   : > { %v752_v2 = vmul.f32 0.1, %v609_v56  ;;  %vm711_vm1 = vcmp.gt.f32.partialorder %v609_v56, 0.0 }
  0xf5   : > { %v793_v16 = vsel %vm711_vm1, %v609_v56, %v752_v2 }
  0xf6   : > { %v663_v0 = vpop.f32.mrf.mxu2  ;;  %v1039_v29 = vmul.f32 %v6726_v15, %v793_v16 }
  0xf7   : > { %v664_v3 = vadd.f32 %v6684_v28, %v663_v0  ;;  %v2379_v0 = vunpack.c.l.b16 %v2278_v53 }
  0xf8   : > { %v611_v7 = vpop.f32.mrf.mxu0 }
  0xf9   : > { %v774_v8 = vmul.f32 0.1, %v664_v3  ;;  %v612_v9 = vadd.f32 %v6684_v28, %v611_v7  ;;  %v6724_v10 = vld [vmem:[#allocation2 + $0x8] sm:$0xff]  ;;  %vm733_vm2 = vcmp.gt.f32.partialorder %v664_v3, 0.0 }
  0xfa   : > { %v1344_v19 = vrot.slane %v6724_v10, 3  ;;  %v1579_v25 = vshrl.u32 %v6724_v10, 16  ;;  %v1582_v26 = vshll.u32 %v6724_v10, 16  ;;  %v2279_v27 = vld [vmem:[#allocation2 + $0xc] sm:$0xf] }
  0xfb   : > { %v753_v17 = vmul.f32 0.1, %v612_v9  ;;  %650 = vmatmul.bf16.gmra.mxu0 %v517_v4  ;;  %705 = vmatmul.bf16.gmra.mxu2 %v528_v5  ;;  %vm712_vm4 = vcmp.gt.f32.partialorder %v612_v9, 0.0  ;;  %v815_v21 = vsel %vm733_vm2, %v664_v3, %v774_v8  ;;  %v2380_v44 = vunpack.c.l.b16 %v2279_v27 }
  0xfc   : > { %v1345_v24 = vsel %vm1342_vm3, %v1343_v11, %v1344_v19  ;;  %v1061_v41 = vmul.f32 %v6742_v34, %v815_v21  ;;  %v1970_v46 = vrot.slane %v1579_v25, 3  ;;  %v1971_v47 = vrot.slane %v1582_v26, 4 }
  0xfd   : > { %v794_v23 = vsel %vm712_vm4, %v612_v9, %v753_v17  ;;  %1461 = vmatmul.bf16.vlgmr.msra.gmra.mxu1 %v1345_v24  ;;  %v1581_v51 = vrot.slane %v1579_v25, 2  ;;  %v1584_v52 = vrot.slane %v1582_v26, 3  ;;  %v1577_v4 = vor.u32 %v1576_v43, %v1573_v35 }
  0xfe   : > { %v1040_v30 = vmul.f32 %v6728_v18, %v794_v23  ;;  %v666_v31 = vpop.f32.mrf.mxu2  ;;  %v1972_v1 = vor.u32 %v1971_v47, %v1970_v46  ;;  %v518_v8 = vpack.c.bf16 %v447_v60, %v446_v59  ;;  %v2421_v17 = vpack.c.b16 %v2380_v44, %v2379_v0  ;;  %v6773_v23 = vpop.permute.xlu1 %855 }
  0xff   : > { %v667_v32 = vadd.f32 %v6684_v28, %v666_v31  ;;  %v6760_v5 = vor.u32 %v1584_v52, %v1581_v51  ;;  %9112 = vst [vmem:[#allocation13_spill] sm:$0xff] %v6773_v23 }
 0x100   : > { %v6744_v39 = vpack.c.bf16 %v1040_v30, %v1039_v29  ;;  %v613_v40 = vpop.f32.mrf.mxu0  ;;  %v6764_v9 = vsel %vm1961_vm6, %v1969_v58, %v1972_v1  ;;  %v2443_v46 = vshrl.u32 %v2421_v17, 16  ;;  %v2446_v10 = vshll.u32 %v2421_v17, 16 }
 0x101   : > { %v775_v45 = vmul.f32 0.1, %v667_v32  ;;  %vm734_vm5 = vcmp.gt.f32.partialorder %v667_v32, 0.0  ;;  %v614_v48 = vadd.f32 %v6684_v28, %v613_v40  ;;  %v1586_v16 = vsel %vm1569_vm7, %v1577_v4, %v6760_v5 }
 0x102   : > { %6003 = vst [vmem:[#allocation2 + $0x10] sm:$0xff] %v6744_v39   ;;  %v5929_v54 = vunpack.c.l.b16 %v6744_v39  ;;  %v2451_v27 = vshrl.u32 %v6744_v39, 16  ;;  %v2454_v31 = vshll.u32 %v6744_v39, 16  ;;  %v2445_v60 = vrot.slane %v2443_v46, 3 }
 0x103   : > { %v816_v56 = vsel %vm734_vm5, %v667_v32, %v775_v45  ;;  %v754_v2 = vmul.f32 0.1, %v614_v48  ;;  %vm713_vm8 = vcmp.gt.f32.partialorder %v614_v48, 0.0 }
 0x104   : > { %v1062_v61 = vmul.f32 %v6750_v55, %v816_v56  ;;  %v6758_v63 = vpack.c.b16 %v5929_v54, %v2380_v44  ;;  %v2453_v47 = vrot.slane %v2451_v27, 3  ;;  %v2456_v39 = vrot.slane %v2454_v31, 4 }
 0x105   : > { %v795_v14 = vsel %vm713_vm8, %v614_v48, %v754_v2  ;;  %v6790_v48 = vpop.permute.xlu2 %960 }
 0x106   : > { %v668_v3 = vpop.f32.mrf.mxu2  ;;  %v5890_v6 = vpack.c.bf16 %v1062_v61, %v1061_v41  ;;  %v1041_v32 = vmul.f32 %v6771_v20, %v795_v14  ;;  %9113 = vst [vmem:[#allocation14_spill] sm:$0xff] %v6790_v48  ;;  %v2448_v61 = vrot.slane %v2446_v10, 4 }
 0x107   : > { %v669_v7 = vadd.f32 %v6684_v28, %v668_v3 }
 0x108   : > { %v616_v11 = vpop.f32.mrf.mxu0  ;;  %6014 = vst [vmem:[#allocation2 + $0x68] sm:$0xff] %v5890_v6   ;;  %v6806_v6 = vor.u32 %v2456_v39, %v2453_v47 }
 0x109   : > { %v617_v12 = vadd.f32 %v6684_v28, %v616_v11  ;;  %v6767_v13 = vld [vmem:[#allocation2 + $0x10] sm:$0xff]  ;;  %v776_v21 = vmul.f32 0.1, %v669_v7  ;;  %vm735_vm10 = vcmp.gt.f32.partialorder %v669_v7, 0.0 }
 0x10a   : > { %v1346_v24 = vrot.slane %v6767_v13, 3  ;;  %v1588_v25 = vshrl.u32 %v6767_v13, 16  ;;  %v1591_v26 = vshll.u32 %v6767_v13, 16  ;;  %v6832_v13 = vpop.permute.xlu0 %970 }
 0x10b   : > { %v755_v22 = vmul.f32 0.1, %v617_v12  ;;  %655 = vmatmul.bf16.gmra.mxu0 %v518_v8  ;;  %1835 = vmatmul.bf16.vlgmr.msrb.gmra.mxu2 %v1586_v16  ;;  %vm714_vm9 = vcmp.gt.f32.partialorder %v617_v12, 0.0  ;;  %v817_v41 = vsel %vm735_vm10, %v669_v7, %v776_v21  ;;  %9117 = vst [vmem:[#allocation18_spill] sm:$0xff] %v6832_v13 }
 0x10c   : > { %v1347_v30 = vsel %vm1342_vm3, %v1344_v19, %v1346_v24  ;;  %v1974_v37 = vrot.slane %v1588_v25, 3  ;;  %v1975_v43 = vrot.slane %v1591_v26, 4  ;;  %v1063_v53 = vmul.f32 %v6790_v48, %v817_v41 }
 0x10d   : > { %v796_v29 = vsel %vm714_vm9, %v617_v12, %v755_v22  ;;  %1466 = vmatmul.bf16.gmra.mxu1 %v1347_v30  ;;  %v1590_v54 = vrot.slane %v1588_v25, 2  ;;  %v1593_v56 = vrot.slane %v1591_v26, 3  ;;  %v2449_v12 = vor.u32 %v2448_v61, %v2445_v60  ;;  %v6817_v22 = vpop.permute.xlu1 %860  ;;  %v6819_v27 = vpop.permute.xlu2 %865 }
 0x10e   : > { %v1042_v35 = vmul.f32 %v6773_v23, %v796_v29  ;;  %v671_v36 = vpop.f32.mrf.mxu2  ;;  %v6792_v51 = vor.u32 %v1975_v43, %v1974_v37  ;;  %9115 = vst [vmem:[#allocation16_spill] sm:$0xff] %v6817_v22 }
 0x10f   : > { %v672_v40 = vadd.f32 %v6684_v28, %v671_v36  ;;  %v6804_v4 = vor.u32 %v1593_v56, %v1590_v54  ;;  %v2458_v21 = vsel %vm1961_vm6, %v2449_v12, %v6806_v6  ;;  %9116 = vst [vmem:[#allocation17_spill] sm:$0xff] %v6819_v27 }
 0x110   : > { %v6788_v44 = vpack.c.bf16 %v1042_v35, %v1041_v32  ;;  %v618_v45 = vpop.f32.mrf.mxu0  ;;  %v6801_v59 = vsel %vm1961_vm6, %v1972_v1, %v6792_v51 }
 0x111   : > { %v777_v19 = vmul.f32 0.1, %v672_v40  ;;  %vm736_vm11 = vcmp.gt.f32.partialorder %v672_v40, 0.0  ;;  %v619_v52 = vadd.f32 %v6684_v28, %v618_v45  ;;  %v1595_v17 = vsel %vm1569_vm7, %v6760_v5, %v6804_v4 }
 0x112   : > { %6004 = vst [vmem:[#allocation2 + $0x18] sm:$0xff] %v6788_v44   ;;  %v2460_v5 = vshrl.u32 %v6788_v44, 16  ;;  %v2463_v36 = vshll.u32 %v6788_v44, 16 }
 0x113   : > { %v818_v58 = vsel %vm736_vm11, %v672_v40, %v777_v19  ;;  %v756_v2 = vmul.f32 0.1, %v619_v52  ;;  %vm715_vm12 = vcmp.gt.f32.partialorder %v619_v52, 0.0 }
 0x114   : > { %v1064_v0 = vmul.f32 %v6797_v57, %v818_v58  ;;  %v2462_v39 = vrot.slane %v2460_v5, 3  ;;  %v6862_v5 = vpop.permute.xlu0 %875 }
 0x115   : > { %v797_v16 = vsel %vm715_vm12, %v619_v52, %v756_v2  ;;  %v6838_v60 = vpop.permute.xlu1 %975  ;;  %9120 = vst [vmem:[#allocation21_spill] sm:$0xff] %v6862_v5  ;;  %vm4384_vm12 = vsmask.f32 6400 }
 0x116   : > { %v673_v3 = vpop.f32.mrf.mxu2  ;;  %v5895_v7 = vpack.c.bf16 %v1064_v0, %v1063_v53  ;;  %v1043_v37 = vmul.f32 %v6817_v22, %v797_v16  ;;  %9118 = vst [vmem:[#allocation19_spill] sm:$0xff] %v6838_v60 }
 0x117   : > { %v674_v8 = vadd.f32 %v6684_v28, %v673_v3 }
 0x118   : > { %v621_v11 = vpop.f32.mrf.mxu0  ;;  %6015 = vst [vmem:[#allocation2 + $0x70] sm:$0xff] %v5895_v7  }
 0x119   : > { %v622_v1 = vadd.f32 %v6684_v28, %v621_v11  ;;  %v6810_v14 = vld [vmem:[#allocation2 + $0x18] sm:$0xff]  ;;  %v778_v25 = vmul.f32 0.1, %v674_v8  ;;  %vm737_vm14 = vcmp.gt.f32.partialorder %v674_v8, 0.0 }
 0x11a   : > { %v1348_v29 = vrot.slane %v6810_v14, 3  ;;  %v1597_v30 = vshrl.u32 %v6810_v14, 16  ;;  %v1600_v31 = vshll.u32 %v6810_v14, 16 }
 0x11b   : > { %v757_v26 = vmul.f32 0.1, %v622_v1  ;;  %1840 = vmatmul.bf16.gmra.mxu2 %v1595_v17  ;;  %2707 = vmatmul.bf16.vlgmr.msrb.gmra.mxu0 %v2458_v21  ;;  %vm716_vm13 = vcmp.gt.f32.partialorder %v622_v1, 0.0  ;;  %v819_v45 = vsel %vm737_vm14, %v674_v8, %v778_v25 }
 0x11c   : > { %v1349_v35 = vsel %vm1342_vm3, %v1346_v24, %v1348_v29  ;;  %v1978_v46 = vrot.slane %v1597_v30, 3  ;;  %v1979_v10 = vrot.slane %v1600_v31, 4  ;;  %v2465_v24 = vrot.slane %v2463_v36, 4 }
 0x11d   : > { %v798_v32 = vsel %vm716_vm13, %v622_v1, %v757_v26  ;;  %1471 = vmatmul.bf16.gmra.mxu1 %v1349_v35  ;;  %v1065_v54 = vmul.f32 %v6832_v13, %v819_v45  ;;  %v1599_v56 = vrot.slane %v1597_v30, 2  ;;  %v1602_v58 = vrot.slane %v1600_v31, 3  ;;  %v6860_v26 = vpop.permute.xlu2 %870 }
 0x11e   : > { %v1044_v40 = vmul.f32 %v6819_v27, %v798_v32  ;;  %v676_v41 = vpop.f32.mrf.mxu2  ;;  %v6834_v44 = vor.u32 %v1979_v10, %v1978_v46  ;;  %v6848_v11 = vor.u32 %v2465_v24, %v2462_v39  ;;  %9119 = vst [vmem:[#allocation20_spill] sm:$0xff] %v6860_v26 }
 0x11f   : > { %v677_v43 = vadd.f32 %v6684_v28, %v676_v41  ;;  %v6846_v8 = vor.u32 %v1602_v58, %v1599_v56  ;;  %v6875_v56 = vpop.permute.xlu1 %980  ;;  %v7328_v23 = vld [vmem:[#allocation2 + $0x70] sm:$0xff] }
 0x120   : > { %v5845_v47 = vpack.c.bf16 %v1044_v40, %v1043_v37  ;;  %v623_v19 = vpop.f32.mrf.mxu0  ;;  %v6843_v0 = vsel %vm1961_vm6, %v6792_v51, %v6834_v44  ;;  %v2467_v25 = vsel %vm1961_vm6, %v6806_v6, %v6848_v11  ;;  %9121 = vst [vmem:[#allocation22_spill] sm:$0xff] %v6875_v56 }
 0x121   : > { %v779_v52 = vmul.f32 0.1, %v677_v43  ;;  %vm738_vm15 = vcmp.gt.f32.partialorder %v677_v43, 0.0  ;;  %v624_v53 = vadd.f32 %v6684_v28, %v623_v19  ;;  %v1604_v21 = vsel %vm1569_vm7, %v6804_v4, %v6846_v8 }
 0x122   : > { %6005 = vst [vmem:[#allocation2 + $0x20] sm:$0xff] %v5845_v47   ;;  %v2469_v36 = vshrl.u32 %v5845_v47, 16  ;;  %v2472_v40 = vshll.u32 %v5845_v47, 16 }
 0x123   : > { %v820_v61 = vsel %vm738_vm15, %v677_v43, %v779_v52  ;;  %v758_v3 = vmul.f32 0.1, %v624_v53  ;;  %vm717_vm0 = vcmp.gt.f32.partialorder %v624_v53, 0.0 }
 0x124   : > { %v1066_v2 = vmul.f32 %v6838_v60, %v820_v61 }
 0x125   : > { %v799_v51 = vsel %vm717_vm0, %v624_v53, %v758_v3  ;;  %v2471_v53 = vrot.slane %v2469_v36, 3 }
 0x126   : > { %v678_v7 = vpop.f32.mrf.mxu2  ;;  %v5900_v12 = vpack.c.bf16 %v1066_v2, %v1065_v54  ;;  %v1045_v41 = vmul.f32 %v6860_v26, %v799_v51  ;;  %v4077_v51 = vld [vmem:[#allocation2 + $0x14] sm:$0xe] }
 0x127   : > { %v679_v1 = vadd.f32 %v6684_v28, %v678_v7  ;;  %v6882_v7 = vld [vmem:[#allocation2 + $0x18] sm:$0xf] }
 0x128   : > { %v626_v14 = vpop.f32.mrf.mxu0  ;;  %6016 = vst [vmem:[#allocation2 + $0x78] sm:$0xff] %v5900_v12   ;;  %v6884_v12 = vpop.permute.xlu2 %985 }
 0x129   : > { %v627_v16 = vadd.f32 %v6684_v28, %v626_v14  ;;  %v6852_v17 = vld [vmem:[#allocation2 + $0x20] sm:$0xff]  ;;  %v780_v30 = vmul.f32 0.1, %v679_v1  ;;  %vm739_vm2 = vcmp.gt.f32.partialorder %v679_v1, 0.0  ;;  %9122 = vst [vmem:[#allocation23_spill] sm:$0xff] %v6884_v12 }
 0x12a   : > { %v1350_v32 = vrot.slane %v6852_v17, 3  ;;  %v1606_v35 = vshrl.u32 %v6852_v17, 16  ;;  %v1609_v4 = vshll.u32 %v6852_v17, 16 }
 0x12b   : > { %v759_v31 = vmul.f32 0.1, %v627_v16  ;;  %1845 = vmatmul.bf16.gmra.mxu2 %v1604_v21  ;;  %2712 = vmatmul.bf16.gmra.mxu0 %v2467_v25  ;;  %vm718_vm1 = vcmp.gt.f32.partialorder %v627_v16, 0.0  ;;  %v821_v10 = vsel %vm739_vm2, %v679_v1, %v780_v30  ;;  %v9013_v21 = vunpack.c.l.b16 %v6882_v7 }
 0x12c   : > { %v1351_v6 = vsel %vm1342_vm3, %v1348_v29, %v1350_v32  ;;  %v1982_v19 = vrot.slane %v1606_v35, 3  ;;  %v1983_v39 = vrot.slane %v1609_v4, 4  ;;  %v2474_v29 = vrot.slane %v2472_v40, 4 }
 0x12d   : > { %v800_v37 = vsel %vm718_vm1, %v627_v16, %v759_v31  ;;  %1476 = vmatmul.bf16.gmra.mxu1 %v1351_v6  ;;  %v1067_v61 = vmul.f32 %v6875_v56, %v821_v10  ;;  %v1608_v2 = vrot.slane %v1606_v35, 2  ;;  %v1611_v3 = vrot.slane %v1609_v4, 3 }
 0x12e   : > { %v1046_v43 = vmul.f32 %v6862_v5, %v800_v37  ;;  %v681_v45 = vpop.f32.mrf.mxu2  ;;  %v6877_v47 = vor.u32 %v1983_v39, %v1982_v19  ;;  %v6895_v35 = vor.u32 %v2474_v29, %v2471_v53  ;;  %v4096_v37 = vunpack.c.l.b16 %v4077_v51  ;;  %v6911_v19 = vpop.permute.xlu0 %880  ;;  %v6927_v51 = vld [vmem:[#allocation2 + $0x1c] sm:$0xff] }
 0x12f   : > { %v682_v46 = vadd.f32 %v6684_v28, %v681_v45  ;;  %v6893_v31 = vor.u32 %v1611_v3, %v1608_v2  ;;  %9123 = vst [vmem:[#allocation24_spill] sm:$0xff] %v6911_v19 }
 0x130   : > { %v6873_v52 = vpack.c.bf16 %v1046_v43, %v1045_v41  ;;  %v628_v24 = vpop.f32.mrf.mxu0  ;;  %v6889_v14 = vsel %vm1961_vm6, %v6834_v44, %v6877_v47  ;;  %v6903_v41 = vpack.c.b16 %v9013_v21, %v4096_v37  ;;  %v2476_v10 = vsel %vm1961_vm6, %v6848_v11, %v6895_v35 }
 0x131   : > { %v781_v54 = vmul.f32 0.1, %v682_v46  ;;  %vm740_vm4 = vcmp.gt.f32.partialorder %v682_v46, 0.0  ;;  %v629_v58 = vadd.f32 %v6684_v28, %v628_v24  ;;  %v6913_v24 = vpop.permute.xlu1 %885 }
 0x132   : > { %6006 = vst [vmem:[#allocation2 + $0x28] sm:$0xff] %v6873_v52  }
 0x133   : > { %v822_v1 = vsel %vm740_vm4, %v682_v46, %v781_v54  ;;  %v760_v25 = vmul.f32 0.1, %v629_v58  ;;  %vm719_vm5 = vcmp.gt.f32.partialorder %v629_v58, 0.0  ;;  %v1613_v46 = vsel %vm1569_vm7, %v6846_v8, %v6893_v31  ;;  %9124 = vst [vmem:[#allocation25_spill] sm:$0xff] %v6913_v24 }
 0x134   : > { %v1068_v16 = vmul.f32 %v6884_v12, %v822_v1  ;;  %v2478_v8 = vshrl.u32 %v6873_v52, 16 }
 0x135   : > { %v801_v43 = vsel %vm719_vm5, %v629_v58, %v760_v25  ;;  %v2481_v58 = vshll.u32 %v6873_v52, 16 }
 0x136   : > { %v683_v30 = vpop.f32.mrf.mxu2  ;;  %v5905_v4 = vpack.c.bf16 %v1068_v16, %v1067_v61  ;;  %v1047_v2 = vmul.f32 %v6911_v19, %v801_v43  ;;  %v4389_v43 = vshll.u32 %v6903_v41, 16 }
 0x137   : > { %v684_v36 = vadd.f32 %v6684_v28, %v683_v30 }
 0x138   : > { %v631_v6 = vpop.f32.mrf.mxu0  ;;  %6017 = vst [vmem:[#allocation2 + $0x80] sm:$0xff] %v5905_v4   ;;  %v4386_v4 = vshrl.u32 %v6903_v41, 16 }
 0x139   : > { %v632_v44 = vadd.f32 %v6684_v28, %v631_v6  ;;  %v6899_v40 = vld [vmem:[#allocation2 + $0x28] sm:$0xff]  ;;  %v782_v45 = vmul.f32 0.1, %v684_v36  ;;  %vm741_vm9 = vcmp.gt.f32.partialorder %v684_v36, 0.0  ;;  %v6933_v6 = vpop.permute.xlu2 %990 }
 0x13a   : > { %v1352_v53 = vrot.slane %v6899_v40, 3  ;;  %v1615_v54 = vshrl.u32 %v6899_v40, 16  ;;  %v1618_v29 = vshll.u32 %v6899_v40, 16  ;;  %9125 = vst [vmem:[#allocation26_spill] sm:$0xff] %v6933_v6 }
 0x13b   : > { %v761_v39 = vmul.f32 0.1, %v632_v44  ;;  %1850 = vmatmul.bf16.gmra.mxu2 %v1613_v46  ;;  %2717 = vmatmul.bf16.gmra.mxu0 %v2476_v10  ;;  %vm720_vm8 = vcmp.gt.f32.partialorder %v632_v44, 0.0  ;;  %v823_v16 = vsel %vm741_vm9, %v684_v36, %v782_v45 }
 0x13c   : > { %v1353_v61 = vsel %vm1342_vm3, %v1350_v32, %v1352_v53  ;;  %v1986_v30 = vrot.slane %v1615_v54, 3  ;;  %v1987_v52 = vrot.slane %v1618_v29, 4  ;;  %v2480_v32 = vrot.slane %v2478_v8, 3 }
 0x13d   : > { %v802_v11 = vsel %vm720_vm8, %v632_v44, %v761_v39  ;;  %1481 = vmatmul.bf16.gmra.mxu1 %v1353_v61  ;;  %v2483_v44 = vrot.slane %v2481_v58, 4  ;;  %v1069_v36 = vmul.f32 %v6933_v6, %v823_v16  ;;  %v1617_v39 = vrot.slane %v1615_v54, 2 }
 0x13e   : > { %v1048_v3 = vmul.f32 %v6913_v24, %v802_v11  ;;  %v686_v1 = vpop.f32.mrf.mxu2  ;;  %v6937_v45 = vor.u32 %v1987_v52, %v1986_v30  ;;  %v1620_v11 = vrot.slane %v1618_v29, 3  ;;  %v9015_v61 = vshll.u32 %v6927_v51, 16 }
 0x13f   : > { %v687_v25 = vadd.f32 %v6684_v28, %v686_v1  ;;  %v9014_v1 = vshrl.u32 %v6927_v51, 16  ;;  %v4388_v16 = vrot.slane %v4386_v4, 1  ;;  %v4391_v30 = vrot.slane %v4389_v43, 2 }
 0x140   : > { %v6931_v37 = vpack.c.bf16 %v1048_v3, %v1047_v2  ;;  %v633_v17 = vpop.f32.mrf.mxu0  ;;  %v6942_v2 = vpop.permute.xlu0 %995  ;;  %v6947_v58 = vsel %vm1961_vm6, %v6877_v47, %v6937_v45  ;;  %v6951_v52 = vor.u32 %v2483_v44, %v2480_v32  ;;  %v4394_v54 = vrot.slane %v9015_v61, 2  ;;  %v6991_v61 = vld [vmem:[#allocation2 + $0x24] sm:$0xff] }
 0x141   : > { %v783_v46 = vmul.f32 0.1, %v687_v25  ;;  %vm742_vm10 = vcmp.gt.f32.partialorder %v687_v25, 0.0  ;;  %v634_v10 = vadd.f32 %v6684_v28, %v633_v17  ;;  %9126 = vst [vmem:[#allocation27_spill] sm:$0xff] %v6942_v2  ;;  %v6955_v21 = vor.u32 %v1620_v11, %v1617_v39 }
 0x142   : > { %6007 = vst [vmem:[#allocation2 + $0x30] sm:$0xff] %v6931_v37   ;;  %v4393_v47 = vrot.slane %v9014_v1, 1  ;;  %v4392_v4 = vor.u32 %v4391_v30, %v4388_v16  ;;  %v2485_v43 = vsel %vm1961_vm6, %v6895_v35, %v6951_v52  ;;  %v6975_v16 = vpop.permute.xlu1 %890  ;;  %vm3135_vm8 = vsmask.f32 7424 }
 0x143   : > { %v824_v8 = vsel %vm742_vm10, %v687_v25, %v783_v46  ;;  %v762_v29 = vmul.f32 0.1, %v634_v10  ;;  %vm721_vm11 = vcmp.gt.f32.partialorder %v634_v10, 0.0  ;;  %9128 = vst [vmem:[#allocation29_spill] sm:$0xff] %v6975_v16 }
 0x144   : > { %v1070_v3 = vmul.f32 %v6942_v2, %v824_v8  ;;  %v6960_v32 = vor.u32 %v4394_v54, %v4393_v47  ;;  %v6977_v54 = vpop.permute.xlu2 %895 }
 0x145   : > { %9129 = vst [vmem:[#allocation30_spill] sm:$0xff] %v6977_v54 }
 0x146   : > { %v688_v17 = vpop.f32.mrf.mxu2  ;;  %v5910_v25 = vpack.c.bf16 %v1070_v3, %v1069_v36  ;;  %v803_v36 = vsel %vm721_vm11, %v634_v10, %v762_v29  ;;  %v1622_v3 = vsel %vm1569_vm7, %v6893_v31, %v6955_v21  ;;  %v2487_v31 = vshrl.u32 %v6931_v37, 16 }
 0x147   : > { %v689_v46 = vadd.f32 %v6684_v28, %v688_v17  ;;  %v6973_v17 = vsel %vm4384_vm12, %v4392_v4, %v6960_v32  ;;  %v1049_v4 = vmul.f32 %v6975_v16, %v803_v36  ;;  %v5764_v16 = vld [vmem:[%s6431_s11 + $0xb8] sm:$0xff] }
 0x148   : > { %v636_v8 = vpop.f32.mrf.mxu0  ;;  %6018 = vst [vmem:[#allocation2 + $0x88] sm:$0xff] %v5910_v25   ;;  %v2490_v25 = vshll.u32 %v6931_v37, 16  ;;  %v6996_v12 = vpop.permute.xlu0 %1000  ;;  %v2489_v40 = vrot.slane %v2487_v31, 3  ;;  %2124 = vmatpush.bf16.msrb.mxu3 %v5764_v16 }
 0x149   : > { %v637_v44 = vadd.f32 %v6684_v28, %v636_v8  ;;  %v6966_v39 = vld [vmem:[#allocation2 + $0x30] sm:$0xff]  ;;  %v784_v11 = vmul.f32 0.1, %v689_v46  ;;  %9127 = vst [vmem:[#allocation28_spill] sm:$0xff] %v6973_v17  ;;  %vm743_vm14 = vcmp.gt.f32.partialorder %v689_v46, 0.0 }
 0x14a   : > { %v9019_v35 = vrot.slane %v6966_v39, 3  ;;  %v1624_v10 = vshrl.u32 %v6966_v39, 16  ;;  %v1627_v29 = vshll.u32 %v6966_v39, 16  ;;  %9130 = vst [vmem:[#allocation31_spill] sm:$0xff] %v6996_v12 }
 0x14b   : > { %v763_v30 = vmul.f32 0.1, %v637_v44  ;;  %1855 = vmatmul.bf16.gmra.mxu2 %v1622_v3  ;;  %2722 = vmatmul.bf16.gmra.mxu0 %v2485_v43  ;;  %vm722_vm13 = vcmp.gt.f32.partialorder %v637_v44, 0.0  ;;  %v825_v1 = vsel %vm743_vm14, %v689_v46, %v784_v11 }
 0x14c   : > { %v1355_v8 = vsel %vm1342_vm3, %v1352_v53, %v9019_v35  ;;  %v1990_v6 = vrot.slane %v1624_v10, 3  ;;  %v1991_v37 = vrot.slane %v1627_v29, 4  ;;  %v2492_v53 = vrot.slane %v2490_v25, 4 }
 0x14d   : > { %v804_v47 = vsel %vm722_vm13, %v637_v44, %v763_v30  ;;  %1486 = vmatmul.bf16.gmra.mxu1 %v1355_v8  ;;  %v1071_v36 = vmul.f32 %v6996_v12, %v825_v1  ;;  %v1626_v11 = vrot.slane %v1624_v10, 2  ;;  %v1629_v8 = vrot.slane %v1627_v29, 3 }
 0x14e   : > { %v1050_v43 = vmul.f32 %v6977_v54, %v804_v47  ;;  %v691_v3 = vpop.f32.mrf.mxu2  ;;  %v6999_v47 = vor.u32 %v1991_v37, %v1990_v6  ;;  %v9022_v6 = vshrl.u32 %v6991_v61, 16  ;;  %v7013_v25 = vor.u32 %v2492_v53, %v2489_v40 }
 0x14f   : > { %v692_v2 = vadd.f32 %v6684_v28, %v691_v3 }
 0x150   : > { %v6994_v44 = vpack.c.bf16 %v1050_v43, %v1049_v4  ;;  %v638_v30 = vpop.f32.mrf.mxu0  ;;  %v9023_v4 = vshll.u32 %v6991_v61, 16  ;;  %v7004_v43 = vpop.permute.xlu1 %1005  ;;  %v7009_v31 = vsel %vm1961_vm6, %v6937_v45, %v6999_v47  ;;  %v2494_v53 = vsel %vm1961_vm6, %v6951_v52, %v7013_v25 }
 0x151   : > { %v785_v35 = vmul.f32 0.1, %v692_v2  ;;  %vm744_vm15 = vcmp.gt.f32.partialorder %v692_v2, 0.0  ;;  %v639_v46 = vadd.f32 %v6684_v28, %v638_v30  ;;  %9131 = vst [vmem:[#allocation32_spill] sm:$0xff] %v7004_v43  ;;  %v7017_v30 = vor.u32 %v1629_v8, %v1626_v11  ;;  %v7041_v52 = vpop.permute.xlu0 %905 }
 0x152   : > { %6008 = vst [vmem:[#allocation2 + $0x38] sm:$0xff] %v6994_v44   ;;  %v4398_v10 = vrot.slane %v9023_v4, 2 }
 0x153   : > { %v826_v3 = vsel %vm744_vm15, %v692_v2, %v785_v35  ;;  %v764_v29 = vmul.f32 0.1, %v639_v46  ;;  %v4397_v2 = vrot.slane %v9022_v6, 1  ;;  %v3526_v35 = vld [vmem:[#allocation2 + $0x14] sm:$0xf]  ;;  %vm723_vm0 = vcmp.gt.f32.partialorder %v639_v46, 0.0 }
 0x154   : > { %v1072_v1 = vmul.f32 %v7004_v43, %v826_v3  ;;  %9135 = vst [vmem:[#allocation36_spill] sm:$0xff] %v7041_v52  ;;  %v9136_v6 = vrot.slane %v6966_v39, 3 }
 0x155   : > { %v7022_v43 = vor.u32 %v4398_v10, %v4397_v2  ;;  %v805_v8 = vsel %vm723_vm0, %v639_v46, %v764_v29  ;;  %v7039_v10 = vpop.permute.xlu2 %900 }
 0x156   : > { %v693_v37 = vpop.f32.mrf.mxu2  ;;  %v5915_v12 = vpack.c.bf16 %v1072_v1, %v1071_v36  ;;  %v3625_v36 = vunpack.c.l.b16 %v3526_v35  ;;  %v1631_v1 = vsel %vm1569_vm7, %v6955_v21, %v7017_v30  ;;  %9134 = vst [vmem:[#allocation35_spill] sm:$0xff] %v7039_v10  ;;  %v2499_v35 = vshll.u32 %v6994_v44, 16 }
 0x157   : > { %v694_v45 = vadd.f32 %v6684_v28, %v693_v37  ;;  %9132 = vst [vmem:[#allocation33_spill] sm:$0xff] %v7022_v43  ;;  %v2496_v37 = vshrl.u32 %v6994_v44, 16  ;;  %v1051_v56 = vmul.f32 %v7039_v10, %v805_v8 }
 0x158   : > { %v641_v3 = vpop.f32.mrf.mxu0  ;;  %6019 = vst [vmem:[#allocation2 + $0x90] sm:$0xff] %v5915_v12   ;;  %v7037_v12 = vsel %vm4384_vm12, %v6960_v32, %v7022_v43  ;;  %v2501_v34 = vrot.slane %v2499_v35, 4 }
 0x159   : > { %v642_v40 = vadd.f32 %v6684_v28, %v641_v3  ;;  %v7028_v11 = vld [vmem:[#allocation2 + $0x38] sm:$0xff]  ;;  %9133 = vst [vmem:[#allocation34_spill] sm:$0xff] %v7037_v12  ;;  %v786_v2 = vmul.f32 0.1, %v694_v45  ;;  %vm745_vm2 = vcmp.gt.f32.partialorder %v694_v45, 0.0  ;;  %v2498_v39 = vrot.slane %v2496_v37, 3 }
 0x15a   : > { %v9031_v46 = vrot.slane %v7028_v11, 3  ;;  %v1633_v21 = vshrl.u32 %v7028_v11, 16  ;;  %v1636_v29 = vshll.u32 %v7028_v11, 16 }
 0x15b   : > { %v765_v3 = vmul.f32 0.1, %v642_v40  ;;  %1860 = vmatmul.bf16.gmra.mxu2 %v1631_v1  ;;  %2727 = vmatmul.bf16.gmra.mxu0 %v2494_v53  ;;  %vm724_vm1 = vcmp.gt.f32.partialorder %v642_v40, 0.0  ;;  %v9137_v53 = vunpack.c.l.b16 %v6882_v7  ;;  %v827_v48 = vsel %vm745_vm2, %v694_v45, %v786_v2 }
 0x15c   : > { %v1357_v1 = vsel %vm1342_vm3, %v9136_v6, %v9031_v46  ;;  %v1994_v44 = vrot.slane %v1633_v21, 3  ;;  %v7059_v46 = vpop.permute.xlu1 %1010  ;;  %v1635_v45 = vrot.slane %v1633_v21, 2  ;;  %v1638_v2 = vrot.slane %v1636_v29, 3 }
 0x15d   : > { %v806_v32 = vsel %vm724_vm1, %v642_v40, %v765_v3  ;;  %v3666_v4 = vpack.c.b16 %v9137_v53, %v3625_v36  ;;  %1491 = vmatmul.bf16.gmra.mxu1 %v1357_v1  ;;  %v1995_v40 = vrot.slane %v1636_v29, 4  ;;  %9138 = vst [vmem:[#allocation37_spill] sm:$0xff] %v7059_v46  ;;  %v7080_v29 = vpop.permute.xlu0 %910 }
 0x15e   : > { %v1052_v60 = vmul.f32 %v7041_v52, %v806_v32  ;;  %v696_v13 = vpop.f32.mrf.mxu2  ;;  %v7074_v32 = vor.u32 %v2501_v34, %v2498_v39  ;;  %9140 = vst [vmem:[#allocation39_spill] sm:$0xff] %v7080_v29  ;;  %v9141_v34 = vshll.u32 %v6927_v51, 16 }
 0x15f   : > { %v697_v57 = vadd.f32 %v6684_v28, %v696_v13  ;;  %v7061_v7 = vor.u32 %v1995_v40, %v1994_v44  ;;  %v3690_v36 = vshll.u32 %v3666_v4, 16  ;;  %v1073_v13 = vmul.f32 %v7059_v46, %v827_v48 }
 0x160   : > { %v7057_v3 = vpack.c.bf16 %v1052_v60, %v1051_v56  ;;  %v643_v55 = vpop.f32.mrf.mxu0  ;;  %v7066_v60 = vpop.permute.xlu2 %1015  ;;  %v3688_v21 = vshrl.u32 %v3666_v4, 16  ;;  %v3697_v39 = vrot.slane %v9141_v34, 1 }
 0x161   : > { %v787_v6 = vmul.f32 0.1, %v697_v57  ;;  %vm746_vm4 = vcmp.gt.f32.partialorder %v697_v57, 0.0  ;;  %v644_v8 = vadd.f32 %v6684_v28, %v643_v55  ;;  %9139 = vst [vmem:[#allocation38_spill] sm:$0xff] %v7066_v60  ;;  %v7071_v37 = vsel %vm1961_vm6, %v6999_v47, %v7061_v7 }
 0x162   : > { %6009 = vst [vmem:[#allocation2 + $0x40] sm:$0xff] %v7057_v3   ;;  %v3692_v1 = vrot.slane %v3690_v36, 1  ;;  %v7076_v55 = vor.u32 %v1638_v2, %v1635_v45  ;;  %v2503_v36 = vsel %vm1961_vm6, %v7013_v25, %v7074_v32 }
 0x163   : > { %v828_v56 = vsel %vm746_vm4, %v697_v57, %v787_v6  ;;  %v766_v53 = vmul.f32 0.1, %v644_v8  ;;  %vm725_vm5 = vcmp.gt.f32.partialorder %v644_v8, 0.0 }
 0x164   : > { %v1074_v35 = vmul.f32 %v7066_v60, %v828_v56  ;;  %v3693_v47 = vor.u32 %v3692_v1, %v3688_v21  ;;  %v1640_v45 = vsel %vm1569_vm7, %v7017_v30, %v7076_v55  ;;  %v9143_v56 = vshrl.u32 %v6927_v51, 16  ;;  %v7102_v25 = vpop.permute.xlu1 %915 }
 0x165   : > { %v807_v4 = vsel %vm725_vm5, %v644_v8, %v766_v53  ;;  %9144 = vst [vmem:[#allocation41_spill] sm:$0xff] %v7102_v25  ;;  %v2505_v51 = vshrl.u32 %v7057_v3, 16  ;;  %v9145_v21 = vrot.slane %v7028_v11, 3 }
 0x166   : > { %v698_v44 = vpop.f32.mrf.mxu2  ;;  %v7078_v48 = vpack.c.bf16 %v1074_v35, %v1073_v13  ;;  %v7096_v2 = vsel %vm3135_vm8, %v3693_v47, %v3697_v39  ;;  %v7100_v35 = vor.u32 %v9143_v56, %v3697_v39  ;;  %v2508_v47 = vshll.u32 %v7057_v3, 16  ;;  %v7118_v56 = vld [vmem:[%s6406_s9] ss:$0 sm:$0xff] }
 0x167   : > { %v699_v57 = vadd.f32 %v6684_v28, %v698_v44  ;;  %9142 = vst [vmem:[#allocation40_spill] sm:$0xff] %v7096_v2  ;;  %v1053_v34 = vmul.f32 %v7080_v29, %v807_v4 }
 0x168   : > { %v646_v40 = vpop.f32.mrf.mxu0  ;;  %6020 = vst [vmem:[#allocation2 + $0x98] sm:$0xff] %v7078_v48  }
 0x169   : > { %v647_v6 = vadd.f32 %v6684_v28, %v646_v40  ;;  %v7090_v13 = vld [vmem:[#allocation2 + $0x40] sm:$0xff]  ;;  %v788_v28 = vmul.f32 0.1, %v699_v57  ;;  %vm747_vm10 = vcmp.gt.f32.partialorder %v699_v57, 0.0 }
 0x16a   : > { %v9034_v8 = vrot.slane %v7090_v13, 3  ;;  %v1642_v30 = vshrl.u32 %v7090_v13, 16  ;;  %v1645_v53 = vshll.u32 %v7090_v13, 16 }
 0x16b   : > { %v767_v1 = vmul.f32 0.1, %v647_v6  ;;  %1865 = vmatmul.bf16.gmra.mxu2 %v1640_v45  ;;  %2732 = vmatmul.bf16.gmra.mxu0 %v2503_v36  ;;  %vm726_vm9 = vcmp.gt.f32.partialorder %v647_v6, 0.0  ;;  %v5780_v45 = vld [vmem:[%s6431_s11 + $0x138] sm:$0xff] }
 0x16c   : > { %v1359_v40 = vsel %vm1342_vm3, %v9145_v21, %v9034_v8  ;;  %v1998_v46 = vrot.slane %v1642_v30, 3  ;;  %v1999_v11 = vrot.slane %v1645_v53, 4  ;;  %v2507_v8 = vrot.slane %v2505_v51, 3  ;;  %2960 = vmatpush.bf16.msrb.mxu1 %v5780_v45 }
 0x16d   : > { %v808_v44 = vsel %vm726_vm9, %v647_v6, %v767_v1  ;;  %1496 = vmatmul.bf16.gmra.mxu1 %v1359_v40  ;;  %v829_v6 = vsel %vm747_vm10, %v699_v57, %v788_v28  ;;  %v7121_v1 = vpop.permute.xlu0 %1025  ;;  %v2510_v40 = vrot.slane %v2508_v47, 4 }
 0x16e   : > { %v1054_v39 = vmul.f32 %v7102_v25, %v808_v44  ;;  %v701_v36 = vpop.f32.mrf.mxu2  ;;  %9146 = vst [vmem:[#allocation42_spill] sm:$0xff] %v7121_v1  ;;  %v7125_v44 = vpop.permute.xlu2 %1020  ;;  %v7127_v25 = vor.u32 %v1999_v11, %v1998_v46 }
 0x16f   : > { %v702_v60 = vadd.f32 %v7118_v56, %v701_v36  ;;  %9147 = vst [vmem:[#allocation43_spill] sm:$0xff] %v7125_v44  ;;  %v1075_v28 = vmul.f32 %v7125_v44, %v829_v6  ;;  %v1644_v36 = vrot.slane %v1642_v30, 2  ;;  %v7139_v46 = vor.u32 %v2510_v40, %v2507_v8  ;;  %v5778_v30 = vld [vmem:[%s6431_s11 + $0x128] sm:$0xff]  ;;  %v7150_v8 = vpop.permute.xlu1 %920 }
 0x170   : > { %v7123_v21 = vpack.c.bf16 %v1054_v39, %v1053_v34  ;;  %v648_v3 = vpop.f32.mrf.mxu0  ;;  %v1647_v34 = vrot.slane %v1645_v53, 3  ;;  %v5779_v39 = vld [vmem:[%s6431_s11 + $0x130] sm:$0xff]  ;;  %v7136_v51 = vsel %vm1961_vm6, %v7061_v7, %v7127_v25  ;;  %v9148_v7 = vshll.u32 %v6991_v61, 16  ;;  %9149 = vst [vmem:[#allocation44_spill] sm:$0xff] %v7150_v8 }
 0x171   : > { %v789_v4 = vmul.f32 0.1, %v702_v60  ;;  %vm748_vm11 = vcmp.gt.f32.partialorder %v702_v60, 0.0  ;;  %v649_v57 = vadd.f32 %v7118_v56, %v648_v3  ;;  %2961 = vmatpush.bf16.msrb.mxu1 %v5779_v39 }
 0x172   : > { %6010 = vst [vmem:[#allocation2 + $0x48] sm:$0xff] %v7123_v21   ;;  %v7141_v52 = vor.u32 %v1647_v34, %v1644_v36 }
 0x173   : > { %v830_v29 = vsel %vm748_vm11, %v702_v60, %v789_v4  ;;  %v768_v45 = vmul.f32 0.1, %v649_v57  ;;  %vm727_vm13 = vcmp.gt.f32.partialorder %v649_v57, 0.0  ;;  %v2512_v4 = vsel %vm1961_vm6, %v7074_v32, %v7139_v46 }
 0x174   : > { %v1076_v47 = vmul.f32 %v7121_v1, %v830_v29  ;;  %v3705_v29 = vrot.slane %v9148_v7, 1  ;;  %v1649_v39 = vsel %vm1569_vm7, %v7076_v55, %v7141_v52 }
 0x175   : > { %2962 = vmatpush.bf16.msrb.mxu1 %v5778_v30  ;;  %v809_v34 = vsel %vm727_vm13, %v649_v57, %v768_v45  ;;  %v9152_v30 = vshrl.u32 %v6991_v61, 16 }
 0x176   : > { %v703_v11 = vpop.f32.mrf.mxu2  ;;  %v7143_v3 = vpack.c.bf16 %v1076_v47, %v1075_v28  ;;  %v7158_v28 = vpop.permute.xlu0 %1030  ;;  %v5777_v47 = vld [vmem:[%s6431_s11 + $0x120] sm:$0xff]  ;;  %v1055_v61 = vmul.f32 %v7150_v8, %v809_v34  ;;  %v5776_v34 = vld [vmem:[%s6431_s11 + $0x118] sm:$0xff] }
 0x177   : > { %v704_v60 = vadd.f32 %v7118_v56, %v703_v11  ;;  %9150 = vst [vmem:[#allocation45_spill] sm:$0xff] %v7158_v28  ;;  %v7166_v11 = vsel %vm3135_vm8, %v7100_v35, %v3705_v29  ;;  %v7174_v1 = vpop.permute.xlu2 %925  ;;  %v2514_v35 = vshrl.u32 %v7123_v21, 16 }
 0x178   : > { %v651_v53 = vpop.f32.mrf.mxu0  ;;  %6021 = vst [vmem:[#allocation2 + $0xa0] sm:$0xff] %v7143_v3  }
 0x179   : > { %v652_v6 = vadd.f32 %v7118_v56, %v651_v53  ;;  %v7156_v40 = vld [vmem:[#allocation2 + $0x48] sm:$0xff]  ;;  %vm749_vm14 = vcmp.gt.f32.partialorder %v704_v60, 0.0  ;;  %v790_v36 = vmul.f32 0.1, %v704_v60  ;;  %9151 = vst [vmem:[#allocation46_spill] sm:$0xff] %v7166_v11  ;;  %v7170_v53 = vor.u32 %v9152_v30, %v3705_v29  ;;  %2963 = vmatpush.bf16.msrb.mxu1 %v5777_v47 }
 0x17a   : > { %v7172_v7 = vpop.f32.mrf.mxu1  ;;  %9154 = vst [vmem:[#allocation48_spill] sm:$0xff] %v7174_v1  ;;  %v9041_v55 = vrot.slane %v7156_v40, 3  ;;  %v2517_v30 = vshll.u32 %v7123_v21, 16  ;;  %v9048_v47 = vshll.u32 %v7156_v40, 16  ;;  %v7193_v21 = vpop.permute.xlu1 %1035 }
 0x17b   : > { %9153 = vst [vmem:[#allocation47_spill] sm:$0xff] %v7170_v53  ;;  %v769_v32 = vmul.f32 0.1, %v652_v6  ;;  %1870 = vmatmul.bf16.gmra.mxu2 %v1649_v39  ;;  %2737 = vmatmul.bf16.gmra.mxu0 %v2512_v4  ;;  %vm728_vm15 = vcmp.gt.f32.partialorder %v652_v6, 0.0  ;;  %v831_v57 = vsel %vm749_vm14, %v704_v60, %v790_v36  ;;  %v9155_v4 = vrot.slane %v7090_v13, 3 }
 0x17c   : > { %v1077_v45 = vmul.f32 %v7158_v28, %v831_v57  ;;  %v9045_v36 = vshrl.u32 %v7156_v40, 16  ;;  %9156 = vst [vmem:[#allocation49_spill] sm:$0xff] %v7193_v21 }
 0x17d   : > { %v810_v29 = vsel %vm728_vm15, %v652_v6, %v769_v32  ;;  %v1361_v39 = vsel %vm1342_vm3, %v9155_v4, %v9041_v55  ;;  %2964 = vmatpush.bf16.msrb.mxu1 %v5776_v34 }
 0x17e   : > { %v1056_v44 = vmul.f32 %v7174_v1, %v810_v29  ;;  %v706_v10 = vpop.f32.mrf.mxu2  ;;  %1501 = vmatmul.bf16.gmra.mxu1 %v1361_v39  ;;  %v1118_v60 = vpack.c.bf16 %v1077_v45, %v1077_v45  ;;  %v1653_v45 = vrot.slane %v9045_v36, 2  ;;  %v1656_v29 = vrot.slane %v9048_v47, 3  ;;  %v5774_v36 = vld [vmem:[%s6431_s11 + $0x108] sm:$0xff] }
 0x17f   : > { %v707_v6 = vadd.f32 %v7118_v56, %v706_v10  ;;  %v2516_v10 = vrot.slane %v2514_v35, 3 }
 0x180   : > { %v7191_v32 = vpack.c.bf16 %v1056_v44, %v1055_v61  ;;  %v653_v13 = vpop.f32.mrf.mxu0  ;;  %1159 = vst [vmem:[#allocation2 + $0xa8] sm:$0xf] %v1118_v60  ;;  %v2519_v44 = vrot.slane %v2517_v30, 4  ;;  %v5775_v61 = vld [vmem:[%s6431_s11 + $0x110] sm:$0xff]  ;;  %v1657_v1 = vor.u32 %v1656_v29, %v1653_v45 }
 0x181   : > { %v791_v57 = vmul.f32 0.1, %v707_v6  ;;  %vm750_vm0 = vcmp.gt.f32.partialorder %v707_v6, 0.0  ;;  %v654_v4 = vadd.f32 %v7118_v56, %v653_v13  ;;  %2965 = vmatpush.bf16.msrb.mxu1 %v5775_v61 }
 0x182   : > { %6011 = vst [vmem:[#allocation2 + $0x50] sm:$0xff] %v7191_v32   ;;  %v1464_v39 = vpop.f32.mrf.mxu1  ;;  %v2520_v8 = vor.u32 %v2519_v44, %v2516_v10  ;;  %v2526_v10 = vshll.u32 %v7191_v32, 16 }
 0x183   : > { %v832_v60 = vsel %vm750_vm0, %v707_v6, %v791_v57  ;;  %v770_v54 = vmul.f32 0.1, %v654_v4  ;;  %vm729_vm1 = vcmp.gt.f32.partialorder %v654_v4, 0.0  ;;  %v662_v6 = vadd.f32 %v7118_v56, %v6698_v42  ;;  %v5773_v57 = vld [vmem:[%s6431_s11 + $0x100] sm:$0xff] }
 0x184   : > { %v1078_v34 = vmul.f32 %v7193_v21, %v832_v60  ;;  %v2521_v13 = vsel %vm1961_vm6, %v7139_v46, %v2520_v8 }
 0x185   : > { %2966 = vmatpush.bf16.msrb.mxu1 %v5774_v36  ;;  %v811_v45 = vsel %vm729_vm1, %v654_v4, %v770_v54  ;;  %v773_v60 = vmul.f32 0.1, %v662_v6  ;;  %vm732_vm4 = vcmp.gt.f32.partialorder %v662_v6, 0.0 }
 0x186   : > { %v708_v55 = vpop.f32.mrf.mxu2  ;;  %v1119_v28 = vpack.c.bf16 %v1078_v34, %v1078_v34  ;;  %v1057_v46 = vmul.f32 %v6703_v50, %v811_v45 }
 0x187   : > { %v1658_v55 = vsel %vm1569_vm7, %v7141_v52, %v1657_v1  ;;  %v2523_v52 = vshrl.u32 %v7191_v32, 16 }
 0x188   : > { %v656_v47 = vpop.f32.mrf.mxu0  ;;  %1160 = vst [vmem:[#allocation2 + $0xac] sm:$0x3] %v1119_v28 }
 0x189   : > { %v657_v35 = vadd.f32 %v7118_v56, %v656_v47  ;;  %v7206_v30 = vld [vmem:[#allocation2 + $0x50] sm:$0xff]  ;;  %2967 = vmatpush.bf16.msrb.mxu1 %v5773_v57  ;;  %v9157_v47 = vrot.slane %v7156_v40, 3  ;;  %v2525_v45 = vrot.slane %v2523_v52, 3 }
 0x18a   : > { %v1467_v28 = vpop.f32.mrf.mxu1  ;;  %v1362_v36 = vrot.slane %v7206_v30, 3  ;;  %v9050_v61 = vshrl.u32 %v7206_v30, 16  ;;  %v9051_v4 = vshll.u32 %v7206_v30, 16  ;;  %v9171_v19 = vshll.u32 %v7206_v30, 16 }
 0x18b   : > { %vm730_vm2 = vcmp.gt.f32.partialorder %v657_v35, 0.0  ;;  %v771_v29 = vmul.f32 0.1, %v657_v35  ;;  %1875 = vmatmul.bf16.gmra.mxu2 %v1658_v55  ;;  %2742 = vmatmul.bf16.gmra.mxu0 %v2521_v13 }
 0x18c   : > { %v1363_v42 = vsel %vm1342_vm3, %v9157_v47, %v1362_v36  ;;  %v1662_v32 = vrot.slane %v9050_v61, 2  ;;  %v1665_v57 = vrot.slane %v9051_v4, 3  ;;  %v2007_v5 = vrot.slane %v9171_v19, 4 }
 0x18d   : > { %v812_v16 = vsel %vm730_vm2, %v657_v35, %v771_v29  ;;  %v2528_v29 = vrot.slane %v2526_v10, 4 }
 0x18e   : > { %v1058_v54 = vmul.f32 %v6694_v38, %v812_v16  ;;  %v1836_v44 = vpop.f32.mrf.mxu2  ;;  %1506 = vmatmul.bf16.gmra.mxu1 %v1363_v42  ;;  %v814_v16 = vsel %vm732_vm4, %v662_v6, %v773_v60  ;;  %v2613_v38 = vshrl.u32 %v7143_v3, 16 }
 0x18f   : > { %v7226_v34 = vadd.f32 %v1836_v44, %v7172_v7  ;;  %v1060_v44 = vmul.f32 %v6701_v49, %v814_v16 }
 0x190   : > { %v5880_v35 = vpack.c.bf16 %v1058_v54, %v1057_v46  ;;  %v658_v55 = vpop.f32.mrf.mxu0  ;;  %v1666_v54 = vor.u32 %v1665_v57, %v1662_v32  ;;  %v5763_v32 = vld [vmem:[%s6431_s11 + $0xb0] sm:$0xff] }
 0x191   : > { %9158 = vst [vmem:[#allocation50_spill] sm:$0xff] %v7226_v34  ;;  %v659_v13 = vadd.f32 %v7118_v56, %v658_v55  ;;  %v2529_v55 = vor.u32 %v2528_v29, %v2525_v45  ;;  %2125 = vmatpush.bf16.msrb.mxu3 %v5763_v32  ;;  %v2604_v32 = vshrl.u32 %v7078_v48, 16  ;;  %v7747_v34 = vld [vmem:[#allocation2 + $0x34] sm:$0xff]  }
 0x192   : > { %6012 = vst [vmem:[#allocation2 + $0x58] sm:$0xff] %v5880_v35   ;;  %v1469_v42 = vpop.f32.mrf.mxu1  ;;  %v1667_v6 = vsel %vm1569_vm7, %v1657_v1, %v1666_v54  ;;  %v2532_v16 = vshrl.u32 %v5880_v35, 16 }
 0x193   : > { %vm731_vm5 = vcmp.gt.f32.partialorder %v659_v13, 0.0  ;;  %v772_v47 = vmul.f32 0.1, %v659_v13  ;;  %v2530_v10 = vsel %vm1961_vm6, %v2520_v8, %v2529_v55 }
 0x195   : > { %v813_v7 = vsel %vm731_vm5, %v659_v13, %v772_v47  ;;  %v2535_v47 = vshll.u32 %v5880_v35, 16  ;;  %v2607_v35 = vshll.u32 %v7078_v48, 16 }
 0x196   : > { %v1059_v46 = vmul.f32 %v6719_v62, %v813_v7  ;;  %v1838_v56 = vpop.f32.mrf.mxu2 }
 0x197   : > { %v7235_v21 = vadd.f32 %v1838_v56, %v1464_v39  ;;  %v2537_v56 = vrot.slane %v2535_v47, 4  ;;  %v2606_v47 = vrot.slane %v2604_v32, 3 }
 0x198   : > { %v7237_v61 = vpack.c.bf16 %v1060_v44, %v1059_v46  ;;  %v7239_v4 = vpop.f32.mrf.mxu0 }
 0x199   : > { %9159 = vst [vmem:[#allocation51_spill] sm:$0xff] %v7235_v21  ;;  %v7241_v52 = vld [vmem:[#allocation2 + $0x58] sm:$0xff] }
 0x19a   : > { %9160 = vst [vmem:[#allocation52_spill] sm:$0xff] %v7239_v4  ;;  %v1472_v60 = vpop.f32.mrf.mxu1  ;;  %v1364_v13 = vrot.slane %v7241_v52, 3  ;;  %v1669_v45 = vshrl.u32 %v7241_v52, 16  ;;  %v9054_v29 = vshll.u32 %v7241_v52, 16 }
 0x19b   : > { %6013 = vst [vmem:[#allocation2 + $0x60] sm:$0xff] %v7237_v61   ;;  %1880 = vmatmul.bf16.gmra.mxu2 %v1667_v6  ;;  %2747 = vmatmul.bf16.gmra.mxu0 %v2530_v10 }
 0x19c   : > { %v1365_v39 = vsel %vm1342_vm3, %v1362_v36, %v1364_v13  ;;  %v1671_v44 = vrot.slane %v1669_v45, 2  ;;  %v1674_v46 = vrot.slane %v9054_v29, 3  ;;  %v2534_v36 = vrot.slane %v2532_v16, 3 }
 0x19d   : > { %v2609_v29 = vrot.slane %v2607_v35, 4  ;;  %v9166_v35 = vshll.u32 %v7156_v40, 16  ;;  %v2010_v22 = vrot.slane %v1669_v45, 3 }
 0x19e   : > { %v1841_v57 = vpop.f32.mrf.mxu2  ;;  %1511 = vmatmul.bf16.gmra.mxu1 %v1365_v39  ;;  %v7267_v49 = vor.u32 %v2537_v56, %v2534_v36  ;;  %v9165_v56 = vshrl.u32 %v7156_v40, 16  ;;  %v7298_v40 = vld [vmem:[#allocation2 + $0x68] sm:$0xff] }
 0x19f   : > { %v7251_v1 = vadd.f32 %v1841_v57, %v1467_v28  ;;  %v7265_v57 = vor.u32 %v1674_v46, %v1671_v44  ;;  %v2616_v44 = vshll.u32 %v7143_v3, 16  ;;  %v9065_v27 = vrot.slane %v7298_v40, 3 }
 0x1a0   : > { %v7253_v8 = vpop.f32.mrf.mxu0  ;;  %v2539_v48 = vsel %vm1961_vm6, %v2529_v55, %v7267_v49  ;;  %v2002_v32 = vrot.slane %v9165_v56, 3  ;;  %v5762_v56 = vld [vmem:[%s6431_s11 + $0xa8] sm:$0xff]  ;;  %v1687_v19 = vshrl.u32 %v7298_v40, 16 }
 0x1a1   : > { %9161 = vst [vmem:[#allocation53_spill] sm:$0xff] %v7251_v1  ;;  %v1676_v50 = vsel %vm1569_vm7, %v1666_v54, %v7265_v57  ;;  %v2618_v36 = vrot.slane %v2616_v44, 4  ;;  %v2003_v54 = vrot.slane %v9166_v35, 4  ;;  %2126 = vmatpush.bf16.msrb.mxu3 %v5762_v56 }
 0x1a2   : > { %9162 = vst [vmem:[#allocation54_spill] sm:$0xff] %v7253_v8  ;;  %v7255_v7 = vld [vmem:[#allocation2 + $0x60] sm:$0xff]  ;;  %v7259_v6 = vpop.f32.mrf.mxu1 }
 0x1a3   : > { %v1366_v10 = vrot.slane %v7255_v7, 3 }
 0x1a5   : > { %v1367_v28 = vsel %vm1342_vm3, %v1364_v13, %v1366_v10  ;;  %v2615_v13 = vrot.slane %v2613_v38, 3  ;;  %v2544_v38 = vshll.u32 %v7237_v61, 16 }
 0x1a6   : > { %v1843_v39 = vpop.f32.mrf.mxu2  ;;  %1516 = vmatmul.bf16.vlgmr.msra.gmra.mxu3 %v1367_v28  ;;  %v2541_v28 = vshrl.u32 %v7237_v61, 16 }
 0x1a7   : > { %v7269_v62 = vadd.f32 %v1843_v39, %v1469_v42  ;;  %v7281_v42 = vor.u32 %v2609_v29, %v2606_v47  ;;  %v1681_v39 = vshll.u32 %v7255_v7, 16  ;;  %v7292_v29 = vor.u32 %v2618_v36, %v2615_v13  ;;  %v7294_v47 = vld [vmem:[#allocation2 + $0xa8] sm:$0xf] }
 0x1a8   : > { %v7271_v16 = vpop.f32.mrf.mxu0  ;;  %v2543_v13 = vrot.slane %v2541_v28, 3  ;;  %v2546_v36 = vrot.slane %v2544_v38, 4  ;;  %v9172_v38 = vshll.u32 %v7241_v52, 16  ;;  %v1690_v52 = vshll.u32 %v7298_v40, 16 }
 0x1a9   : > { %9163 = vst [vmem:[#allocation55_spill] sm:$0xff] %v7269_v62  ;;  %v7306_v61 = vsel %vm1961_vm6, %v7281_v42, %v7292_v29  ;;  %v1683_v24 = vrot.slane %v1681_v39, 3 }
 0x1aa   : > { %9164 = vst [vmem:[#allocation56_spill] sm:$0xff] %v7271_v16  ;;  %v7279_v46 = vpop.f32.mrf.mxu1  ;;  %v2011_v56 = vrot.slane %v9172_v38, 4 }
 0x1ab   : > { %1885 = vmatmul.bf16.gmra.mxu2 %v1676_v50  ;;  %2752 = vmatmul.bf16.gmra.mxu0 %v2539_v48  ;;  %v1678_v50 = vshrl.u32 %v7255_v7, 16  ;;  %v2004_v48 = vor.u32 %v2003_v54, %v2002_v32  ;;  %v9170_v32 = vshrl.u32 %v7206_v30, 16  ;;  %v9173_v30 = vunpack.c.l.b16 %v7294_v47 }
 0x1ad   : > { %v7310_v7 = vsel %vm1961_vm6, %v7127_v25, %v2004_v48  ;;  %v2006_v54 = vrot.slane %v9170_v32, 3  ;;  %v6002_v25 = vunpack.c.h.b16 %v7143_v3  ;;  %v1369_v32 = vsel %vm1342_vm3, %v1366_v10, %v9065_v27 }
 0x1ae   : > { %v1846_v55 = vpop.f32.mrf.mxu2  ;;  %2968 = vmatmul.bf16.vlgmr.msrb.gmra.mxu1 %v6758_v63  ;;  %9169 = vst [vmem:[#allocation59_spill] sm:$0xff] %v7310_v7  ;;  %v2012_v10 = vor.u32 %v2011_v56, %v2010_v22  ;;  %v2014_v38 = vrot.slane %v1678_v50, 3  ;;  %v7359_v56 = vld [vmem:[#allocation2 + $0x80] sm:$0xff] }
 0x1af   : > { %v7296_v44 = vadd.f32 %v1846_v55, %v1472_v60  ;;  %v1680_v55 = vrot.slane %v1678_v50, 2  ;;  %v2008_v28 = vor.u32 %v2007_v5, %v2006_v54  ;;  %v7326_v60 = vor.u32 %v2546_v36, %v2543_v13  ;;  %v7346_v54 = vld [vmem:[#allocation2 + $0x78] sm:$0xff] }
 0x1b0   : > { %v7301_v35 = vpop.f32.mrf.mxu0  ;;  %v7333_v20 = vpack.c.b16 %v9173_v30, %v6002_v25  ;;  %v9185_v27 = vshrl.u32 %v7346_v54, 16  ;;  %v9186_v53 = vshll.u32 %v7346_v54, 16 }
 0x1b1   : > { %9167 = vst [vmem:[#allocation57_spill] sm:$0xff] %v7296_v44  ;;  %v7335_v5 = vor.u32 %v1683_v24, %v1680_v55  ;;  %v7339_v45 = vsel %vm1961_vm6, %v2004_v48, %v2008_v28  ;;  %v7349_v25 = vsel %vm1961_vm6, %v2008_v28, %v2012_v10  ;;  %v2548_v24 = vsel %vm1961_vm6, %v7267_v49, %v7326_v60  ;;  %v6033_v55 = vld [vmem:[#allocation2 + $0x68] sm:$0xff]   ;;  %v7565_v44 = vld [vmem:[#allocation2 + $0x74] sm:$0xff] }
 0x1b2   : > { %9168 = vst [vmem:[#allocation58_spill] sm:$0xff] %v7301_v35  ;;  %v7317_v26 = vpop.f32.mrf.mxu1  ;;  %v2018_v28 = vrot.slane %v1687_v19, 3  ;;  %v2550_v48 = vshrl.u32 %v6033_v55, 16  ;;  %v2553_v18 = vshll.u32 %v6033_v55, 16  ;;  %v2027_v11 = vrot.slane %v9186_v53, 4 }
 0x1b3   : > { %9174 = vst [vmem:[#allocation60_spill] sm:$0xff] %v7333_v20  ;;  %v9190_v53 = vshll.u32 %v7359_v56, 16  ;;  %v1689_v49 = vrot.slane %v1687_v19, 2 }
 0x1b4   : > { %9175 = vst [vmem:[#allocation61_spill] sm:$0xff] %v7339_v45  ;;  %v2552_v2 = vrot.slane %v2550_v48, 3  ;;  %v1692_v48 = vrot.slane %v1690_v52, 3 }
 0x1b5   : > { %9178 = vst [vmem:[#allocation64_spill] sm:$0xff] %v7349_v25  ;;  %v2031_v12 = vrot.slane %v9190_v53, 4 }
 0x1b6   : > { %v1848_v3 = vpop.f32.mrf.mxu2  ;;  %1521 = vmatmul.bf16.gmra.mxu3 %v1369_v32  ;;  %v2015_v32 = vrot.slane %v1681_v39, 4  ;;  %v7363_v39 = vld [vmem:[#allocation2 + $0x14] sm:$0xff]  }
 0x1b7   : > { %v7342_v13 = vadd.f32 %v1848_v3, %v7259_v6  ;;  %v1685_v6 = vsel %vm1569_vm7, %v7265_v57, %v7335_v5  ;;  %v2019_v3 = vrot.slane %v1690_v52, 4 }
 0x1b8   : > { %v7344_v36 = vpop.f32.mrf.mxu0  ;;  %v2016_v30 = vor.u32 %v2015_v32, %v2014_v38  ;;  %v9180_v38 = vshrl.u32 %v7328_v23, 16 }
 0x1b9   : > { %9176 = vst [vmem:[#allocation62_spill] sm:$0xff] %v7342_v13  ;;  %v2020_v57 = vor.u32 %v2019_v3, %v2018_v28  ;;  %v7535_v13 = vld [vmem:[#allocation2 + $0x5c] sm:$0xff] }
 0x1ba   : > { %9177 = vst [vmem:[#allocation63_spill] sm:$0xff] %v7344_v36  ;;  %v7361_v50 = vpop.f32.mrf.mxu1  ;;  %v7368_v22 = vsel %vm1961_vm6, %v2012_v10, %v2016_v30  ;;  %v2022_v32 = vrot.slane %v9180_v38, 3  ;;  %v5761_v38 = vld [vmem:[%s6431_s11 + $0xa0] sm:$0xff] }
 0x1bb   : > { %1890 = vmatmul.bf16.gmra.mxu2 %v1685_v6  ;;  %2757 = vmatmul.bf16.gmra.mxu0 %v2548_v24  ;;  %9179 = vst [vmem:[#allocation65_spill] sm:$0xff] %v7368_v22  ;;  %v9181_v24 = vshll.u32 %v7328_v23, 16  ;;  %v7377_v33 = vsel %vm1961_vm6, %v2016_v30, %v2020_v57  ;;  %v2555_v30 = vrot.slane %v2553_v18, 4 }
 0x1bc   : > { %9182 = vst [vmem:[#allocation66_spill] sm:$0xff] %v7377_v33  ;;  %2127 = vmatpush.bf16.msrb.mxu3 %v5761_v38  ;;  %v9193_v38 = vrot.slane %v7298_v40, 3 }
 0x1bd   : > { %v2023_v6 = vrot.slane %v9181_v24, 4  ;;  %v2026_v24 = vrot.slane %v9185_v27, 3 }
 0x1be   : > { %v1851_v15 = vpop.f32.mrf.mxu2  ;;  %2973 = vmatmul.bf16.gmra.mxu1 %v7363_v39 }
 0x1bf   : > { %v7380_v10 = vadd.f32 %v1851_v15, %v7279_v46  ;;  %v2024_v55 = vor.u32 %v2023_v6, %v2022_v32  ;;  %v7394_v15 = vld [vmem:[#allocation2 + $0x3c] sm:$0xff]  ;;  %v7396_v46 = vld [vmem:[#allocation2 + $0x44] sm:$0xff]  ;;  %v2028_v32 = vor.u32 %v2027_v11, %v2026_v24  ;;  %v9189_v6 = vshrl.u32 %v7359_v56, 16  ;;  %v7414_v24 = vld [vmem:[#allocation2 + $0x4c] sm:$0xff] }
 0x1c0   : > { %v7383_v3 = vpop.f32.mrf.mxu0  ;;  %9188 = vst [vmem:[#allocation70_spill] sm:$0xff] %v7394_v15  ;;  %v7412_v11 = vor.u32 %v2555_v30, %v2552_v2  ;;  %v9072_v19 = vshll.u32 %v7394_v15, 16  ;;  %v9070_v52 = vshll.u32 %v7396_v46, 16  ;;  %v1693_v2 = vor.u32 %v1692_v48, %v1689_v49 }
 0x1c1   : > { %9183 = vst [vmem:[#allocation67_spill] sm:$0xff] %v7380_v10  ;;  %v7392_v43 = vsel %vm1961_vm6, %v2020_v57, %v2024_v55  ;;  %v2030_v28 = vrot.slane %v9189_v6, 3  ;;  %v7405_v18 = vsel %vm1961_vm6, %v2024_v55, %v2028_v32  ;;  %v9192_v57 = vrot.slane %v7328_v23, 3 }
 0x1c2   : > { %9184 = vst [vmem:[#allocation68_spill] sm:$0xff] %v7383_v3  ;;  %v7400_v27 = vpop.f32.mrf.mxu1  ;;  %v9071_v30 = vshrl.u32 %v7396_v46, 16  ;;  %v7444_v48 = vrot.slane %v9072_v19, 1 }
 0x1c3   : > { %9187 = vst [vmem:[#allocation69_spill] sm:$0xff] %v7392_v43  ;;  %v1371_v43 = vsel %vm1342_vm3, %v9193_v38, %v9192_v57  ;;  %v7416_v6 = vor.u32 %v2031_v12, %v2030_v28  ;;  %v4414_v12 = vrot.slane %v9070_v52, 2  ;;  %v9074_v28 = vshll.u32 %v7414_v24, 16  ;;  %v6034_v57 = vld [vmem:[#allocation2 + $0x70] sm:$0xff]   ;;  %v7452_v52 = vld [vmem:[#allocation2 + $0x1c] sm:$0xff]  }
 0x1c4   : > { %9191 = vst [vmem:[#allocation71_spill] sm:$0xff] %v7405_v18  ;;  %v4413_v49 = vrot.slane %v9071_v30, 1  ;;  %v2562_v18 = vshll.u32 %v6034_v57, 16 }
 0x1c5   : > { %v7425_v40 = vsel %vm1961_vm6, %v2028_v32, %v7416_v6  ;;  %v9077_v32 = vshrl.u32 %v7394_v15, 16  ;;  %9197 = vst [vmem:[#allocation75_spill] sm:$0xff] %v7444_v48 }
 0x1c6   : > { %v1853_v33 = vpop.f32.mrf.mxu2  ;;  %1526 = vmatmul.bf16.gmra.mxu3 %v1371_v43  ;;  %9195 = vst [vmem:[#allocation73_spill] sm:$0xff] %v7425_v40  ;;  %v2557_v43 = vsel %vm1961_vm6, %v7326_v60, %v7412_v11  ;;  %v7459_v19 = vor.u32 %v4414_v12, %v4413_v49  ;;  %v2559_v40 = vshrl.u32 %v6034_v57, 16  ;;  %v9080_v12 = vrot.slane %v7346_v54, 3  ;;  %v7481_v57 = vld [vmem:[#allocation2 + $0x90] sm:$0xff] }
 0x1c7   : > { %v7421_v55 = vadd.f32 %v1853_v33, %v7317_v26  ;;  %v9073_v33 = vshrl.u32 %v7414_v24, 16  ;;  %v1694_v26 = vsel %vm1569_vm7, %v7335_v5, %v1693_v2  ;;  %v4418_v5 = vrot.slane %v9074_v28, 2 }
 0x1c8   : > { %v7427_v53 = vpop.f32.mrf.mxu0  ;;  %v7457_v30 = vor.u32 %v9077_v32, %v7444_v48  ;;  %9198 = vst [vmem:[#allocation76_spill] sm:$0xff] %v7459_v19  ;;  %v9202_v49 = vshrl.u32 %v7328_v23, 16  ;;  %v7479_v48 = vld [vmem:[#allocation2 + $0x88] sm:$0xff] }
 0x1c9   : > { %9194 = vst [vmem:[#allocation72_spill] sm:$0xff] %v7421_v55  ;;  %v4417_v38 = vrot.slane %v9073_v33, 1  ;;  %v9081_v55 = vshrl.u32 %v7479_v48, 16  ;;  %v9082_v3 = vshll.u32 %v7479_v48, 16 }
 0x1ca   : > { %9196 = vst [vmem:[#allocation74_spill] sm:$0xff] %v7427_v53  ;;  %v7446_v60 = vpop.f32.mrf.mxu1 }
 0x1cb   : > { %1895 = vmatmul.bf16.gmra.mxu2 %v1694_v26  ;;  %2762 = vmatmul.bf16.gmra.mxu0 %v2557_v43  ;;  %v7461_v26 = vor.u32 %v4418_v5, %v4417_v38  ;;  %v1698_v38 = vrot.slane %v9202_v49, 2  ;;  %v9203_v5 = vshll.u32 %v7328_v23, 16  ;;  %v9204_v49 = vrot.slane %v7328_v23, 3  ;;  %v6035_v23 = vld [vmem:[#allocation2 + $0x78] sm:$0xff]  }
 0x1cc   : > { %v2034_v17 = vrot.slane %v9081_v55, 3 }
 0x1cd   : > { %v7470_v28 = vsel %vm4384_vm12, %v7459_v19, %v7461_v26  ;;  %v1701_v32 = vrot.slane %v9203_v5, 3  ;;  %v7485_v19 = vld [vmem:[#allocation2 + $0xa0] sm:$0xf]  ;;  %v1373_v5 = vsel %vm1342_vm3, %v9204_v49, %v9080_v12  ;;  %v5760_v49 = vld [vmem:[%s6431_s11 + $0x98] sm:$0xff] }
 0x1ce   : > { %v1856_v43 = vpop.f32.mrf.mxu2  ;;  %2978 = vmatmul.bf16.gmra.mxu1 %v7452_v52  ;;  %9200 = vst [vmem:[#allocation78_spill] sm:$0xff] %v7470_v28  ;;  %v1940_v28 = vld [vmem:[#allocation2 + $0xa4] sm:$0x3]  ;;  %2128 = vmatpush.bf16.msrb.mxu3 %v5760_v49 }
 0x1cf   : > { %v7465_v33 = vadd.f32 %v1856_v43, %v7361_v50  ;;  %v7483_v50 = vld [vmem:[#allocation2 + $0x98] sm:$0xff]  ;;  %v2561_v43 = vrot.slane %v2559_v40, 3  ;;  %v7494_v53 = vor.u32 %v1701_v32, %v1698_v38  ;;  %v9083_v40 = vshll.u32 %v7481_v57, 16 }
 0x1d0   : > { %v7472_v15 = vpop.f32.mrf.mxu0  ;;  %v1959_v10 = vunpack.c.l.b16 %v1940_v28  ;;  %v2035_v28 = vrot.slane %v9082_v3, 4  ;;  %v9209_v3 = vshrl.u32 %v7483_v50, 16 }
 0x1d1   : > { %9199 = vst [vmem:[#allocation77_spill] sm:$0xff] %v7465_v33  ;;  %v2564_v33 = vrot.slane %v2562_v18, 4  ;;  %v7511_v18 = vld [vmem:[#allocation2 + $0x54] sm:$0xff] }
 0x1d2   : > { %9201 = vst [vmem:[#allocation79_spill] sm:$0xff] %v7472_v15  ;;  %v7487_v15 = vpop.f32.mrf.mxu1  ;;  %v9252_v7 = vshll.u32 %v7511_v18, 16 }
 0x1d3   : > { %v7501_v22 = vor.u32 %v2564_v33, %v2561_v43  ;;  %v1703_v33 = vsel %vm1569_vm7, %v1693_v2, %v7494_v53  ;;  %v9207_v43 = vshrl.u32 %v7481_v57, 16  ;;  %v9210_v2 = vshll.u32 %v7483_v50, 16 }
 0x1d5   : > { %v2566_v55 = vsel %vm1961_vm6, %v7412_v11, %v7501_v22  ;;  %v2043_v49 = vrot.slane %v9210_v2, 4  ;;  %v7545_v2 = vld [vmem:[#allocation2 + $0x64] sm:$0xff] }
 0x1d6   : > { %v1858_v36 = vpop.f32.mrf.mxu2  ;;  %1531 = vmatmul.bf16.gmra.mxu3 %v1373_v5  ;;  %v2038_v5 = vrot.slane %v9207_v43, 3  ;;  %v9089_v62 = vshll.u32 %v7545_v2, 16 }
 0x1d7   : > { %v7506_v38 = vadd.f32 %v1858_v36, %v7400_v27  ;;  %v2039_v36 = vrot.slane %v9083_v40, 4  ;;  %v9208_v27 = vunpack.c.l.b16 %v7485_v19 }
 0x1d8   : > { %v7509_v12 = vpop.f32.mrf.mxu0 }
 0x1d9   : > { %9205 = vst [vmem:[#allocation80_spill] sm:$0xff] %v7506_v38  ;;  %v1960_v32 = vpack.c.b16 %v1959_v10, %v9208_v27  ;;  %v2042_v38 = vrot.slane %v9209_v3, 3  ;;  %v2040_v10 = vor.u32 %v2039_v36, %v2038_v5  ;;  %v7537_v27 = vld [vmem:[#allocation2 + $0x24] sm:$0xff]   ;;  %v9085_v3 = vshll.u32 %v7511_v18, 16 }
 0x1da   : > { %9206 = vst [vmem:[#allocation81_spill] sm:$0xff] %v7509_v12  ;;  %v2036_v12 = vor.u32 %v2035_v28, %v2034_v17  ;;  %v7532_v43 = vpop.f32.mrf.mxu1  ;;  %v9084_v28 = vshrl.u32 %v7511_v18, 16 }
 0x1db   : > { %1900 = vmatmul.bf16.gmra.mxu2 %v1703_v33  ;;  %2767 = vmatmul.bf16.gmra.mxu0 %v2566_v55  ;;  %v2044_v11 = vor.u32 %v2043_v49, %v2042_v38  ;;  %v2568_v33 = vshrl.u32 %v6035_v23, 16  ;;  %v2571_v55 = vshll.u32 %v6035_v23, 16  ;;  %v2047_v35 = vshrl.u32 %v1960_v32, 16 }
 0x1dc   : > { %v7541_v17 = vsel %vm1961_vm6, %v7416_v6, %v2036_v12  ;;  %v7548_v40 = vsel %vm1961_vm6, %v2036_v12, %v2040_v10  ;;  %v4421_v6 = vrot.slane %v9084_v28, 1  ;;  %v4422_v38 = vrot.slane %v9085_v3, 2 }
 0x1dd   : > { %9211 = vst [vmem:[#allocation82_spill] sm:$0xff] %v7541_v17  ;;  %v7552_v36 = vsel %vm1961_vm6, %v2040_v10, %v2044_v11  ;;  %v2050_v49 = vshll.u32 %v1960_v32, 16  ;;  %v9215_v12 = vshrl.u32 %v7346_v54, 16  ;;  %v7563_v17 = vld [vmem:[#allocation2 + $0x6c] sm:$0xff]  ;;  %v2049_v16 = vrot.slane %v2047_v35, 3 }
 0x1de   : > { %9212 = vst [vmem:[#allocation83_spill] sm:$0xff] %v7548_v40  ;;  %v1861_v5 = vpop.f32.mrf.mxu2  ;;  %2983 = vmatmul.bf16.gmra.mxu1 %v7537_v27  ;;  %v9086_v10 = vshll.u32 %v7535_v13, 16  ;;  %v9217_v28 = vshll.u32 %v7346_v54, 16  ;;  %v4423_v3 = vor.u32 %v4422_v38, %v4421_v6  ;;  %v9090_v6 = vshrl.u32 %v7545_v2, 16 }
 0x1df   : > { %9213 = vst [vmem:[#allocation84_spill] sm:$0xff] %v7552_v36  ;;  %v7559_v23 = vadd.f32 %v1861_v5, %v7446_v60  ;;  %v1707_v40 = vrot.slane %v9215_v12, 2  ;;  %v2052_v32 = vrot.slane %v2050_v49, 4  ;;  %v9087_v60 = vshrl.u32 %v7535_v13, 16 }
 0x1e0   : > { %v7568_v36 = vpop.f32.mrf.mxu0  ;;  %v1710_v25 = vrot.slane %v9217_v28, 3  ;;  %v2570_v5 = vrot.slane %v2568_v33, 3  ;;  %v4426_v12 = vrot.slane %v9086_v10, 2  ;;  %v7578_v35 = vsel %vm4384_vm12, %v7461_v26, %v4423_v3 }
 0x1e1   : > { %9214 = vst [vmem:[#allocation85_spill] sm:$0xff] %v7559_v23  ;;  %v2573_v23 = vrot.slane %v2571_v55, 4  ;;  %v7580_v8 = vor.u32 %v2052_v32, %v2049_v16  ;;  %v4425_v28 = vrot.slane %v9087_v60, 1  ;;  %v9220_v33 = vrot.slane %v7359_v56, 3 }
 0x1e2   : > { %9216 = vst [vmem:[#allocation86_spill] sm:$0xff] %v7568_v36  ;;  %v7585_v38 = vpop.f32.mrf.mxu1  ;;  %v9221_v55 = vrot.slane %v7346_v54, 3  ;;  %v4430_v10 = vrot.slane %v9089_v62, 2  ;;  %v9092_v26 = vshll.u32 %v7563_v17, 16  ;;  %v9091_v36 = vshrl.u32 %v7563_v17, 16 }
 0x1e3   : > { %9218 = vst [vmem:[#allocation87_spill] sm:$0xff] %v7578_v35  ;;  %v7598_v32 = vsel %vm1961_vm6, %v2044_v11, %v7580_v8  ;;  %v4427_v60 = vor.u32 %v4426_v12, %v4425_v28  ;;  %v4429_v35 = vrot.slane %v9090_v6, 1  ;;  %v1711_v54 = vor.u32 %v1710_v25, %v1707_v40 }
 0x1e4   : > { %9219 = vst [vmem:[#allocation88_spill] sm:$0xff] %v7580_v8  ;;  %v1375_v49 = vsel %vm1342_vm3, %v9221_v55, %v9220_v33  ;;  %v2574_v20 = vor.u32 %v2573_v23, %v2570_v5  ;;  %v6036_v33 = vld [vmem:[#allocation2 + $0x80] sm:$0xff]   ;;  %v4434_v55 = vrot.slane %v9092_v26, 2  ;;  %v9093_v62 = vshrl.u32 %v7565_v44, 16 }
 0x1e5   : > { %9222 = vst [vmem:[#allocation89_spill] sm:$0xff] %v7598_v32  ;;  %v7607_v16 = vsel %vm4384_vm12, %v4423_v3, %v4427_v60  ;;  %v4431_v11 = vor.u32 %v4430_v10, %v4429_v35  ;;  %v4433_v12 = vrot.slane %v9091_v36, 1  ;;  %v9224_v28 = vshll.u32 %v7565_v44, 16 }
 0x1e6   : > { %v1863_v1 = vpop.f32.mrf.mxu2  ;;  %1536 = vmatmul.bf16.gmra.mxu3 %v1375_v49  ;;  %9223 = vst [vmem:[#allocation90_spill] sm:$0xff] %v7607_v16  ;;  %v4437_v40 = vrot.slane %v9093_v62, 1  ;;  %v9226_v23 = vshll.u32 %v7396_v46, 16  ;;  %v2577_v3 = vshrl.u32 %v6036_v33, 16  ;;  %v2580_v10 = vshll.u32 %v6036_v33, 16 }
 0x1e7   : > { %v4438_v6 = vrot.slane %v9224_v28, 2  ;;  %v7614_v25 = vadd.f32 %v1863_v1, %v7487_v15  ;;  %v7623_v35 = vsel %vm4384_vm12, %v4427_v60, %v4431_v11  ;;  %v4435_v36 = vor.u32 %v4434_v55, %v4433_v12 }
 0x1e8   : > { %v3737_v5 = vrot.slane %v9226_v23, 1  ;;  %v7620_v49 = vpop.f32.mrf.mxu0  ;;  %9228 = vst [vmem:[#allocation93_spill] sm:$0xff] %v7623_v35  ;;  %v9230_v15 = vshrl.u32 %v7396_v46, 16  ;;  %v9231_v23 = vshll.u32 %v7414_v24, 16  ;;  %v1712_v8 = vsel %vm1569_vm7, %v7494_v53, %v1711_v54 }
 0x1e9   : > { %9225 = vst [vmem:[#allocation91_spill] sm:$0xff] %v7614_v25  ;;  %v7625_v26 = vor.u32 %v4438_v6, %v4437_v40  ;;  %v2575_v60 = vsel %vm1961_vm6, %v7501_v22, %v2574_v20  ;;  %v7640_v33 = vsel %vm4384_vm12, %v4431_v11, %v4435_v36  ;;  %v9235_v53 = vshrl.u32 %v7414_v24, 16  ;;  %v7656_v22 = vld [vmem:[#allocation2 + $0x2c] sm:$0xff]  }
 0x1ea   : > { %9227 = vst [vmem:[#allocation92_spill] sm:$0xff] %v7620_v49  ;;  %v7629_v1 = vsel %vm3135_vm8, %v7457_v30, %v3737_v5  ;;  %v3741_v28 = vor.u32 %v9230_v15, %v3737_v5  ;;  %v3745_v62 = vrot.slane %v9231_v23, 1  ;;  %v7642_v6 = vpop.f32.mrf.mxu1  ;;  %v5759_v30 = vld [vmem:[%s6431_s11 + $0x90] sm:$0xff]  ;;  %v9236_v11 = vshrl.u32 %v7359_v56, 16 }
 0x1eb   : > { %9229 = vst [vmem:[#allocation94_spill] sm:$0xff] %v7629_v1  ;;  %1905 = vmatmul.bf16.gmra.mxu2 %v1712_v8  ;;  %2772 = vmatmul.bf16.gmra.mxu0 %v2575_v60  ;;  %v7647_v46 = vsel %vm4384_vm12, %v4435_v36, %v7625_v26  ;;  %v9237_v40 = vshll.u32 %v7359_v56, 16  ;;  %v2579_v15 = vrot.slane %v2577_v3, 3  ;;  %v2582_v23 = vrot.slane %v2580_v10, 4  ;;  %v7678_v10 = vld [vmem:[#allocation2 + $0x84] sm:$0xff] }
 0x1ec   : > { %9232 = vst [vmem:[#allocation95_spill] sm:$0xff] %v7640_v33  ;;  %v7650_v55 = vsel %vm3135_vm8, %v3741_v28, %v3745_v62  ;;  %v7654_v12 = vor.u32 %v9235_v53, %v3745_v62  ;;  %v1716_v8 = vrot.slane %v9236_v11, 2  ;;  %2129 = vmatpush.bf16.msrb.mxu3 %v5759_v30  ;;  %v1376_v62 = vrot.slane %v7479_v48, 3  ;;  %v7672_v11 = vld [vmem:[#allocation2 + $0x88] sm:$0xff]  }
 0x1ed   : > { %9233 = vst [vmem:[#allocation96_spill] sm:$0xff] %v7647_v46  ;;  %v1719_v5 = vrot.slane %v9237_v40, 3  ;;  %v7674_v40 = vld [vmem:[#allocation2 + $0x7c] sm:$0xff]  ;;  %v7676_v3 = vor.u32 %v2582_v23, %v2579_v15  ;;  %v7680_v30 = vld [vmem:[#allocation2 + $0x8c] sm:$0xff]  ;;  %v9240_v53 = vrot.slane %v7359_v56, 3  ;;  %v9241_v23 = vrot.slane %v7481_v57, 3 }
 0x1ee   : > { %9234 = vst [vmem:[#allocation97_spill] sm:$0xff] %v7650_v55  ;;  %v1866_v36 = vpop.f32.mrf.mxu2  ;;  %2988 = vmatmul.bf16.gmra.mxu1 %v7656_v22  ;;  %v7686_v55 = vld [vmem:[#allocation2 + $0xa4] sm:$0xff]  ;;  %v9096_v32 = vshrl.u32 %v7678_v10, 16  ;;  %v9245_v56 = vshll.u32 %v7678_v10, 16 }
 0x1ef   : > { %v7664_v28 = vadd.f32 %v1866_v36, %v7532_v43  ;;  %v7669_v60 = vor.u32 %v1719_v5, %v1716_v8  ;;  %v7682_v43 = vld [vmem:[#allocation2 + $0x94] sm:$0xff]  ;;  %v7684_v36 = vld [vmem:[#allocation2 + $0x9c] sm:$0xff]  ;;  %v7688_v8 = vld [vmem:[#allocation2 + $0xac] sm:$0xff]  ;;  %v1377_v1 = vsel %vm1342_vm3, %v9240_v53, %v1376_v62  ;;  %v7700_v46 = vsel %vm1342_vm3, %v1376_v62, %v9241_v23 }
 0x1f0   : > { %v7667_v24 = vpop.f32.mrf.mxu0  ;;  %v2584_v16 = vsel %vm1961_vm6, %v2574_v20, %v7676_v3  ;;  %v9095_v20 = vshrl.u32 %v7674_v40, 16  ;;  %v9248_v23 = vshrl.u32 %v7682_v43, 16 }
 0x1f1   : > { %9238 = vst [vmem:[#allocation98_spill] sm:$0xff] %v7664_v28  ;;  %v1721_v15 = vsel %vm1569_vm7, %v1711_v54, %v7669_v60  ;;  %v9247_v54 = vshll.u32 %v7680_v30, 16 }
 0x1f2   : > { %9239 = vst [vmem:[#allocation99_spill] sm:$0xff] %v7667_v24  ;;  %v7690_v5 = vpop.f32.mrf.mxu1  ;;  %v4453_v49 = vrot.slane %v9248_v23, 1 }
 0x1f3   : > { %v4450_v62 = vrot.slane %v9247_v54, 2 }
 0x1f6   : > { %v1868_v24 = vpop.f32.mrf.mxu2  ;;  %1541 = vmatmul.bf16.gmra.mxu3 %v1377_v1  ;;  %v9246_v1 = vshrl.u32 %v7680_v30, 16 }
 0x1f7   : > { %v7714_v35 = vadd.f32 %v1868_v24, %v7585_v38  ;;  %v4441_v38 = vrot.slane %v9095_v20, 1  ;;  %v9244_v24 = vshll.u32 %v7674_v40, 16  ;;  %v9249_v20 = vshll.u32 %v7682_v43, 16 }
 0x1f8   : > { %v7719_v53 = vpop.f32.mrf.mxu0  ;;  %v4449_v28 = vrot.slane %v9246_v1, 1  ;;  %v9251_v1 = vshll.u32 %v7684_v36, 16 }
 0x1f9   : > { %9242 = vst [vmem:[#allocation100_spill] sm:$0xff] %v7714_v35  ;;  %v4442_v33 = vrot.slane %v9244_v24, 2  ;;  %v4445_v35 = vrot.slane %v9096_v32, 1  ;;  %v4454_v25 = vrot.slane %v9249_v20, 2  ;;  %v3753_v20 = vrot.slane %v9252_v7, 1 }
 0x1fa   : > { %9243 = vst [vmem:[#allocation101_spill] sm:$0xff] %v7719_v53  ;;  %v4446_v53 = vrot.slane %v9245_v56, 2  ;;  %v9250_v56 = vshrl.u32 %v7684_v36, 16  ;;  %v4458_v21 = vrot.slane %v9251_v1, 2  ;;  %v4451_v54 = vor.u32 %v4450_v62, %v4449_v28 }
 0x1fb   : > { %1910 = vmatmul.bf16.gmra.mxu2 %v1721_v15  ;;  %2777 = vmatmul.bf16.gmra.mxu0 %v2584_v16  ;;  %v7741_v24 = vpop.f32.mrf.mxu1  ;;  %v4443_v32 = vor.u32 %v4442_v33, %v4441_v38  ;;  %v4455_v23 = vor.u32 %v4454_v25, %v4453_v49  ;;  %v9253_v16 = vshrl.u32 %v7686_v55, 16  ;;  %v9256_v38 = vshll.u32 %v7686_v55, 16 }
 0x1fc   : > { %v4447_v4 = vor.u32 %v4446_v53, %v4445_v35  ;;  %v4457_v45 = vrot.slane %v9250_v56, 1 }
 0x1fd   : > { %v4461_v15 = vrot.slane %v9253_v16, 1  ;;  %v7755_v35 = vsel %vm4384_vm12, %v7625_v26, %v4443_v32  ;;  %v4462_v56 = vrot.slane %v9256_v38, 2  ;;  %v7767_v7 = vsel %vm4384_vm12, %v4451_v54, %v4455_v23 }
 0x1fe   : > { %9254 = vst [vmem:[#allocation102_spill] sm:$0xff] %v7755_v35  ;;  %v7758_v33 = vsel %vm4384_vm12, %v4443_v32, %v4447_v4  ;;  %v4459_v53 = vor.u32 %v4458_v21, %v4457_v45  ;;  %v1871_v1 = vpop.f32.mrf.mxu2  ;;  %2993 = vmatmul.bf16.gmra.mxu1 %v7747_v34  ;;  %v7764_v25 = vsel %vm4384_vm12, %v4447_v4, %v4451_v54  ;;  %v9260_v32 = vshrl.u32 %v7511_v18, 16  ;;  %v5758_v45 = vld [vmem:[%s6431_s11 + $0x88] sm:$0xff] }
 0x1ff   : > { %9255 = vst [vmem:[#allocation103_spill] sm:$0xff] %v7758_v33  ;;  %v7771_v26 = vsel %vm3135_vm8, %v7654_v12, %v3753_v20  ;;  %v7776_v21 = vadd.f32 %v1871_v1, %v7642_v6  ;;  %v4463_v62 = vor.u32 %v4462_v56, %v4461_v15  ;;  %v9262_v4 = vshrl.u32 %v7688_v8, 16  ;;  %2130 = vmatpush.bf16.msrb.mxu3 %v5758_v45 }
 0x200   : > { %9257 = vst [vmem:[#allocation104_spill] sm:$0xff] %v7764_v25  ;;  %v3757_v49 = vor.u32 %v9260_v32, %v3753_v20  ;;  %v7780_v28 = vsel %vm4384_vm12, %v4455_v23, %v4459_v53  ;;  %v7784_v54 = vpop.f32.mrf.mxu0  ;;  %v9264_v38 = vshrl.u32 %v7479_v48, 16  ;;  %v9266_v20 = vshll.u32 %v7688_v8, 16 }
 0x201   : > { %9258 = vst [vmem:[#allocation105_spill] sm:$0xff] %v7767_v7  ;;  %v4465_v16 = vrot.slane %v9262_v4, 1  ;;  %v9267_v1 = vshll.u32 %v7563_v17, 16  ;;  %v7795_v23 = vsel %vm4384_vm12, %v4459_v53, %v4463_v62  ;;  %v9269_v15 = vshll.u32 %v7535_v13, 16 }
 0x202   : > { %9259 = vst [vmem:[#allocation106_spill] sm:$0xff] %v7771_v26  ;;  %v1725_v12 = vrot.slane %v9264_v38, 2  ;;  %v9265_v26 = vshll.u32 %v7479_v48, 16  ;;  %v4466_v6 = vrot.slane %v9266_v20, 2  ;;  %v9270_v4 = vshll.u32 %v7545_v2, 16 }
 0x203   : > { %9261 = vst [vmem:[#allocation107_spill] sm:$0xff] %v7780_v28  ;;  %v3777_v32 = vrot.slane %v9267_v1, 1  ;;  %v3761_v56 = vrot.slane %v9269_v15, 1  ;;  %v9271_v38 = vshll.u32 %v7565_v44, 16  ;;  %v9273_v20 = vshll.u32 %v7672_v11, 16 }
 0x204   : > { %9263 = vst [vmem:[#allocation108_spill] sm:$0xff] %v7784_v54  ;;  %v1728_v18 = vrot.slane %v9265_v26, 3  ;;  %v3769_v28 = vrot.slane %v9270_v4, 1  ;;  %v9272_v26 = vshrl.u32 %v7672_v11, 16  ;;  %v7807_v1 = vor.u32 %v4466_v6, %v4465_v16 }
 0x205   : > { %9268 = vst [vmem:[#allocation109_spill] sm:$0xff] %v7795_v23  ;;  %v3785_v48 = vrot.slane %v9271_v38, 1  ;;  %v2591_v25 = vrot.slane %v9273_v20, 4  ;;  %v9275_v53 = vshrl.u32 %v7563_v17, 16  ;;  %v1504_v23 = vpop.f32.mrf.mxu1  ;;  %v7812_v15 = vsel %vm3135_vm8, %v3757_v49, %v3761_v56 }
 0x206   : > { %v2588_v7 = vrot.slane %v9272_v26, 3  ;;  %9274 = vst [vmem:[#allocation110_spill] sm:$0xff] %v7807_v1  ;;  %v9277_v4 = vshrl.u32 %v7535_v13, 16  ;;  %v9278_v38 = vshrl.u32 %v7545_v2, 16  ;;  %v9279_v26 = vshrl.u32 %v7565_v44, 16  ;;  %1546 = vmatmul.bf16.gmra.mxu3 %v7700_v46 }
 0x207   : > { %v3781_v45 = vor.u32 %v9275_v53, %v3777_v32  ;;  %9276 = vst [vmem:[#allocation111_spill] sm:$0xff] %v7812_v15  ;;  %v1729_v11 = vor.u32 %v1728_v18, %v1725_v12  ;;  %v7822_v16 = vsel %vm4384_vm12, %v4463_v62, %v7807_v1  ;;  %v9282_v49 = vshll.u32 %v7674_v40, 16  ;;  %v1873_v62 = vpop.f32.mrf.mxu2  ;;  %v5830_v15 = vld [vmem:[%s6431_s11 + $0x230] sm:$0xff] }
 0x208   : > { %v3765_v33 = vor.u32 %v9277_v4, %v3761_v56  ;;  %v3773_v35 = vor.u32 %v9278_v38, %v3769_v28  ;;  %v3789_v54 = vor.u32 %v9279_v26, %v3785_v48  ;;  %9280 = vst [vmem:[#allocation112_spill] sm:$0xff] %v7822_v16  ;;  %v9285_v44 = vshll.u32 %v7678_v10, 16 }
 0x209   : > { %v7825_v17 = vsel %vm3135_vm8, %v3781_v45, %v3785_v48  ;;  %v3793_v6 = vrot.slane %v9282_v49, 1  ;;  %v9286_v12 = vshll.u32 %v7680_v30, 16  ;;  %v2592_v48 = vor.u32 %v2591_v25, %v2588_v7  ;;  %v7856_v7 = vpop.f32.mrf.mxu0 }
 0x20a   : > { %9281 = vst [vmem:[#allocation113_spill] sm:$0xff] %v7825_v17  ;;  %v7830_v13 = vsel %vm3135_vm8, %v3765_v33, %v3769_v28  ;;  %v7833_v2 = vsel %vm3135_vm8, %v3773_v35, %v3777_v32  ;;  %v3801_v56 = vrot.slane %v9285_v44, 1  ;;  %v9288_v53 = vshrl.u32 %v7674_v40, 16 }
 0x20b   : > { %9283 = vst [vmem:[#allocation114_spill] sm:$0xff] %v7830_v13  ;;  %v3809_v18 = vrot.slane %v9286_v12, 1  ;;  %v7841_v20 = vsel %vm3135_vm8, %v3789_v54, %v3793_v6  ;;  %v9289_v28 = vshll.u32 %v7682_v43, 16  ;;  %v7848_v32 = vadd.f32 %v1873_v62, %v7690_v5 }
 0x20c   : > { %9284 = vst [vmem:[#allocation115_spill] sm:$0xff] %v7833_v2  ;;  %v3797_v33 = vor.u32 %v9288_v53, %v3793_v6  ;;  %v9290_v45 = vshrl.u32 %v7678_v10, 16  ;;  %v9291_v38 = vshrl.u32 %v7680_v30, 16  ;;  %v9292_v46 = vshll.u32 %v7684_v36, 16 }
 0x20d   : > { %9287 = vst [vmem:[#allocation116_spill] sm:$0xff] %v7841_v20  ;;  %v3817_v35 = vrot.slane %v9289_v28, 1  ;;  %v9294_v54 = vshrl.u32 %v7682_v43, 16  ;;  %v9295_v5 = vshll.u32 %v7686_v55, 16  ;;  %v9296_v10 = vshll.u32 %v7688_v8, 16 }
 0x20e   : > { %v3805_v4 = vor.u32 %v9290_v45, %v3801_v56  ;;  %v3813_v26 = vor.u32 %v9291_v38, %v3809_v18  ;;  %v3825_v25 = vrot.slane %v9292_v46, 1  ;;  %v7859_v40 = vsel %vm3135_vm8, %v3797_v33, %v3801_v56  ;;  %v6038_v38 = vld [vmem:[#allocation2 + $0x90] sm:$0xff]  }
 0x20f   : > { %9293 = vst [vmem:[#allocation117_spill] sm:$0xff] %v7859_v40  ;;  %v3821_v49 = vor.u32 %v9294_v54, %v3817_v35  ;;  %v3833_v6 = vrot.slane %v9295_v5, 1  ;;  %v3841_v44 = vrot.slane %v9296_v10, 1  ;;  %v1730_v30 = vsel %vm1569_vm7, %v7669_v60, %v1729_v11 }
 0x210   : > { %v7870_v12 = vsel %vm3135_vm8, %v3805_v4, %v3809_v18  ;;  %v7873_v62 = vsel %vm3135_vm8, %v3813_v26, %v3817_v35  ;;  %v9299_v56 = vshrl.u32 %v7684_v36, 16  ;;  %v2593_v43 = vsel %vm1961_vm6, %v7676_v3, %v2592_v48  ;;  %1915 = vmatmul.bf16.gmra.mxu2 %v1730_v30  ;;  %v1507_v35 = vpop.f32.mrf.mxu1  ;;  %v7891_v4 = vld [vmem:[#allocation2 + $0x3c] sm:$0xff]   ;;  %v1876_v26 = vpop.f32.mrf.mxu2 }
 0x211   : > { %9297 = vst [vmem:[#allocation118_spill] sm:$0xff] %v7870_v12  ;;  %v7880_v33 = vsel %vm3135_vm8, %v3821_v49, %v3825_v25  ;;  %v9301_v28 = vshrl.u32 %v7686_v55, 16  ;;  %v9302_v60 = vshrl.u32 %v7688_v8, 16  ;;  %2782 = vmatmul.bf16.gmra.mxu0 %v2593_v43  ;;  %2998 = vmatmul.bf16.gmra.mxu1 %v7891_v4  ;;  %v7898_v55 = vadd.f32 %v1876_v26, %v7741_v24  ;;  %v7900_v8 = vpop.f32.mrf.mxu0  ;;  %v5757_v49 = vld [vmem:[%s6431_s11 + $0x80] sm:$0xff] }
 0x212   : > { %9298 = vst [vmem:[#allocation119_spill] sm:$0xff] %v7873_v62  ;;  %v3829_v53 = vor.u32 %v9299_v56, %v3825_v25  ;;  %v2595_v46 = vshrl.u32 %v6038_v38, 16  ;;  %v2598_v25 = vshll.u32 %v6038_v38, 16  ;;  %v1380_v54 = vrot.slane %v7483_v50, 3  ;;  %2131 = vmatpush.bf16.msrb.mxu3 %v5757_v49 }
 0x213   : > { %9300 = vst [vmem:[#allocation120_spill] sm:$0xff] %v7880_v33  ;;  %v3837_v45 = vor.u32 %v9301_v28, %v3833_v6  ;;  %v7886_v18 = vor.u32 %v9302_v60, %v3841_v44  ;;  %v9306_v5 = vshrl.u32 %v7481_v57, 16  ;;  %v9307_v10 = vshll.u32 %v7481_v57, 16  ;;  %v1202_v60 = vld [vmem:[#allocation2 + $0xa4] sm:$0x1] }
 0x214   : > { %v7889_v36 = vsel %vm3135_vm8, %v3829_v53, %v3833_v6  ;;  %v2597_v56 = vrot.slane %v2595_v46, 3  ;;  %v2600_v53 = vrot.slane %v2598_v25, 4  ;;  %v9308_v24 = vrot.slane %v7481_v57, 3  ;;  %v5788_v25 = vld [vmem:[%s6431_s11 + $0x178] sm:$0xff] }
 0x215   : > { %9303 = vst [vmem:[#allocation121_spill] sm:$0xff] %v7886_v18  ;;  %v7894_v3 = vsel %vm3135_vm8, %v3837_v45, %v3841_v44  ;;  %v1734_v6 = vrot.slane %v9306_v5, 2  ;;  %v1737_v44 = vrot.slane %v9307_v10, 3  ;;  %v1320_v10 = vunpack.c.l.b16 %v1202_v60  ;;  %3372 = vmatpush.bf16.msra.mxu2 %v5788_v25 }
 0x216   : > { %9304 = vst [vmem:[#allocation122_spill] sm:$0xff] %v7889_v36  ;;  %v1381_v43 = vsel %vm1342_vm3, %v9308_v24, %v1380_v54  ;;  %v2601_v5 = vor.u32 %v2600_v53, %v2597_v56  ;;  %v7918_v24 = vld [vmem:[#allocation2 + $0x44] sm:$0xff]   ;;  %v9311_v60 = vshll.u32 %v7483_v50, 16  ;;  %v2319_v36 = vld [vmem:[#allocation2 + $0xac] sm:$0x3] }
 0x217   : > { %9305 = vst [vmem:[#allocation123_spill] sm:$0xff] %v7894_v3  ;;  %1551 = vmatmul.bf16.gmra.mxu3 %v1381_v43  ;;  %v1738_v45 = vor.u32 %v1737_v44, %v1734_v6  ;;  %v9309_v6 = vunpack.c.l.b16 %v7485_v19  ;;  %v9310_v43 = vshrl.u32 %v7483_v50, 16  ;;  %v7961_v33 = vunpack.c.l.b16 %v2319_v36 }
 0x218   : > { %v1509_v30 = vpop.f32.mrf.mxu1  ;;  %v1878_v28 = vpop.f32.mrf.mxu2  ;;  %v2602_v46 = vsel %vm1961_vm6, %v2592_v48, %v2601_v5  ;;  %v5787_v48 = vld [vmem:[%s6431_s11 + $0x170] sm:$0xff] }
 0x219   : > { %v7911_v38 = vadd.f32 %v1878_v28, %v1504_v23  ;;  %v7913_v26 = vpop.f32.mrf.mxu0  ;;  %v1739_v49 = vsel %vm1569_vm7, %v1729_v11, %v1738_v45  ;;  %v1341_v23 = vpack.c.b16 %v1320_v10, %v9309_v6  ;;  %v1743_v28 = vrot.slane %v9310_v43, 2  ;;  %3373 = vmatpush.bf16.msra.mxu2 %v5787_v48  ;;  %v5786_v10 = vld [vmem:[%s6431_s11 + $0x168] sm:$0xff]  ;;  %v5785_v43 = vld [vmem:[%s6431_s11 + $0x160] sm:$0xff] }
 0x21a   : > { %v2611_v48 = vsel %vm1961_vm6, %v2601_v5, %v7281_v42 }
 0x21b   : > { %v1382_v53 = vrot.slane %v1341_v23, 3 }
 0x21d   : > { %3374 = vmatpush.bf16.msra.mxu2 %v5786_v10  ;;  %v1753_v10 = vshll.u32 %v1341_v23, 16 }
 0x220   : > { %1920 = vmatmul.bf16.gmra.mxu2 %v1739_v49  ;;  %v1512_v57 = vpop.f32.mrf.mxu1  ;;  %v1881_v44 = vpop.f32.mrf.mxu2  ;;  %v1746_v49 = vrot.slane %v9311_v60, 3  ;;  %v7947_v60 = vld [vmem:[#allocation2 + $0x4c] sm:$0xff]  }
 0x221   : > { %2787 = vmatmul.bf16.gmra.mxu0 %v2602_v46  ;;  %3003 = vmatmul.bf16.gmra.mxu1 %v7918_v24  ;;  %v7923_v56 = vadd.f32 %v1881_v44, %v1507_v35  ;;  %v7925_v11 = vpop.f32.mrf.mxu0  ;;  %v1383_v46 = vsel %vm1342_vm3, %v1380_v54, %v1382_v53  ;;  %v5815_v44 = vld [vmem:[%s6431_s11 + $0x1b8] sm:$0xff]  ;;  %vm4098_vm3 = vcmask 1046528  }
 0x222   : > { %v1747_v35 = vor.u32 %v1746_v49, %v1743_v28  ;;  %3923 = vmatpush.bf16.msra.mxu3 %v5815_v44  ;;  %3375 = vmatpush.bf16.msra.mxu2 %v5785_v43  ;;  %v5823_v28 = vld [vmem:[%s6431_s11 + $0x1f8] sm:$0xff] }
 0x223   : > { %4209 = vmatpush.bf16.msra.mxu0 %v5823_v28  ;;  %v5831_v44 = vld [vmem:[%s6431_s11 + $0x238] sm:$0xff] }
 0x224   : > { %v1748_v50 = vsel %vm1569_vm7, %v1738_v45, %v1747_v35  ;;  %v1750_v45 = vshrl.u32 %v1341_v23, 16  ;;  %4547 = vmatpush.bf16.msra.mxu1 %v5831_v44  ;;  %v5782_v23 = vld [vmem:[%s6431_s11 + $0x148] sm:$0xff]  ;;  %v9315_v44 = vunpack.c.l.b16 %v7294_v47 }
 0x227   : > { %1556 = vmatmul.bf16.gmra.mxu3 %v1383_v46  ;;  %v5783_v46 = vld [vmem:[%s6431_s11 + $0x150] sm:$0xff] }
 0x228   : > { %v1514_v19 = vpop.f32.mrf.mxu1  ;;  %v1883_v25 = vpop.f32.mrf.mxu2  ;;  %4548 = vmatpush.bf16.msra.mxu1 %v5830_v15 }
 0x229   : > { %v7934_v6 = vadd.f32 %v1883_v25, %v1509_v30  ;;  %v7937_v18 = vpop.f32.mrf.mxu0  ;;  %v1517_v3 = vpop.f32.mrf.mxu3  ;;  %v5784_v30 = vld [vmem:[%s6431_s11 + $0x158] sm:$0xff]  ;;  %v5822_v25 = vld [vmem:[%s6431_s11 + $0x1f0] sm:$0xff] }
 0x22a   : > { %3376 = vmatpush.bf16.msra.mxu2 %v5784_v30  ;;  %4210 = vmatpush.bf16.msra.mxu0 %v5822_v25  ;;  %v5821_v30 = vld [vmem:[%s6431_s11 + $0x1e8] sm:$0xff] }
 0x22e   : > { %3377 = vmatpush.bf16.msra.mxu2 %v5783_v46  ;;  %4211 = vmatpush.bf16.msra.mxu0 %v5821_v30  ;;  %v5820_v46 = vld [vmem:[%s6431_s11 + $0x1e0] sm:$0xff] }
 0x230   : > { %1925 = vmatmul.bf16.gmra.mxu2 %v1748_v50  ;;  %v7943_v54 = vpop.f32.mrf.mxu1  ;;  %v1886_v49 = vpop.f32.mrf.mxu2  ;;  %v1752_v50 = vrot.slane %v1750_v45, 2 }
 0x231   : > { %2792 = vmatmul.bf16.gmra.mxu0 %v2611_v48  ;;  %3008 = vmatmul.bf16.gmra.mxu1 %v7947_v60  ;;  %v7950_v42 = vadd.f32 %v1886_v49, %v1512_v57  ;;  %v7952_v5 = vpop.f32.mrf.mxu0  ;;  %v1519_v43 = vpop.f32.mrf.mxu3  ;;  %v1755_v48 = vrot.slane %v1753_v10, 3  ;;  %v5781_v10 = vld [vmem:[%s6431_s11 + $0x140] sm:$0xff] }
 0x232   : > { %9312 = vst [vmem:[#allocation124_spill] sm:$0xff] %v7952_v5  ;;  %3378 = vmatpush.bf16.msra.mxu2 %v5782_v23  ;;  %4212 = vmatpush.bf16.msra.mxu0 %v5820_v46  ;;  %v5817_v46 = vld [vmem:[%s6431_s11 + $0x1c8] sm:$0xff] }
 0x233   : > { %v1756_v49 = vor.u32 %v1755_v48, %v1752_v50  ;;  %v5819_v50 = vld [vmem:[%s6431_s11 + $0x1d8] sm:$0xff] }
 0x235   : > { %v1757_v12 = vsel %vm1569_vm7, %v1747_v35, %v1756_v49 }
 0x236   : > { %3379 = vmatpush.bf16.msra.mxu2 %v5781_v10  ;;  %4213 = vmatpush.bf16.msra.mxu0 %v5819_v50 }
 0x237   : > { %1561 = vmatmul.bf16.gmra.mxu3 %v1382_v53  ;;  %v2441_v53 = vpack.c.b16 %v7961_v33, %v9315_v44 }
 0x238   : > { %v7957_v28 = vpop.f32.mrf.mxu1  ;;  %v1888_v57 = vpop.f32.mrf.mxu2 }
 0x239   : > { %v7963_v62 = vadd.f32 %v1888_v57, %v1514_v19  ;;  %v7965_v45 = vpop.f32.mrf.mxu0  ;;  %v1522_v25 = vpop.f32.mrf.mxu3  ;;  %v7976_v19 = vld [vmem:[#allocation2 + $0x54] sm:$0xff]   ;;  %v2622_v35 = vshrl.u32 %v2441_v53, 16  ;;  %v2625_v23 = vshll.u32 %v2441_v53, 16  ;;  %v5816_v53 = vld [vmem:[%s6431_s11 + $0x1c0] sm:$0xff] }
 0x23a   : > { %9314 = vst [vmem:[#allocation126_spill] sm:$0xff] %v7965_v45 }
 0x23b   : > { %9313 = vst [vmem:[#allocation125_spill] sm:$0xff] %v7963_v62  ;;  %v2624_v57 = vrot.slane %v2622_v35, 3  ;;  %v2627_v10 = vrot.slane %v2625_v23, 4  ;;  %v7998_v23 = vld [vmem:[#allocation2 + $0x5c] sm:$0xff]  }
 0x23d   : > { %v2628_v20 = vor.u32 %v2627_v10, %v2624_v57  ;;  %v5814_v57 = vld [vmem:[%s6431_s11 + $0x1b0] sm:$0xff] }
 0x23e   : > { %3924 = vmatpush.bf16.msra.mxu3 %v5814_v57 }
 0x240   : > { %1930 = vmatmul.bf16.gmra.mxu2 %v1757_v12  ;;  %v7974_v36 = vpop.f32.mrf.mxu1  ;;  %v1891_v48 = vpop.f32.mrf.mxu2  ;;  %v5818_v12 = vld [vmem:[%s6431_s11 + $0x1d0] sm:$0xff] }
 0x241   : > { %2797 = vmatmul.bf16.gmra.mxu0 %v7306_v61  ;;  %3013 = vmatmul.bf16.gmra.mxu1 %v7976_v19  ;;  %v7980_v47 = vadd.f32 %v1891_v48, %v1517_v3  ;;  %v7982_v30 = vpop.f32.mrf.mxu0  ;;  %v1524_v61 = vpop.f32.mrf.mxu3  ;;  %v2629_v48 = vsel %vm1961_vm6, %v7292_v29, %v2628_v20  ;;  %v3144_v29 = vshll.u32 %v7363_v39, 16 }
 0x242   : > { %9317 = vst [vmem:[#allocation128_spill] sm:$0xff] %v7982_v30  ;;  %4214 = vmatpush.bf16.msra.mxu0 %v5818_v12 }
 0x243   : > { %9316 = vst [vmem:[#allocation127_spill] sm:$0xff] %v7980_v47 }
 0x246   : > { %4215 = vmatpush.bf16.msra.mxu0 %v5817_v46 }
 0x247   : > { %2132 = vmatmul.bf16.vlgmr.msrb.gmra.mxu3 %v6764_v9 }
 0x248   : > { %v7985_v44 = vpop.f32.mrf.mxu1  ;;  %v1893_v40 = vpop.f32.mrf.mxu2 }
 0x249   : > { %v7989_v17 = vadd.f32 %v1893_v40, %v1519_v43  ;;  %v7991_v3 = vpop.f32.mrf.mxu0  ;;  %v1527_v50 = vpop.f32.mrf.mxu3  ;;  %v3139_v43 = vshll.u32 %v6758_v63, 16 }
 0x24a   : > { %9319 = vst [vmem:[#allocation130_spill] sm:$0xff] %v7991_v3  ;;  %4216 = vmatpush.bf16.msra.mxu0 %v5816_v53  ;;  %v3137_v53 = vshrl.u32 %v6758_v63, 16 }
 0x24b   : > { %9318 = vst [vmem:[#allocation129_spill] sm:$0xff] %v7989_v17  ;;  %v3141_v46 = vrot.slane %v3139_v43, 1  ;;  %v8020_v43 = vld [vmem:[#allocation2 + $0x64] sm:$0xff]  }
 0x24d   : > { %v3142_v1 = vor.u32 %v3141_v46, %v3137_v53  ;;  %v6233_v53 = vld [vmem:[#allocation2 + $0x1c] sm:$0xff] }
 0x24e   : > { %v4100_v15 = vrot.slane %v6233_v53, 1  ;;  %v6234_v53 = vld [vmem:[#allocation2 + $0x24] sm:$0xff] }
 0x250   : > { %1935 = vmatmul.bf16.gmra.mxu2 %v1756_v49  ;;  %v7996_v35 = vpop.f32.mrf.mxu1  ;;  %v1896_v9 = vpop.f32.mrf.mxu2 }
 0x251   : > { %2802 = vmatmul.bf16.gmra.mxu0 %v2629_v48  ;;  %3018 = vmatmul.bf16.gmra.mxu1 %v7998_v23  ;;  %v8001_v40 = vadd.f32 %v1896_v9, %v1522_v25  ;;  %v8004_v12 = vpop.f32.mrf.mxu0  ;;  %v1529_v10 = vpop.f32.mrf.mxu3  ;;  %v3146_v48 = vrot.slane %v3144_v29, 1  ;;  %v3152_v29 = vshll.u32 %v7452_v52, 16 }
 0x252   : > { %9321 = vst [vmem:[#allocation132_spill] sm:$0xff] %v8004_v12 }
 0x253   : > { %9320 = vst [vmem:[#allocation131_spill] sm:$0xff] %v8001_v40  ;;  %v3147_v16 = vsel %vm3135_vm8, %v3142_v1, %v3146_v48 }
 0x257   : > { %2137 = vmatmul.bf16.gmra.mxu3 %v6801_v59 }
 0x258   : > { %v8008_v49 = vpop.f32.mrf.mxu1  ;;  %v1898_v2 = vpop.f32.mrf.mxu2 }
 0x259   : > { %v8012_v25 = vadd.f32 %v1898_v2, %v1524_v61  ;;  %v8014_v9 = vpop.f32.mrf.mxu0  ;;  %v1532_v13 = vpop.f32.mrf.mxu3 }
 0x25a   : > { %9323 = vst [vmem:[#allocation134_spill] sm:$0xff] %v8014_v9 }
 0x25b   : > { %9322 = vst [vmem:[#allocation133_spill] sm:$0xff] %v8012_v25 }
 0x260   : > { %3380 = vmatmul.bf16.vlgmr.msra.gmra.mxu2 %v3147_v16  ;;  %v8017_v57 = vpop.f32.mrf.mxu1  ;;  %v1901_v63 = vpop.f32.mrf.mxu2  ;;  %v3148_v16 = vshrl.u32 %v7363_v39, 16  ;;  %v8041_v39 = vld [vmem:[#allocation2 + $0x6c] sm:$0xff]  }
 0x261   : > { %2807 = vmatmul.bf16.gmra.mxu0 %v2628_v20  ;;  %3023 = vmatmul.bf16.gmra.mxu1 %v8020_v43  ;;  %v8023_v59 = vadd.f32 %v1901_v63, %v1527_v50  ;;  %v8025_v2 = vpop.f32.mrf.mxu0  ;;  %v1534_v61 = vpop.f32.mrf.mxu3  ;;  %v3154_v20 = vrot.slane %v3152_v29, 1 }
 0x262   : > { %9325 = vst [vmem:[#allocation136_spill] sm:$0xff] %v8025_v2  ;;  %v3150_v63 = vor.u32 %v3148_v16, %v3146_v48  ;;  %v4099_v2 = vrot.slane %v6903_v41, 1  ;;  %v3160_v41 = vshll.u32 %v7537_v27, 16 }
 0x263   : > { %9324 = vst [vmem:[#allocation135_spill] sm:$0xff] %v8023_v59 }
 0x264   : > { %v3155_v25 = vsel %vm3135_vm8, %v3150_v63, %v3154_v20  ;;  %v4101_v12 = vsel %vm4098_vm3, %v4099_v2, %v4100_v15  ;;  %v4102_v63 = vrot.slane %v6234_v53, 1  ;;  %v8070_v53 = vld [vmem:[#allocation2 + $0x2c] sm:$0xff] }
 0x267   : > { %2142 = vmatmul.bf16.gmra.mxu3 %v6843_v0 }
 0x268   : > { %v8028_v46 = vpop.f32.mrf.mxu1  ;;  %v1903_v1 = vpop.f32.mrf.mxu2 }
 0x269   : > { %v8032_v9 = vadd.f32 %v1903_v1, %v1529_v10  ;;  %v8034_v50 = vpop.f32.mrf.mxu0  ;;  %v1537_v59 = vpop.f32.mrf.mxu3 }
 0x26a   : > { %9327 = vst [vmem:[#allocation138_spill] sm:$0xff] %v8034_v50 }
 0x26b   : > { %9326 = vst [vmem:[#allocation137_spill] sm:$0xff] %v8032_v9  ;;  %v4103_v9 = vsel %vm4098_vm3, %v4100_v15, %v4102_v63 }
 0x270   : > { %3385 = vmatmul.bf16.gmra.mxu2 %v3155_v25  ;;  %v8039_v0 = vpop.f32.mrf.mxu1  ;;  %v1906_v29 = vpop.f32.mrf.mxu2  ;;  %v3162_v25 = vrot.slane %v3160_v41, 1 }
 0x271   : > { %4217 = vmatmul.bf16.vlgmr.msra.gmra.mxu0 %v4101_v12  ;;  %3028 = vmatmul.bf16.gmra.mxu1 %v8041_v39  ;;  %v8044_v10 = vadd.f32 %v1906_v29, %v1532_v13  ;;  %v8046_v1 = vpop.f32.mrf.mxu0  ;;  %v1539_v48 = vpop.f32.mrf.mxu3  ;;  %v3156_v12 = vshrl.u32 %v7452_v52, 16  ;;  %v8062_v52 = vld [vmem:[#allocation2 + $0x74] sm:$0xff]  }
 0x272   : > { %9329 = vst [vmem:[#allocation140_spill] sm:$0xff] %v8046_v1 }
 0x273   : > { %9328 = vst [vmem:[#allocation139_spill] sm:$0xff] %v8044_v10  ;;  %v3158_v29 = vor.u32 %v3156_v12, %v3154_v20  ;;  %v3168_v12 = vshll.u32 %v7656_v22, 16 }
 0x275   : > { %v3163_v10 = vsel %vm3135_vm8, %v3158_v29, %v3162_v25  ;;  %v3164_v29 = vshrl.u32 %v7537_v27, 16 }
 0x277   : > { %2147 = vmatmul.bf16.gmra.mxu3 %v6889_v14  ;;  %v5813_v14 = vld [vmem:[%s6431_s11 + $0x1a8] sm:$0xff] }
 0x278   : > { %v8049_v16 = vpop.f32.mrf.mxu1  ;;  %v1908_v2 = vpop.f32.mrf.mxu2  ;;  %3925 = vmatpush.bf16.msra.mxu3 %v5813_v14  ;;  %v3170_v14 = vrot.slane %v3168_v12, 1 }
 0x279   : > { %v8053_v50 = vadd.f32 %v1908_v2, %v1534_v61  ;;  %v8055_v13 = vpop.f32.mrf.mxu0  ;;  %v1542_v1 = vpop.f32.mrf.mxu3 }
 0x27a   : > { %9331 = vst [vmem:[#allocation142_spill] sm:$0xff] %v8055_v13 }
 0x27b   : > { %9330 = vst [vmem:[#allocation141_spill] sm:$0xff] %v8053_v50 }
 0x280   : > { %3390 = vmatmul.bf16.gmra.mxu2 %v3163_v10  ;;  %v8059_v40 = vpop.f32.mrf.mxu1  ;;  %v1911_v41 = vpop.f32.mrf.mxu2 }
 0x281   : > { %4222 = vmatmul.bf16.gmra.mxu0 %v4103_v9  ;;  %3033 = vmatmul.bf16.gmra.mxu1 %v8062_v52  ;;  %v8065_v61 = vadd.f32 %v1911_v41, %v1537_v59  ;;  %v8067_v20 = vpop.f32.mrf.mxu0  ;;  %v1544_v2 = vpop.f32.mrf.mxu3  ;;  %v5829_v9 = vld [vmem:[%s6431_s11 + $0x228] sm:$0xff]  ;;  %v4104_v59 = vrot.slane %v8070_v53, 1 }
 0x282   : > { %9333 = vst [vmem:[#allocation144_spill] sm:$0xff] %v8067_v20  ;;  %4549 = vmatpush.bf16.msra.mxu1 %v5829_v9 }
 0x283   : > { %9332 = vst [vmem:[#allocation143_spill] sm:$0xff] %v8065_v61  ;;  %v3166_v61 = vor.u32 %v3164_v29, %v3162_v25  ;;  %v4105_v3 = vsel %vm4098_vm3, %v4102_v63, %v4104_v59  ;;  %v3176_v25 = vshll.u32 %v7747_v34, 16  ;;  %v8094_v29 = vld [vmem:[#allocation2 + $0x34] sm:$0xff] }
 0x285   : > { %v3171_v50 = vsel %vm3135_vm8, %v3166_v61, %v3170_v14  ;;  %v3178_v63 = vrot.slane %v3176_v25, 1 }
 0x287   : > { %2152 = vmatmul.bf16.gmra.mxu3 %v6947_v58  ;;  %v8086_v58 = vld [vmem:[#allocation2 + $0x7c] sm:$0xff]  }
 0x288   : > { %v8072_v15 = vpop.f32.mrf.mxu1  ;;  %v1913_v10 = vpop.f32.mrf.mxu2 }
 0x289   : > { %v8078_v41 = vadd.f32 %v1913_v10, %v1539_v48  ;;  %v1547_v13 = vpop.f32.mrf.mxu3 }
 0x28b   : > { %9334 = vst [vmem:[#allocation145_spill] sm:$0xff] %v8078_v41 }
 0x28e   : > { %v8080_v20 = vpop.f32.mrf.mxu0 }
 0x28f   : > { %9335 = vst [vmem:[#allocation146_spill] sm:$0xff] %v8080_v20  ;;  %v4106_v20 = vrot.slane %v8094_v29, 1 }
 0x290   : > { %3395 = vmatmul.bf16.gmra.mxu2 %v3171_v50  ;;  %v8084_v9 = vpop.f32.mrf.mxu1 }
 0x291   : > { %4227 = vmatmul.bf16.gmra.mxu0 %v4105_v3  ;;  %3038 = vmatmul.bf16.gmra.mxu1 %v8086_v58  ;;  %v1549_v10 = vpop.f32.mrf.mxu3  ;;  %v3172_v3 = vshrl.u32 %v7656_v22, 16  ;;  %v4107_v17 = vsel %vm4098_vm3, %v4104_v59, %v4106_v20 }
 0x293   : > { %v1916_v27 = vpop.f32.mrf.mxu2 }
 0x294   : > { %v8089_v12 = vadd.f32 %v1916_v27, %v1542_v1  ;;  %v3174_v27 = vor.u32 %v3172_v3, %v3170_v14  ;;  %v3184_v14 = vshll.u32 %v7891_v4, 16 }
 0x296   : > { %9336 = vst [vmem:[#allocation147_spill] sm:$0xff] %v8089_v12  ;;  %v8091_v48 = vpop.f32.mrf.mxu0  ;;  %v3179_v12 = vsel %vm3135_vm8, %v3174_v27, %v3178_v63  ;;  %v5812_v27 = vld [vmem:[%s6431_s11 + $0x1a0] sm:$0xff] }
 0x297   : > { %9337 = vst [vmem:[#allocation148_spill] sm:$0xff] %v8091_v48  ;;  %2157 = vmatmul.bf16.gmra.mxu3 %v7009_v31  ;;  %v8109_v31 = vld [vmem:[#allocation2 + $0x84] sm:$0xff]  }
 0x298   : > { %v8096_v61 = vpop.f32.mrf.mxu1  ;;  %3926 = vmatpush.bf16.msra.mxu3 %v5812_v27 }
 0x29a   : > { %v1552_v48 = vpop.f32.mrf.mxu3 }
 0x29b   : > { %v1918_v50 = vpop.f32.mrf.mxu2 }
 0x29c   : > { %v8101_v41 = vadd.f32 %v1918_v50, %v1544_v2 }
 0x29e   : > { %9338 = vst [vmem:[#allocation149_spill] sm:$0xff] %v8101_v41  ;;  %v8103_v1 = vpop.f32.mrf.mxu0 }
 0x29f   : > { %9339 = vst [vmem:[#allocation150_spill] sm:$0xff] %v8103_v1  ;;  %v6235_v1 = vld [vmem:[#allocation2 + $0x3c] sm:$0xff] }
 0x2a0   : > { %3400 = vmatmul.bf16.gmra.mxu2 %v3179_v12  ;;  %v8107_v30 = vpop.f32.mrf.mxu1  ;;  %v3186_v12 = vrot.slane %v3184_v14, 1  ;;  %v4108_v41 = vrot.slane %v6235_v1, 1 }
 0x2a1   : > { %4232 = vmatmul.bf16.gmra.mxu0 %v4107_v17  ;;  %3043 = vmatmul.bf16.gmra.mxu1 %v8109_v31  ;;  %v3180_v17 = vshrl.u32 %v7747_v34, 16 }
 0x2a2   : > { %v1554_v50 = vpop.f32.mrf.mxu3  ;;  %v4109_v45 = vsel %vm4098_vm3, %v4106_v20, %v4108_v41 }
 0x2a3   : > { %v1921_v22 = vpop.f32.mrf.mxu2 }
 0x2a4   : > { %v8112_v2 = vadd.f32 %v1921_v22, %v1547_v13 }
 0x2a6   : > { %9340 = vst [vmem:[#allocation151_spill] sm:$0xff] %v8112_v2  ;;  %v8114_v25 = vpop.f32.mrf.mxu0 }
 0x2a7   : > { %9341 = vst [vmem:[#allocation152_spill] sm:$0xff] %v8114_v25  ;;  %2162 = vmatmul.bf16.gmra.mxu3 %v7071_v37  ;;  %v3182_v25 = vor.u32 %v3180_v17, %v3178_v63  ;;  %v8130_v37 = vld [vmem:[#allocation2 + $0x8c] sm:$0xff]   ;;  %v6236_v17 = vld [vmem:[#allocation2 + $0x44] sm:$0xff] }
 0x2a8   : > { %v8117_v3 = vpop.f32.mrf.mxu1 }
 0x2a9   : > { %v3187_v47 = vsel %vm3135_vm8, %v3182_v25, %v3186_v12  ;;  %v3192_v25 = vshll.u32 %v7918_v24, 16 }
 0x2aa   : > { %v1557_v2 = vpop.f32.mrf.mxu3 }
 0x2ab   : > { %v1923_v59 = vpop.f32.mrf.mxu2  ;;  %v3194_v20 = vrot.slane %v3192_v25, 1 }
 0x2ac   : > { %v8122_v13 = vadd.f32 %v1923_v59, %v1549_v10  ;;  %v5828_v10 = vld [vmem:[%s6431_s11 + $0x220] sm:$0xff] }
 0x2ad   : > { %4550 = vmatpush.bf16.msra.mxu1 %v5828_v10 }
 0x2ae   : > { %9342 = vst [vmem:[#allocation153_spill] sm:$0xff] %v8122_v13  ;;  %v8124_v22 = vpop.f32.mrf.mxu0 }
 0x2af   : > { %9343 = vst [vmem:[#allocation154_spill] sm:$0xff] %v8124_v22  ;;  %v4110_v22 = vrot.slane %v6236_v17, 1 }
 0x2b0   : > { %3405 = vmatmul.bf16.gmra.mxu2 %v3187_v47  ;;  %v8128_v27 = vpop.f32.mrf.mxu1 }
 0x2b1   : > { %4237 = vmatmul.bf16.gmra.mxu0 %v4109_v45  ;;  %3048 = vmatmul.bf16.gmra.mxu1 %v8130_v37  ;;  %v3188_v45 = vshrl.u32 %v7891_v4, 16 }
 0x2b2   : > { %v1559_v63 = vpop.f32.mrf.mxu3 }
 0x2b3   : > { %v1926_v34 = vpop.f32.mrf.mxu2 }
 0x2b4   : > { %v8133_v1 = vadd.f32 %v1926_v34, %v1552_v48  ;;  %v3190_v34 = vor.u32 %v3188_v45, %v3186_v12  ;;  %v3200_v12 = vshll.u32 %v7947_v60, 16 }
 0x2b6   : > { %9344 = vst [vmem:[#allocation155_spill] sm:$0xff] %v8133_v1  ;;  %v8136_v14 = vpop.f32.mrf.mxu0  ;;  %v3195_v10 = vsel %vm3135_vm8, %v3190_v34, %v3194_v20  ;;  %v4111_v1 = vsel %vm4098_vm3, %v4108_v41, %v4110_v22  ;;  %v9352_v41 = vld [vmem:[#allocation59_spill] sm:$0xff]  ;;  %v3202_v34 = vrot.slane %v3200_v12, 1 }
 0x2b7   : > { %9345 = vst [vmem:[#allocation156_spill] sm:$0xff] %v8136_v14  ;;  %2167 = vmatmul.bf16.gmra.mxu3 %v7136_v51  ;;  %v8151_v51 = vld [vmem:[#allocation2 + $0x94] sm:$0xff]   ;;  %v8172_v12 = vld [vmem:[#allocation2 + $0x9c] sm:$0xff]  }
 0x2b8   : > { %v8139_v59 = vpop.f32.mrf.mxu1 }
 0x2ba   : > { %v1562_v14 = vpop.f32.mrf.mxu3 }
 0x2bb   : > { %v1928_v47 = vpop.f32.mrf.mxu2 }
 0x2bc   : > { %v8143_v13 = vadd.f32 %v1928_v47, %v1554_v50 }
 0x2be   : > { %9346 = vst [vmem:[#allocation157_spill] sm:$0xff] %v8143_v13  ;;  %v8145_v48 = vpop.f32.mrf.mxu0 }
 0x2bf   : > { %9347 = vst [vmem:[#allocation158_spill] sm:$0xff] %v8145_v48 }
 0x2c0   : > { %3410 = vmatmul.bf16.gmra.mxu2 %v3195_v10  ;;  %v8149_v62 = vpop.f32.mrf.mxu1  ;;  %v6237_v10 = vld [vmem:[#allocation2 + $0x4c] sm:$0xff] }
 0x2c1   : > { %4242 = vmatmul.bf16.gmra.mxu0 %v4111_v1  ;;  %9348 = vst [vmem:[#allocation159_spill] sm:$0xff] %v8149_v62  ;;  %3053 = vmatmul.bf16.gmra.mxu1 %v8151_v51  ;;  %v3196_v1 = vshrl.u32 %v7918_v24, 16  ;;  %v4112_v48 = vrot.slane %v6237_v10, 1  ;;  %v9364_v62 = vld [vmem:[#allocation53_spill] sm:$0xff] }
 0x2c2   : > { %v1564_v47 = vpop.f32.mrf.mxu3 }
 0x2c3   : > { %v1931_v4 = vpop.f32.mrf.mxu2  ;;  %v4113_v5 = vsel %vm4098_vm3, %v4110_v22, %v4112_v48  ;;  %v9359_v22 = vld [vmem:[#allocation51_spill] sm:$0xff] }
 0x2c4   : > { %v8154_v25 = vadd.f32 %v1931_v4, %v1557_v2  ;;  %v3198_v4 = vor.u32 %v3196_v1, %v3194_v20  ;;  %v5811_v20 = vld [vmem:[%s6431_s11 + $0x198] sm:$0xff] }
 0x2c5   : > { %3927 = vmatpush.bf16.msra.mxu3 %v5811_v20 }
 0x2c6   : > { %9349 = vst [vmem:[#allocation160_spill] sm:$0xff] %v8154_v25  ;;  %v8156_v50 = vpop.f32.mrf.mxu0 }
 0x2c7   : > { %9350 = vst [vmem:[#allocation161_spill] sm:$0xff] %v8156_v50  ;;  %2172 = vmatmul.bf16.gmra.mxu3 %v9352_v41  ;;  %v9355_v50 = vld [vmem:[#allocation50_spill] sm:$0xff] }
 0x2c8   : > { %v8159_v45 = vpop.f32.mrf.mxu1 }
 0x2c9   : > { %9351 = vst [vmem:[#allocation162_spill] sm:$0xff] %v8159_v45  ;;  %v3203_v45 = vsel %vm3135_vm8, %v3198_v4, %v3202_v34  ;;  %v5826_v4 = vld [vmem:[%s6431_s11 + $0x210] sm:$0xff] }
 0x2ca   : > { %v2133_v47 = vpop.f32.mrf.mxu3 }
 0x2cb   : > { %v1933_v17 = vpop.f32.mrf.mxu2  ;;  %v2237_v25 = vadd.f32 %v2133_v47, %v9355_v50  ;;  %v5827_v50 = vld [vmem:[%s6431_s11 + $0x218] sm:$0xff] }
 0x2cc   : > { %v8163_v13 = vadd.f32 %v1933_v17, %v1559_v63  ;;  %4551 = vmatpush.bf16.msra.mxu1 %v5827_v50 }
 0x2ce   : > { %9353 = vst [vmem:[#allocation59_spill] sm:$0xff] %v8163_v13  ;;  %v8165_v2 = vpop.f32.mrf.mxu0 }
 0x2cf   : > { %9354 = vst [vmem:[#allocation163_spill] sm:$0xff] %v8165_v2  ;;  %v9361_v2 = vld [vmem:[#allocation61_spill] sm:$0xff] }
 0x2d0   : > { %3415 = vmatmul.bf16.gmra.mxu2 %v3203_v45  ;;  %v8170_v24 = vpop.f32.mrf.mxu1  ;;  %4552 = vmatpush.bf16.msra.mxu1 %v5826_v4 }
 0x2d1   : > { %4247 = vmatmul.bf16.gmra.mxu0 %v4113_v5  ;;  %9356 = vst [vmem:[#allocation50_spill] sm:$0xff] %v8170_v24  ;;  %3058 = vmatmul.bf16.gmra.mxu1 %v8172_v12  ;;  %v3208_v5 = vshll.u32 %v7976_v19, 16 }
 0x2d2   : > { %v2135_v1 = vpop.f32.mrf.mxu3 }
 0x2d3   : > { %v1936_v63 = vpop.f32.mrf.mxu2  ;;  %v2238_v45 = vadd.f32 %v2135_v1, %v9359_v22  ;;  %v5825_v1 = vld [vmem:[%s6431_s11 + $0x208] sm:$0xff] }
 0x2d4   : > { %v8175_v17 = vadd.f32 %v1936_v63, %v1562_v14  ;;  %v3204_v14 = vshrl.u32 %v7947_v60, 16  ;;  %v3210_v63 = vrot.slane %v3208_v5, 1  ;;  %v9363_v22 = vld [vmem:[#allocation52_spill] sm:$0xff]  ;;  %4553 = vmatpush.bf16.msra.mxu1 %v5825_v1  ;;  %v3216_v1 = vshll.u32 %v7998_v23, 16 }
 0x2d5   : > { %v2812_v24 = vadd.f32 %v9363_v22, %v2237_v25 }
 0x2d6   : > { %9357 = vst [vmem:[#allocation164_spill] sm:$0xff] %v8175_v17  ;;  %v8178_v41 = vpop.f32.mrf.mxu0  ;;  %v3206_v20 = vor.u32 %v3204_v14, %v3202_v34  ;;  %v9366_v34 = vld [vmem:[#allocation60_spill] sm:$0xff] }
 0x2d7   : > { %9358 = vst [vmem:[#allocation165_spill] sm:$0xff] %v8178_v41  ;;  %2177 = vmatmul.bf16.gmra.mxu3 %v9361_v2  ;;  %v6238_v41 = vld [vmem:[#allocation2 + $0x54] sm:$0xff]  ;;  %v3073_v5 = vadd.f32 %v7943_v54, %v2812_v24  ;;  %v9371_v54 = vld [vmem:[#allocation64_spill] sm:$0xff]  ;;  %v3212_v24 = vshrl.u32 %v7976_v19, 16  ;;  %v2890_v19 = vpack.c.b16 %v7961_v33, %v7961_v33 }
 0x2d8   : > { %v8183_v10 = vpop.f32.mrf.mxu1  ;;  %v4114_v17 = vrot.slane %v6238_v41, 1  ;;  %v5824_v41 = vld [vmem:[%s6431_s11 + $0x200] sm:$0xff] }
 0x2d9   : > { %9360 = vst [vmem:[#allocation51_spill] sm:$0xff] %v8183_v10  ;;  %4554 = vmatpush.bf16.msra.mxu1 %v5824_v41 }
 0x2da   : > { %v2138_v50 = vpop.f32.mrf.mxu3  ;;  %v4115_v2 = vsel %vm4098_vm3, %v4112_v48, %v4114_v17 }
 0x2db   : > { %v1938_v47 = vpop.f32.mrf.mxu2  ;;  %v2239_v10 = vadd.f32 %v2138_v50, %v9364_v62  ;;  %v9368_v62 = vld [vmem:[#allocation54_spill] sm:$0xff]  ;;  %v9369_v50 = vld [vmem:[#allocation55_spill] sm:$0xff] }
 0x2dc   : > { %v3211_v47 = vsel %vm3135_vm8, %v3206_v20, %v3210_v63  ;;  %v2813_v22 = vadd.f32 %v9368_v62, %v2238_v45  ;;  %v3214_v45 = vor.u32 %v3212_v24, %v3210_v63  ;;  %v9373_v62 = vld [vmem:[#allocation56_spill] sm:$0xff]  ;;  %v9376_v63 = vld [vmem:[#allocation58_spill] sm:$0xff] }
 0x2dd   : > { %v9377_v24 = vld [vmem:[#allocation62_spill] sm:$0xff] }
 0x2de   : > { %v8188_v13 = vpop.f32.mrf.mxu0 }
 0x2df   : > { %9362 = vst [vmem:[#allocation61_spill] sm:$0xff] %v8188_v13 }
 0x2e0   : > { %3420 = vmatmul.bf16.gmra.mxu2 %v3211_v47  ;;  %v8195_v60 = vpop.f32.mrf.mxu1 }
 0x2e1   : > { %4252 = vmatmul.bf16.gmra.mxu0 %v4115_v2  ;;  %9365 = vst [vmem:[#allocation52_spill] sm:$0xff] %v8195_v60  ;;  %3063 = vmatmul.bf16.gmra.mxu1 %v9366_v34  ;;  %v3074_v2 = vadd.f32 %v7957_v28, %v2813_v22 }
 0x2e2   : > { %v2140_v20 = vpop.f32.mrf.mxu3 }
 0x2e3   : > { %v3381_v4 = vpop.f32.mrf.mxu2  ;;  %v2240_v48 = vadd.f32 %v2140_v20, %v9369_v50  ;;  %v9374_v50 = vld [vmem:[#allocation57_spill] sm:$0xff] }
 0x2e4   : > { %v8200_v14 = vadd.f32 %v3381_v4, %v3073_v5  ;;  %v3218_v5 = vrot.slane %v3216_v1, 1  ;;  %v6239_v4 = vld [vmem:[#allocation2 + $0x5c] sm:$0xff] }
 0x2e5   : > { %v4116_v41 = vrot.slane %v6239_v4, 1 }
 0x2e6   : > { %9367 = vst [vmem:[#allocation53_spill] sm:$0xff] %v8200_v14  ;;  %v2810_v25 = vpop.f32.mrf.mxu0  ;;  %v2814_v14 = vadd.f32 %v9373_v62, %v2239_v10 }
 0x2e7   : > { %2182 = vmatmul.bf16.gmra.mxu3 %v9371_v54  ;;  %v4117_v28 = vsel %vm4098_vm3, %v4114_v17, %v4116_v41 }
 0x2e8   : > { %v8205_v47 = vpop.f32.mrf.mxu1 }
 0x2e9   : > { %9370 = vst [vmem:[#allocation60_spill] sm:$0xff] %v8205_v47  ;;  %v3219_v47 = vsel %vm3135_vm8, %v3214_v45, %v3218_v5  ;;  %v3224_v45 = vshll.u32 %v8020_v43, 16 }
 0x2ea   : > { %v2143_v20 = vpop.f32.mrf.mxu3 }
 0x2eb   : > { %v3383_v13 = vpop.f32.mrf.mxu2  ;;  %v2241_v60 = vadd.f32 %v2143_v20, %v9374_v50  ;;  %v6240_v20 = vld [vmem:[#allocation2 + $0x64] sm:$0xff] }
 0x2ec   : > { %v8210_v25 = vadd.f32 %v3383_v13, %v3074_v2  ;;  %v3075_v13 = vadd.f32 %v7974_v36, %v2814_v14  ;;  %v2815_v2 = vadd.f32 %v9376_v63, %v2240_v48  ;;  %v9378_v36 = vld [vmem:[#allocation65_spill] sm:$0xff]  ;;  %v4118_v50 = vrot.slane %v6240_v20, 1 }
 0x2ed   : > { %v3226_v48 = vrot.slane %v3224_v45, 1 }
 0x2ee   : > { %9372 = vst [vmem:[#allocation54_spill] sm:$0xff] %v8210_v25  ;;  %v3076_v33 = vadd.f32 %v7985_v44, %v2815_v2 }
 0x2f0   : > { %3425 = vmatmul.bf16.gmra.mxu2 %v3219_v47  ;;  %v8216_v22 = vpop.f32.mrf.mxu1  ;;  %v3220_v47 = vshrl.u32 %v7998_v23, 16 }
 0x2f1   : > { %4257 = vmatmul.bf16.gmra.mxu0 %v4117_v28  ;;  %3068 = vmatmul.bf16.gmra.mxu1 %v2890_v19  ;;  %v5810_v19 = vld [vmem:[%s6431_s11 + $0x190] sm:$0xff] }
 0x2f2   : > { %v2145_v54 = vpop.f32.mrf.mxu3  ;;  %v3222_v14 = vor.u32 %v3220_v47, %v3218_v5  ;;  %3928 = vmatpush.bf16.msra.mxu3 %v5810_v19  ;;  %v9382_v47 = vld [vmem:[#allocation28_spill] sm:$0xff]  ;;  %v3232_v19 = vshll.u32 %v8041_v39, 16 }
 0x2f3   : > { %v3386_v1 = vpop.f32.mrf.mxu2  ;;  %v2242_v4 = vadd.f32 %v2145_v54, %v9377_v24  ;;  %v9381_v54 = vld [vmem:[#allocation67_spill] sm:$0xff] }
 0x2f4   : > { %v8221_v10 = vadd.f32 %v3386_v1, %v3075_v13  ;;  %v9380_v13 = vld [vmem:[#allocation63_spill] sm:$0xff]  ;;  %v3227_v23 = vsel %vm3135_vm8, %v3222_v14, %v3226_v48  ;;  %v9385_v14 = vld [vmem:[#allocation72_spill] sm:$0xff] }
 0x2f5   : > { %v2816_v1 = vadd.f32 %v9380_v13, %v2241_v60  ;;  %v8244_v60 = vpop.f32.mrf.mxu0 }
 0x2f6   : > { %9375 = vst [vmem:[#allocation55_spill] sm:$0xff] %v8221_v10  ;;  %v4119_v10 = vsel %vm4098_vm3, %v4116_v41, %v4118_v50 }
 0x2f7   : > { %2187 = vmatmul.bf16.gmra.mxu3 %v9378_v36  ;;  %v3077_v5 = vadd.f32 %v7996_v35, %v2816_v1  ;;  %v9386_v1 = vld [vmem:[#allocation66_spill] sm:$0xff] }
 0x2f8   : > { %v8225_v17 = vpop.f32.mrf.mxu1 }
 0x2fa   : > { %v2148_v63 = vpop.f32.mrf.mxu3 }
 0x2fb   : > { %v3388_v62 = vpop.f32.mrf.mxu2  ;;  %v2243_v24 = vadd.f32 %v2148_v63, %v9381_v54 }
 0x2fc   : > { %v8231_v28 = vadd.f32 %v3388_v62, %v3076_v33  ;;  %v9384_v33 = vld [vmem:[#allocation68_spill] sm:$0xff] }
 0x2fd   : > { %v2817_v62 = vadd.f32 %v9384_v33, %v2242_v4 }
 0x2fe   : > { %9379 = vst [vmem:[#allocation64_spill] sm:$0xff] %v8231_v28  ;;  %v8260_v28 = vpop.f32.mrf.mxu0 }
 0x2ff   : > { %v3078_v35 = vadd.f32 %v8008_v49, %v2817_v62  ;;  %9390 = vst [vmem:[#allocation58_spill] sm:$0xff] %v8260_v28 }
 0x300   : > { %3430 = vmatmul.bf16.gmra.mxu2 %v3227_v23  ;;  %v8238_v44 = vpop.f32.mrf.mxu1  ;;  %v3234_v23 = vrot.slane %v3232_v19, 1 }
 0x301   : > { %4262 = vmatmul.bf16.gmra.mxu0 %v4119_v10  ;;  %4555 = vmatmul.bf16.vlgmr.msra.gmra.mxu1 %v9382_v47  ;;  %v3228_v10 = vshrl.u32 %v8020_v43, 16 }
 0x302   : > { %v2150_v36 = vpop.f32.mrf.mxu3 }
 0x303   : > { %v3391_v2 = vpop.f32.mrf.mxu2  ;;  %v2244_v20 = vadd.f32 %v2150_v36, %v9385_v14  ;;  %v3230_v63 = vor.u32 %v3228_v10, %v3226_v48  ;;  %v9389_v36 = vld [vmem:[#allocation77_spill] sm:$0xff]  ;;  %v9391_v10 = vld [vmem:[#allocation34_spill] sm:$0xff] }
 0x304   : > { %v8242_v45 = vadd.f32 %v3391_v2, %v3077_v5  ;;  %v6241_v5 = vld [vmem:[#allocation2 + $0x6c] sm:$0xff]  ;;  %v9388_v2 = vld [vmem:[#allocation74_spill] sm:$0xff] }
 0x305   : > { %v4120_v4 = vrot.slane %v6241_v5, 1  ;;  %v2818_v47 = vadd.f32 %v9388_v2, %v2243_v24  ;;  %v3235_v43 = vsel %vm3135_vm8, %v3230_v63, %v3234_v23  ;;  %v9393_v24 = vld [vmem:[#allocation79_spill] sm:$0xff]  ;;  %v9394_v63 = vld [vmem:[#allocation80_spill] sm:$0xff] }
 0x306   : > { %9383 = vst [vmem:[#allocation56_spill] sm:$0xff] %v8242_v45 }
 0x307   : > { %2192 = vmatmul.bf16.gmra.mxu3 %v9386_v1  ;;  %v4121_v45 = vsel %vm4098_vm3, %v4118_v50, %v4120_v4  ;;  %v3079_v48 = vadd.f32 %v8017_v57, %v2818_v47  ;;  %v9099_v1 = vshll.u32 %v8070_v53, 16  ;;  %v9098_v50 = vshrl.u32 %v8070_v53, 16  ;;  %v8276_v47 = vpop.f32.mrf.mxu0 }
 0x308   : > { %v8248_v41 = vpop.f32.mrf.mxu1  ;;  %v3240_v57 = vshll.u32 %v8062_v52, 16  ;;  %9395 = vst [vmem:[#allocation65_spill] sm:$0xff] %v8276_v47 }
 0x30a   : > { %v2153_v33 = vpop.f32.mrf.mxu3 }
 0x30b   : > { %v3393_v13 = vpop.f32.mrf.mxu2  ;;  %v2245_v14 = vadd.f32 %v2153_v33, %v9389_v36  ;;  %v4402_v36 = vrot.slane %v9099_v1, 2 }
 0x30c   : > { %v8254_v54 = vadd.f32 %v3393_v13, %v3078_v35  ;;  %v2819_v35 = vadd.f32 %v9393_v24, %v2244_v20  ;;  %v4401_v20 = vrot.slane %v9098_v50, 1 }
 0x30e   : > { %9387 = vst [vmem:[#allocation57_spill] sm:$0xff] %v8254_v54  ;;  %v3080_v33 = vadd.f32 %v8028_v46, %v2819_v35  ;;  %v4403_v47 = vor.u32 %v4402_v36, %v4401_v20  ;;  %v9399_v46 = vld [vmem:[#allocation85_spill] sm:$0xff] }
 0x310   : > { %3435 = vmatmul.bf16.gmra.mxu2 %v3235_v43  ;;  %v8262_v49 = vpop.f32.mrf.mxu1 }
 0x311   : > { %4267 = vmatmul.bf16.gmra.mxu0 %v4121_v45  ;;  %4560 = vmatmul.bf16.gmra.mxu1 %v9391_v10  ;;  %v3236_v45 = vshrl.u32 %v8041_v39, 16  ;;  %v6242_v10 = vld [vmem:[#allocation2 + $0x74] sm:$0xff] }
 0x312   : > { %v2155_v13 = vpop.f32.mrf.mxu3  ;;  %v4122_v39 = vrot.slane %v6242_v10, 1  ;;  %v3248_v10 = vshll.u32 %v8086_v58, 16 }
 0x313   : > { %v3396_v62 = vpop.f32.mrf.mxu2  ;;  %v2246_v5 = vadd.f32 %v2155_v13, %v9394_v63  ;;  %v3242_v13 = vrot.slane %v3240_v57, 1  ;;  %v9398_v63 = vld [vmem:[#allocation81_spill] sm:$0xff] }
 0x314   : > { %v8266_v19 = vadd.f32 %v3396_v62, %v3079_v48  ;;  %v9396_v48 = vld [vmem:[#allocation69_spill] sm:$0xff]  ;;  %v3238_v62 = vor.u32 %v3236_v45, %v3234_v23  ;;  %v4123_v28 = vsel %vm4098_vm3, %v4120_v4, %v4122_v39  ;;  %v9101_v4 = vshll.u32 %v8094_v29, 16 }
 0x315   : > { %v9400_v45 = vld [vmem:[#allocation33_spill] sm:$0xff] }
 0x316   : > { %9392 = vst [vmem:[#allocation62_spill] sm:$0xff] %v8266_v19  ;;  %v2820_v19 = vadd.f32 %v9398_v63, %v2245_v14  ;;  %v3243_v50 = vsel %vm3135_vm8, %v3238_v62, %v3242_v13  ;;  %v4404_v57 = vsel %vm4384_vm12, %v9400_v45, %v4403_v47  ;;  %v8295_v14 = vpop.f32.mrf.mxu0  ;;  %v5809_v63 = vld [vmem:[%s6431_s11 + $0x188] sm:$0xff] }
 0x317   : > { %2197 = vmatmul.bf16.gmra.mxu3 %v9396_v48  ;;  %9401 = vst [vmem:[#allocation67_spill] sm:$0xff] %v8295_v14 }
 0x318   : > { %v8273_v2 = vpop.f32.mrf.mxu1  ;;  %v3081_v23 = vadd.f32 %v8039_v0, %v2820_v19  ;;  %v3244_v0 = vshrl.u32 %v8062_v52, 16  ;;  %3929 = vmatpush.bf16.msra.mxu3 %v5809_v63 }
 0x31a   : > { %v2158_v54 = vpop.f32.mrf.mxu3 }
 0x31b   : > { %v3398_v43 = vpop.f32.mrf.mxu2  ;;  %v2247_v35 = vadd.f32 %v2158_v54, %v9399_v46  ;;  %v9403_v54 = vld [vmem:[#allocation86_spill] sm:$0xff] }
 0x31c   : > { %v8284_v24 = vadd.f32 %v3398_v43, %v3080_v33  ;;  %v2821_v36 = vadd.f32 %v9403_v54, %v2246_v5  ;;  %v4406_v5 = vrot.slane %v9101_v4, 2  ;;  %v6243_v54 = vld [vmem:[#allocation2 + $0x7c] sm:$0xff] }
 0x31e   : > { %9397 = vst [vmem:[#allocation63_spill] sm:$0xff] %v8284_v24  ;;  %v3082_v46 = vadd.f32 %v8049_v16, %v2821_v36  ;;  %v8316_v1 = vpop.f32.mrf.mxu0 }
 0x320   : > { %3440 = vmatmul.bf16.gmra.mxu2 %v3243_v50  ;;  %v8290_v48 = vpop.f32.mrf.mxu1  ;;  %v9404_v50 = vld [vmem:[#allocation91_spill] sm:$0xff] }
 0x321   : > { %4272 = vmatmul.bf16.gmra.mxu0 %v4123_v28  ;;  %4565 = vmatmul.bf16.gmra.mxu1 %v4404_v57  ;;  %v9100_v28 = vshrl.u32 %v8094_v29, 16  ;;  %v9405_v57 = vld [vmem:[#allocation71_spill] sm:$0xff] }
 0x322   : > { %v2160_v43 = vpop.f32.mrf.mxu3 }
 0x323   : > { %v3401_v33 = vpop.f32.mrf.mxu2  ;;  %v2248_v62 = vadd.f32 %v2160_v43, %v9404_v50  ;;  %v4124_v43 = vrot.slane %v6243_v54, 1  ;;  %v3250_v50 = vrot.slane %v3248_v10, 1 }
 0x324   : > { %v8297_v20 = vadd.f32 %v3401_v33, %v3081_v23  ;;  %v4405_v23 = vrot.slane %v9100_v28, 1  ;;  %v3246_v33 = vor.u32 %v3244_v0, %v3242_v13  ;;  %v9408_v28 = vld [vmem:[#allocation98_spill] sm:$0xff] }
 0x325   : > { %v4125_v25 = vsel %vm4098_vm3, %v4122_v39, %v4124_v43 }
 0x326   : > { %9402 = vst [vmem:[#allocation28_spill] sm:$0xff] %v8297_v20  ;;  %v9407_v20 = vld [vmem:[#allocation92_spill] sm:$0xff]  ;;  %v4407_v24 = vor.u32 %v4406_v5, %v4405_v23  ;;  %v3251_v4 = vsel %vm3135_vm8, %v3246_v33, %v3250_v50  ;;  %v8331_v39 = vpop.f32.mrf.mxu0 }
 0x327   : > { %2202 = vmatmul.bf16.gmra.mxu3 %v9405_v57  ;;  %v2822_v16 = vadd.f32 %v9407_v20, %v2247_v35  ;;  %v9410_v35 = vld [vmem:[#allocation99_spill] sm:$0xff] }
 0x328   : > { %v8304_v19 = vpop.f32.mrf.mxu1  ;;  %v4408_v10 = vsel %vm4384_vm12, %v4403_v47, %v4407_v24  ;;  %v2823_v20 = vadd.f32 %v9410_v35, %v2248_v62  ;;  %v9412_v47 = vld [vmem:[#allocation70_spill] sm:$0xff] }
 0x329   : > { %v3083_v0 = vadd.f32 %v8059_v40, %v2822_v16  ;;  %v9413_v57 = vshrl.u32 %v9412_v47, 16  ;;  %v9414_v54 = vshll.u32 %v9412_v47, 16 }
 0x32a   : > { %v2163_v36 = vpop.f32.mrf.mxu3  ;;  %v3084_v40 = vadd.f32 %v8072_v15, %v2823_v20 }
 0x32b   : > { %v3403_v45 = vpop.f32.mrf.mxu2  ;;  %v2249_v14 = vadd.f32 %v2163_v36, %v9408_v28  ;;  %v9411_v28 = vld [vmem:[#allocation100_spill] sm:$0xff]  ;;  %v4409_v33 = vrot.slane %v9413_v57, 1  ;;  %v4410_v16 = vrot.slane %v9414_v54, 2  ;;  %v9415_v36 = vld [vmem:[#allocation73_spill] sm:$0xff] }
 0x32c   : > { %v8314_v52 = vadd.f32 %v3403_v45, %v3082_v46  ;;  %v3252_v45 = vshrl.u32 %v8086_v58, 16 }
 0x32e   : > { %9406 = vst [vmem:[#allocation68_spill] sm:$0xff] %v8314_v52  ;;  %v4411_v52 = vor.u32 %v4410_v16, %v4409_v33  ;;  %v9417_v33 = vld [vmem:[#allocation108_spill] sm:$0xff] }
 0x330   : > { %3445 = vmatmul.bf16.gmra.mxu2 %v3251_v4  ;;  %v8322_v13 = vpop.f32.mrf.mxu1  ;;  %v3256_v4 = vshll.u32 %v8109_v31, 16 }
 0x331   : > { %4277 = vmatmul.bf16.gmra.mxu0 %v4125_v25  ;;  %4570 = vmatmul.bf16.gmra.mxu1 %v4408_v10  ;;  %v6244_v10 = vld [vmem:[#allocation2 + $0x84] sm:$0xff] }
 0x332   : > { %v2165_v23 = vpop.f32.mrf.mxu3  ;;  %v4126_v58 = vrot.slane %v6244_v10, 1  ;;  %v3258_v35 = vrot.slane %v3256_v4, 1  ;;  %v4412_v4 = vsel %vm4384_vm12, %v4407_v24, %v4411_v52  ;;  %v6245_v10 = vld [vmem:[#allocation2 + $0x8c] sm:$0xff] }
 0x333   : > { %v3406_v63 = vpop.f32.mrf.mxu2  ;;  %v2250_v5 = vadd.f32 %v2165_v23, %v9411_v28  ;;  %v9416_v23 = vld [vmem:[#allocation101_spill] sm:$0xff] }
 0x334   : > { %v8326_v46 = vadd.f32 %v3406_v63, %v3083_v0  ;;  %v3254_v0 = vor.u32 %v3252_v45, %v3250_v50  ;;  %v2824_v28 = vadd.f32 %v9416_v23, %v2249_v14  ;;  %v4127_v47 = vsel %vm4098_vm3, %v4124_v43, %v4126_v58  ;;  %v8350_v50 = vpop.f32.mrf.mxu0 }
 0x335   : > { %v3260_v43 = vshrl.u32 %v8109_v31, 16  ;;  %v4128_v23 = vrot.slane %v6245_v10, 1  ;;  %v6246_v10 = vld [vmem:[#allocation2 + $0x94] sm:$0xff] }
 0x336   : > { %9409 = vst [vmem:[#allocation72_spill] sm:$0xff] %v8326_v46  ;;  %v3259_v20 = vsel %vm3135_vm8, %v3254_v0, %v3258_v35  ;;  %v3085_v45 = vadd.f32 %v8084_v9, %v2824_v28  ;;  %v9418_v0 = vld [vmem:[#allocation82_spill] sm:$0xff] }
 0x337   : > { %2207 = vmatmul.bf16.gmra.mxu3 %v9415_v36  ;;  %v3262_v24 = vor.u32 %v3260_v43, %v3258_v35  ;;  %v5808_v35 = vld [vmem:[%s6431_s11 + $0x180] sm:$0xff] }
 0x338   : > { %v8333_v25 = vpop.f32.mrf.mxu1  ;;  %3930 = vmatpush.bf16.msra.mxu3 %v5808_v35 }
 0x33a   : > { %v2168_v46 = vpop.f32.mrf.mxu3 }
 0x33b   : > { %v3408_v62 = vpop.f32.mrf.mxu2  ;;  %v2251_v15 = vadd.f32 %v2168_v46, %v7776_v21  ;;  %v2825_v21 = vadd.f32 %v9417_v33, %v2250_v5  ;;  %v9419_v33 = vld [vmem:[#allocation76_spill] sm:$0xff] }
 0x33c   : > { %v8342_v63 = vadd.f32 %v3408_v62, %v3084_v40  ;;  %v3264_v62 = vshll.u32 %v8130_v37, 16  ;;  %v8364_v28 = vpop.f32.mrf.mxu0 }
 0x33d   : > { %v3086_v36 = vadd.f32 %v8096_v61, %v2825_v21  ;;  %v2826_v31 = vadd.f32 %v7856_v7, %v2251_v15  ;;  %v4129_v61 = vsel %vm4098_vm3, %v4126_v58, %v4128_v23  ;;  %v4416_v21 = vsel %vm4384_vm12, %v4411_v52, %v9419_v33  ;;  %v9421_v33 = vld [vmem:[#allocation78_spill] sm:$0xff] }
 0x340   : > { %3450 = vmatmul.bf16.gmra.mxu2 %v3259_v20  ;;  %v8348_v57 = vpop.f32.mrf.mxu1 }
 0x341   : > { %4282 = vmatmul.bf16.gmra.mxu0 %v4127_v47  ;;  %4575 = vmatmul.bf16.gmra.mxu1 %v4412_v4 }
 0x342   : > { %v2170_v46 = vpop.f32.mrf.mxu3 }
 0x343   : > { %v3411_v40 = vpop.f32.mrf.mxu2  ;;  %v2252_v54 = vadd.f32 %v2170_v46, %v7848_v32  ;;  %v3266_v32 = vrot.slane %v3264_v62, 1  ;;  %v3268_v62 = vshrl.u32 %v8130_v37, 16 }
 0x344   : > { %v8354_v14 = vadd.f32 %v3411_v40, %v3085_v45  ;;  %v3087_v40 = vadd.f32 %v8107_v30, %v2826_v31  ;;  %v3272_v30 = vshll.u32 %v8151_v51, 16  ;;  %v4130_v31 = vrot.slane %v6246_v10, 1 }
 0x345   : > { %v3267_v45 = vsel %vm3135_vm8, %v3262_v24, %v3266_v32  ;;  %v2827_v15 = vadd.f32 %v7900_v8, %v2252_v54  ;;  %v3270_v24 = vor.u32 %v3268_v62, %v3266_v32 }
 0x346   : > { %v3274_v8 = vrot.slane %v3272_v30, 1  ;;  %v9422_v30 = vld [vmem:[#allocation84_spill] sm:$0xff] }
 0x347   : > { %2212 = vmatmul.bf16.gmra.mxu3 %v9418_v0  ;;  %v3088_v52 = vadd.f32 %v8117_v3, %v2827_v15  ;;  %v9420_v0 = vld [vmem:[#allocation83_spill] sm:$0xff]  ;;  %v3280_v15 = vshll.u32 %v8172_v12, 16 }
 0x348   : > { %v8359_v16 = vpop.f32.mrf.mxu1 }
 0x34a   : > { %v2173_v20 = vpop.f32.mrf.mxu3 }
 0x34b   : > { %v3413_v9 = vpop.f32.mrf.mxu2  ;;  %v2253_v47 = vadd.f32 %v2173_v20, %v7898_v55  ;;  %v8380_v55 = vpop.f32.mrf.mxu0 }
 0x34c   : > { %v8366_v5 = vadd.f32 %v3413_v9, %v3086_v36 }
 0x34d   : > { %v2828_v54 = vadd.f32 %v7913_v26, %v2253_v47 }
 0x34f   : > { %v3089_v32 = vadd.f32 %v8128_v27, %v2828_v54 }
 0x350   : > { %3455 = vmatmul.bf16.gmra.mxu2 %v3267_v45  ;;  %v8372_v4 = vpop.f32.mrf.mxu1  ;;  %v3275_v45 = vsel %vm3135_vm8, %v3270_v24, %v3274_v8 }
 0x351   : > { %4287 = vmatmul.bf16.gmra.mxu0 %v4129_v61  ;;  %4580 = vmatmul.bf16.gmra.mxu1 %v4416_v21  ;;  %v4131_v61 = vsel %vm4098_vm3, %v4128_v23, %v4130_v31  ;;  %v3276_v23 = vshrl.u32 %v8151_v51, 16 }
 0x352   : > { %v2175_v58 = vpop.f32.mrf.mxu3 }
 0x353   : > { %v3416_v46 = vpop.f32.mrf.mxu2  ;;  %v2254_v43 = vadd.f32 %v2175_v58, %v7911_v38  ;;  %v8396_v35 = vpop.f32.mrf.mxu0 }
 0x354   : > { %v8378_v7 = vadd.f32 %v3416_v46, %v3087_v40 }
 0x355   : > { %v2829_v26 = vadd.f32 %v7925_v11, %v2254_v43  ;;  %v3282_v43 = vrot.slane %v3280_v15, 1  ;;  %v9427_v15 = vld [vmem:[#allocation162_spill] sm:$0xff] }
 0x357   : > { %2217 = vmatmul.bf16.gmra.mxu3 %v9420_v0  ;;  %v3090_v27 = vadd.f32 %v8139_v59, %v2829_v26 }
 0x358   : > { %v8385_v36 = vpop.f32.mrf.mxu1 }
 0x35a   : > { %v2178_v38 = vpop.f32.mrf.mxu3 }
 0x35b   : > { %v3418_v9 = vpop.f32.mrf.mxu2  ;;  %v2255_v37 = vadd.f32 %v2178_v38, %v7923_v56  ;;  %v8410_v58 = vpop.f32.mrf.mxu0  ;;  %v9423_v38 = vld [vmem:[#allocation159_spill] sm:$0xff] }
 0x35c   : > { %v8390_v20 = vadd.f32 %v3418_v9, %v3088_v52  ;;  %v3278_v52 = vor.u32 %v3276_v23, %v3274_v8  ;;  %v6247_v9 = vld [vmem:[#allocation2 + $0x9c] sm:$0xff]  ;;  %v3288_v23 = vshll.u32 %v9366_v34, 16 }
 0x35d   : > { %v4132_v0 = vrot.slane %v6247_v9, 1  ;;  %v6248_v9 = vld [vmem:[#allocation2 + $0xa4] sm:$0xff] }
 0x35e   : > { %v3283_v10 = vsel %vm3135_vm8, %v3278_v52, %v3282_v43 }
 0x35f   : > { %v4133_v54 = vsel %vm4098_vm3, %v4130_v31, %v4132_v0  ;;  %v3284_v31 = vshrl.u32 %v8172_v12, 16 }
 0x360   : > { %3460 = vmatmul.bf16.gmra.mxu2 %v3275_v45  ;;  %v8398_v3 = vpop.f32.mrf.mxu1 }
 0x361   : > { %4292 = vmatmul.bf16.gmra.mxu0 %v4131_v61  ;;  %4585 = vmatmul.bf16.gmra.mxu1 %v9421_v33  ;;  %v9424_v61 = vld [vmem:[#allocation87_spill] sm:$0xff]  ;;  %v9426_v33 = vld [vmem:[#allocation125_spill] sm:$0xff]  ;;  %v3286_v52 = vor.u32 %v3284_v31, %v3282_v43  ;;  %v9431_v43 = vld [vmem:[#allocation50_spill] sm:$0xff] }
 0x362   : > { %v2180_v56 = vpop.f32.mrf.mxu3 }
 0x363   : > { %v3421_v40 = vpop.f32.mrf.mxu2  ;;  %v2256_v47 = vadd.f32 %v2180_v56, %v7934_v6  ;;  %v2830_v6 = vadd.f32 %v7937_v18, %v2255_v37  ;;  %v9425_v18 = vld [vmem:[#allocation124_spill] sm:$0xff] }
 0x364   : > { %v8402_v21 = vadd.f32 %v3421_v40, %v3089_v32  ;;  %v8424_v32 = vpop.f32.mrf.mxu0 }
 0x365   : > { %v3091_v8 = vadd.f32 %v9423_v38, %v2830_v6  ;;  %v2831_v37 = vadd.f32 %v9425_v18, %v2256_v47  ;;  %v4134_v6 = vrot.slane %v6248_v9, 1  ;;  %v3290_v47 = vrot.slane %v3288_v23, 1  ;;  %v9429_v38 = vld [vmem:[#allocation126_spill] sm:$0xff] }
 0x367   : > { %2222 = vmatmul.bf16.gmra.mxu3 %v9422_v30  ;;  %v9428_v30 = vld [vmem:[#allocation89_spill] sm:$0xff]  ;;  %v3291_v18 = vsel %vm3135_vm8, %v3286_v52, %v3290_v47  ;;  %v3292_v52 = vshrl.u32 %v9366_v34, 16 }
 0x368   : > { %v8407_v46 = vpop.f32.mrf.mxu1 }
 0x36a   : > { %v2183_v51 = vpop.f32.mrf.mxu3 }
 0x36b   : > { %v3423_v62 = vpop.f32.mrf.mxu2  ;;  %v2257_v24 = vadd.f32 %v2183_v51, %v7950_v42 }
 0x36c   : > { %v8414_v11 = vadd.f32 %v3423_v62, %v3090_v27  ;;  %v3092_v27 = vadd.f32 %v9427_v15, %v2831_v37  ;;  %v4135_v37 = vsel %vm4098_vm3, %v4132_v0, %v4134_v6 }
 0x370   : > { %3465 = vmatmul.bf16.gmra.mxu2 %v3283_v10  ;;  %v8420_v59 = vpop.f32.mrf.mxu1  ;;  %v3114_v10 = vld [vmem:[#allocation2 + $0xac] sm:$0x7] }
 0x371   : > { %4297 = vmatmul.bf16.gmra.mxu0 %v4133_v54  ;;  %4590 = vmatmul.bf16.gmra.mxu1 %v9424_v61  ;;  %v8436_v54 = vpop.f32.mrf.mxu0 }
 0x372   : > { %v2185_v42 = vpop.f32.mrf.mxu3 }
 0x373   : > { %v3426_v45 = vpop.f32.mrf.mxu2  ;;  %v2258_v26 = vadd.f32 %v2185_v42, %v9426_v33  ;;  %v3133_v42 = vunpack.c.l.b16 %v3114_v10  ;;  %v9436_v10 = vld [vmem:[#allocation51_spill] sm:$0xff] }
 0x374   : > { %v8426_v40 = vadd.f32 %v3426_v45, %v3091_v8  ;;  %v2832_v8 = vadd.f32 %v9429_v38, %v2257_v24  ;;  %v9430_v45 = vld [vmem:[#allocation127_spill] sm:$0xff] }
 0x375   : > { %v3134_v23 = vpack.c.b16 %v3133_v42, %v3133_v42  ;;  %v6249_v42 = vld [vmem:[#allocation2 + $0xac] sm:$0xff] }
 0x376   : > { %v3093_v33 = vadd.f32 %v9431_v43, %v2832_v8  ;;  %v9437_v8 = vld [vmem:[#allocation88_spill] sm:$0xff]  ;;  %v4136_v43 = vrot.slane %v6249_v42, 1 }
 0x377   : > { %2227 = vmatmul.bf16.gmra.mxu3 %v9428_v30  ;;  %v9435_v30 = vld [vmem:[#allocation129_spill] sm:$0xff]  ;;  %v3296_v38 = vshll.u32 %v3134_v23, 16 }
 0x378   : > { %v3071_v56 = vpop.f32.mrf.mxu1 }
 0x379   : > { %v9432_v56 = vld [vmem:[#allocation90_spill] sm:$0xff]  ;;  %v8449_v0 = vpop.f32.mrf.mxu0 }
 0x37a   : > { %v2188_v12 = vpop.f32.mrf.mxu3 }
 0x37b   : > { %v3428_v62 = vpop.f32.mrf.mxu2  ;;  %v2259_v61 = vadd.f32 %v2188_v12, %v9430_v45 }
 0x37c   : > { %v8434_v51 = vadd.f32 %v3428_v62, %v3092_v27  ;;  %v9434_v27 = vld [vmem:[#allocation128_spill] sm:$0xff] }
 0x37d   : > { %v2833_v24 = vadd.f32 %v9434_v27, %v2258_v26  ;;  %v9439_v26 = vld [vmem:[#allocation130_spill] sm:$0xff]  ;;  %v9440_v27 = vld [vmem:[#allocation131_spill] sm:$0xff] }
 0x37f   : > { %v3094_v12 = vadd.f32 %v9436_v10, %v2833_v24  ;;  %v3566_v24 = vld [vmem:[#allocation2 + $0xb4] sm:$0x7] }
 0x380   : > { %3470 = vmatmul.bf16.gmra.mxu2 %v3291_v18  ;;  %v3294_v18 = vor.u32 %v3292_v52, %v3290_v47  ;;  %v9441_v47 = vld [vmem:[#allocation52_spill] sm:$0xff] }
 0x381   : > { %4302 = vmatmul.bf16.gmra.mxu0 %v4135_v37  ;;  %4595 = vmatmul.bf16.gmra.mxu1 %v9432_v56  ;;  %v3298_v37 = vrot.slane %v3296_v38, 1  ;;  %v8459_v10 = vpop.f32.mrf.mxu0 }
 0x382   : > { %v2190_v62 = vpop.f32.mrf.mxu3 }
 0x383   : > { %v3431_v31 = vpop.f32.mrf.mxu2  ;;  %v2260_v9 = vadd.f32 %v2190_v62, %v9435_v30  ;;  %v3299_v34 = vsel %vm3135_vm8, %v3294_v18, %v3298_v37  ;;  %v4137_v30 = vsel %vm4098_vm3, %v4134_v6, %v4136_v43  ;;  %v8469_v6 = vpop.f32.mrf.mxu1 }
 0x384   : > { %v8444_v15 = vadd.f32 %v3431_v31, %v3093_v33  ;;  %v2834_v31 = vadd.f32 %v9439_v26, %v2259_v61  ;;  %v9444_v61 = vld [vmem:[#allocation132_spill] sm:$0xff] }
 0x385   : > { %v2835_v42 = vadd.f32 %v9444_v61, %v2260_v9  ;;  %v9449_v9 = vld [vmem:[#allocation134_spill] sm:$0xff] }
 0x386   : > { %9433 = vst [vmem:[#allocation66_spill] sm:$0xff] %v8444_v15  ;;  %v3095_v52 = vadd.f32 %v9441_v47, %v2834_v31  ;;  %v9447_v31 = vld [vmem:[#allocation40_spill] sm:$0xff] }
 0x387   : > { %2232 = vmatmul.bf16.gmra.mxu3 %v9437_v8  ;;  %v9442_v8 = vld [vmem:[#allocation93_spill] sm:$0xff] }
 0x38a   : > { %v2193_v56 = vpop.f32.mrf.mxu3 }
 0x38b   : > { %v3433_v45 = vpop.f32.mrf.mxu2  ;;  %v2261_v62 = vadd.f32 %v2193_v56, %v9440_v27  ;;  %v9445_v56 = vld [vmem:[#allocation133_spill] sm:$0xff] }
 0x38c   : > { %v8453_v33 = vadd.f32 %v3433_v45, %v3094_v12  ;;  %v3665_v12 = vunpack.c.l.b16 %v3566_v24  ;;  %v8474_v24 = vpop.f32.mrf.mxu0 }
 0x38e   : > { %9438 = vst [vmem:[#allocation74_spill] sm:$0xff] %v8453_v33  ;;  %v8467_v27 = vpack.c.b16 %v3665_v12, %v3665_v12  ;;  %v3300_v33 = vshrl.u32 %v3134_v23, 16  ;;  %v9450_v12 = vld [vmem:[#allocation135_spill] sm:$0xff] }
 0x390   : > { %3475 = vmatmul.bf16.gmra.mxu2 %v3299_v34  ;;  %v9446_v34 = vld [vmem:[#allocation60_spill] sm:$0xff]  ;;  %v4138_v47 = vrot.slane %v8467_v27, 1  ;;  %v3302_v61 = vor.u32 %v3300_v33, %v3298_v37  ;;  %v9454_v33 = vld [vmem:[#allocation137_spill] sm:$0xff] }
 0x391   : > { %4307 = vmatmul.bf16.gmra.mxu0 %v4137_v30  ;;  %4600 = vmatmul.bf16.gmra.mxu1 %v9442_v8  ;;  %v3096_v30 = vadd.f32 %v9446_v34, %v2835_v42  ;;  %v8482_v42 = vpop.f32.mrf.mxu1 }
 0x392   : > { %v2195_v26 = vpop.f32.mrf.mxu3 }
 0x393   : > { %v3436_v38 = vpop.f32.mrf.mxu2  ;;  %v2262_v18 = vadd.f32 %v2195_v26, %v9445_v56  ;;  %v4139_v56 = vsel %vm4098_vm3, %v4136_v43, %v4138_v47 }
 0x394   : > { %v8463_v45 = vadd.f32 %v3436_v38, %v3095_v52  ;;  %v2836_v38 = vadd.f32 %v9449_v9, %v2261_v62  ;;  %v9453_v62 = vld [vmem:[#allocation136_spill] sm:$0xff] }
 0x396   : > { %9443 = vst [vmem:[#allocation77_spill] sm:$0xff] %v8463_v45  ;;  %v3097_v23 = vadd.f32 %v8216_v22, %v2836_v38 }
 0x397   : > { %3931 = vmatmul.bf16.vlgmr.msra.gmra.mxu3 %v9447_v31  ;;  %v9451_v31 = vld [vmem:[#allocation95_spill] sm:$0xff] }
 0x399   : > { %v8495_v38 = vpop.f32.mrf.mxu1 }
 0x39a   : > { %v2198_v8 = vpop.f32.mrf.mxu3 }
 0x39b   : > { %v3438_v15 = vpop.f32.mrf.mxu2  ;;  %v2263_v26 = vadd.f32 %v2198_v8, %v9450_v12  ;;  %v9457_v12 = vld [vmem:[#allocation138_spill] sm:$0xff] }
 0x39c   : > { %v8476_v52 = vadd.f32 %v3438_v15, %v3096_v30  ;;  %v8487_v15 = vpop.f32.mrf.mxu0  ;;  %v2837_v30 = vadd.f32 %v9453_v62, %v2262_v18 }
 0x39e   : > { %9448 = vst [vmem:[#allocation34_spill] sm:$0xff] %v8476_v52  ;;  %v3098_v43 = vadd.f32 %v8225_v17, %v2837_v30  ;;  %v9461_v30 = vld [vmem:[#allocation140_spill] sm:$0xff] }
 0x3a0   : > { %3480 = vmatmul.bf16.gmra.mxu2 %v3302_v61  ;;  %v9455_v61 = vld [vmem:[#allocation46_spill] sm:$0xff] }
 0x3a1   : > { %4312 = vmatmul.bf16.gmra.mxu0 %v4139_v56  ;;  %4605 = vmatmul.bf16.gmra.mxu1 %v9451_v31  ;;  %v2838_v56 = vadd.f32 %v9457_v12, %v2263_v26  ;;  %v8508_v26 = vpop.f32.mrf.mxu1  ;;  %v9463_v12 = vld [vmem:[#allocation141_spill] sm:$0xff] }
 0x3a2   : > { %v2200_v37 = vpop.f32.mrf.mxu3 }
 0x3a3   : > { %v3441_v34 = vpop.f32.mrf.mxu2  ;;  %v2264_v9 = vadd.f32 %v2200_v37, %v9454_v33  ;;  %v3099_v18 = vadd.f32 %v8238_v44, %v2838_v56  ;;  %v9459_v37 = vld [vmem:[#allocation96_spill] sm:$0xff] }
 0x3a4   : > { %v8485_v45 = vadd.f32 %v3441_v34, %v3097_v23  ;;  %v9458_v34 = vld [vmem:[#allocation139_spill] sm:$0xff] }
 0x3a5   : > { %v2839_v33 = vadd.f32 %v9461_v30, %v2264_v9  ;;  %v9466_v30 = vld [vmem:[#allocation143_spill] sm:$0xff] }
 0x3a6   : > { %9452 = vst [vmem:[#allocation79_spill] sm:$0xff] %v8485_v45  ;;  %v8499_v45 = vpop.f32.mrf.mxu0 }
 0x3a7   : > { %3936 = vmatmul.bf16.gmra.mxu3 %v9455_v61 }
 0x3aa   : > { %v2203_v23 = vpop.f32.mrf.mxu3 }
 0x3ab   : > { %v3443_v8 = vpop.f32.mrf.mxu2  ;;  %v2265_v31 = vadd.f32 %v2203_v23, %v9458_v34  ;;  %v3100_v34 = vadd.f32 %v8248_v41, %v2839_v33  ;;  %v9469_v33 = vld [vmem:[#allocation144_spill] sm:$0xff] }
 0x3ac   : > { %v8493_v22 = vadd.f32 %v3443_v8, %v3098_v43  ;;  %v9462_v8 = vshll.u32 %v8070_v53, 16 }
 0x3ae   : > { %9456 = vst [vmem:[#allocation80_spill] sm:$0xff] %v8493_v22  ;;  %v3713_v61 = vrot.slane %v9462_v8, 1  ;;  %v8518_v22 = vpop.f32.mrf.mxu1 }
 0x3b1   : > { %4317 = vmatmul.bf16.gmra.mxu0 %v4138_v47  ;;  %4610 = vmatmul.bf16.gmra.mxu1 %v9459_v37  ;;  %v9464_v47 = vld [vmem:[#allocation47_spill] sm:$0xff] }
 0x3b2   : > { %v2205_v43 = vpop.f32.mrf.mxu3  ;;  %v3714_v44 = vsel %vm3135_vm8, %v9464_v47, %v3713_v61 }
 0x3b3   : > { %v3446_v62 = vpop.f32.mrf.mxu2  ;;  %v2266_v23 = vadd.f32 %v2205_v43, %v9463_v12  ;;  %v9467_v43 = vld [vmem:[#allocation102_spill] sm:$0xff] }
 0x3b4   : > { %v8503_v17 = vadd.f32 %v3446_v62, %v3099_v18  ;;  %v9465_v18 = vld [vmem:[#allocation142_spill] sm:$0xff] }
 0x3b5   : > { %v2840_v62 = vadd.f32 %v9465_v18, %v2265_v31  ;;  %v2841_v12 = vadd.f32 %v9469_v33, %v2266_v23  ;;  %v9472_v18 = vshrl.u32 %v8070_v53, 16  ;;  %v9473_v23 = vld [vmem:[#allocation146_spill] sm:$0xff]  ;;  %v9475_v53 = vld [vmem:[#allocation103_spill] sm:$0xff] }
 0x3b6   : > { %9460 = vst [vmem:[#allocation69_spill] sm:$0xff] %v8503_v17 }
 0x3b7   : > { %3941 = vmatmul.bf16.gmra.mxu3 %v3714_v44  ;;  %v3101_v8 = vadd.f32 %v8262_v49, %v2840_v62  ;;  %v8532_v62 = vpop.f32.mrf.mxu1 }
 0x3ba   : > { %v2208_v9 = vpop.f32.mrf.mxu3 }
 0x3bb   : > { %v3448_v56 = vpop.f32.mrf.mxu2  ;;  %v2267_v17 = vadd.f32 %v2208_v9, %v9466_v30  ;;  %v3717_v9 = vor.u32 %v9472_v18, %v3713_v61  ;;  %v3102_v30 = vadd.f32 %v8273_v2, %v2841_v12  ;;  %v9477_v12 = vld [vmem:[#allocation148_spill] sm:$0xff] }
 0x3bc   : > { %v8514_v37 = vadd.f32 %v3448_v56, %v3100_v34  ;;  %v9470_v34 = vshll.u32 %v8094_v29, 16  ;;  %v9471_v56 = vld [vmem:[#allocation145_spill] sm:$0xff] }
 0x3be   : > { %v3721_v44 = vrot.slane %v9470_v34, 1 }
 0x3bf   : > { %v8542_v2 = vpop.f32.mrf.mxu1 }
 0x3c0   : > { %v3722_v49 = vsel %vm3135_vm8, %v3717_v9, %v3721_v44 }
 0x3c1   : > { %4615 = vmatmul.bf16.gmra.mxu1 %v9467_v43 }
 0x3c2   : > { %v2210_v47 = vpop.f32.mrf.mxu3 }
 0x3c3   : > { %v3451_v52 = vpop.f32.mrf.mxu2  ;;  %v2268_v31 = vadd.f32 %v2210_v47, %v9471_v56 }
 0x3c4   : > { %v8522_v41 = vadd.f32 %v3451_v52, %v3101_v8  ;;  %v2842_v8 = vadd.f32 %v9473_v23, %v2267_v17 }
 0x3c5   : > { %v2843_v18 = vadd.f32 %v9477_v12, %v2268_v31  ;;  %v9482_v31 = vld [vmem:[#allocation151_spill] sm:$0xff] }
 0x3c6   : > { %9468 = vst [vmem:[#allocation81_spill] sm:$0xff] %v8522_v41  ;;  %v9474_v41 = vld [vmem:[#allocation147_spill] sm:$0xff]  ;;  %v3103_v47 = vadd.f32 %v8290_v48, %v2842_v8 }
 0x3c7   : > { %3946 = vmatmul.bf16.gmra.mxu3 %v3722_v49  ;;  %v9478_v49 = vld [vmem:[#allocation149_spill] sm:$0xff]  ;;  %v3104_v23 = vadd.f32 %v8304_v19, %v2843_v18  ;;  %v9484_v18 = vld [vmem:[#allocation152_spill] sm:$0xff] }
 0x3ca   : > { %v2213_v33 = vpop.f32.mrf.mxu3 }
 0x3cb   : > { %v3453_v43 = vpop.f32.mrf.mxu2  ;;  %v2269_v34 = vadd.f32 %v2213_v33, %v9474_v41  ;;  %v9480_v41 = vld [vmem:[#allocation75_spill] sm:$0xff] }
 0x3cc   : > { %v8534_v52 = vadd.f32 %v3453_v43, %v3102_v30  ;;  %v9479_v43 = vshrl.u32 %v8094_v29, 16 }
 0x3ce   : > { %v3725_v17 = vor.u32 %v9479_v43, %v3721_v44  ;;  %v9483_v44 = vld [vmem:[#allocation104_spill] sm:$0xff] }
 0x3d0   : > { %v3730_v48 = vsel %vm3135_vm8, %v3725_v17, %v9480_v41  ;;  %v9485_v17 = vld [vmem:[#allocation153_spill] sm:$0xff] }
 0x3d1   : > { %4620 = vmatmul.bf16.gmra.mxu1 %v9475_v53 }
 0x3d2   : > { %v2215_v9 = vpop.f32.mrf.mxu3 }
 0x3d3   : > { %v3456_v56 = vpop.f32.mrf.mxu2  ;;  %v2270_v30 = vadd.f32 %v2215_v9, %v9478_v49 }
 0x3d4   : > { %v8540_v61 = vadd.f32 %v3456_v56, %v3103_v47  ;;  %v9481_v47 = vld [vmem:[#allocation150_spill] sm:$0xff] }
 0x3d5   : > { %v2844_v56 = vadd.f32 %v9481_v47, %v2269_v34  ;;  %v2845_v49 = vadd.f32 %v9484_v18, %v2270_v30  ;;  %v9490_v18 = vld [vmem:[#allocation105_spill] sm:$0xff] }
 0x3d6   : > { %9476 = vst [vmem:[#allocation85_spill] sm:$0xff] %v8540_v61  ;;  %v8554_v61 = vpop.f32.mrf.mxu1 }
 0x3d7   : > { %3951 = vmatmul.bf16.gmra.mxu3 %v3730_v48  ;;  %v3105_v9 = vadd.f32 %v8322_v13, %v2844_v56  ;;  %v3106_v34 = vadd.f32 %v8333_v25, %v2845_v49  ;;  %v9488_v13 = vld [vmem:[#allocation154_spill] sm:$0xff]  ;;  %v9491_v25 = vld [vmem:[#allocation156_spill] sm:$0xff] }
 0x3da   : > { %v2218_v53 = vpop.f32.mrf.mxu3 }
 0x3db   : > { %v3458_v8 = vpop.f32.mrf.mxu2  ;;  %v2271_v12 = vadd.f32 %v2218_v53, %v9482_v31  ;;  %v9489_v31 = vld [vmem:[#allocation155_spill] sm:$0xff] }
 0x3dc   : > { %v8551_v33 = vadd.f32 %v3458_v8, %v3104_v23  ;;  %v9486_v8 = vld [vmem:[#allocation94_spill] sm:$0xff] }
 0x3dd   : > { %v2846_v56 = vadd.f32 %v9488_v13, %v2271_v12  ;;  %v9493_v13 = vld [vmem:[#allocation97_spill] sm:$0xff] }
 0x3de   : > { %v8563_v41 = vpop.f32.mrf.mxu1 }
 0x3e1   : > { %4625 = vmatmul.bf16.gmra.mxu1 %v9483_v44 }
 0x3e2   : > { %v2220_v43 = vpop.f32.mrf.mxu3 }
 0x3e3   : > { %v3461_v29 = vpop.f32.mrf.mxu2  ;;  %v2272_v23 = vadd.f32 %v2220_v43, %v9485_v17 }
 0x3e4   : > { %v8559_v19 = vadd.f32 %v3461_v29, %v3105_v9  ;;  %v3107_v29 = vadd.f32 %v8348_v57, %v2846_v56  ;;  %v9495_v56 = vld [vmem:[#allocation158_spill] sm:$0xff] }
 0x3e5   : > { %v2847_v49 = vadd.f32 %v9491_v25, %v2272_v23  ;;  %v9497_v25 = vld [vmem:[#allocation107_spill] sm:$0xff] }
 0x3e6   : > { %v8572_v30 = vpop.f32.mrf.mxu1 }
 0x3e7   : > { %3956 = vmatmul.bf16.gmra.mxu3 %v9486_v8  ;;  %v9492_v8 = vld [vmem:[#allocation157_spill] sm:$0xff] }
 0x3ea   : > { %v2223_v53 = vpop.f32.mrf.mxu3 }
 0x3eb   : > { %v3463_v48 = vpop.f32.mrf.mxu2  ;;  %v2273_v9 = vadd.f32 %v2223_v53, %v9489_v31 }
 0x3ec   : > { %v8567_v47 = vadd.f32 %v3463_v48, %v3106_v34  ;;  %v3108_v48 = vadd.f32 %v8359_v16, %v2847_v49  ;;  %v9499_v16 = vld [vmem:[#allocation161_spill] sm:$0xff] }
 0x3ed   : > { %v2848_v31 = vadd.f32 %v9495_v56, %v2273_v9  ;;  %v9501_v56 = vld [vmem:[#allocation106_spill] sm:$0xff] }
 0x3ee   : > { %9487 = vst [vmem:[#allocation33_spill] sm:$0xff] %v8567_v47  ;;  %v8583_v57 = vpop.f32.mrf.mxu1 }
 0x3f1   : > { %4630 = vmatmul.bf16.gmra.mxu1 %v9490_v18  ;;  %v9496_v18 = vld [vmem:[#allocation160_spill] sm:$0xff] }
 0x3f2   : > { %v2225_v17 = vpop.f32.mrf.mxu3 }
 0x3f3   : > { %v3466_v44 = vpop.f32.mrf.mxu2  ;;  %v2274_v34 = vadd.f32 %v2225_v17, %v9492_v8 }
 0x3f4   : > { %v8575_v43 = vadd.f32 %v3466_v44, %v3107_v29  ;;  %v3109_v44 = vadd.f32 %v8372_v4, %v2848_v31  ;;  %v9503_v4 = vld [vmem:[#allocation163_spill] sm:$0xff] }
 0x3f5   : > { %v2849_v49 = vadd.f32 %v9499_v16, %v2274_v34 }
 0x3f7   : > { %3961 = vmatmul.bf16.gmra.mxu3 %v9493_v13  ;;  %v8592_v13 = vpop.f32.mrf.mxu1 }
 0x3fa   : > { %v2228_v47 = vpop.f32.mrf.mxu3 }
 0x3fb   : > { %v3468_v12 = vpop.f32.mrf.mxu2  ;;  %v2275_v29 = vadd.f32 %v2228_v47, %v9496_v18 }
 0x3fc   : > { %v8581_v53 = vadd.f32 %v3468_v12, %v3108_v48  ;;  %v9500_v48 = vld [vmem:[#allocation59_spill] sm:$0xff] }
 0x3fd   : > { %v2850_v31 = vadd.f32 %v9503_v4, %v2275_v29  ;;  %v4363_v4 = vld [vmem:[#allocation2 + $0xb4] sm:$0xf] }
 0x3fe   : > { %9494 = vst [vmem:[#allocation86_spill] sm:$0xff] %v8581_v53  ;;  %v3110_v53 = vadd.f32 %v8385_v36, %v2849_v49  ;;  %v9507_v36 = vld [vmem:[#allocation165_spill] sm:$0xff] }
 0x3ff   : > { %v3111_v34 = vadd.f32 %v8398_v3, %v2850_v31  ;;  %v9510_v3 = vld [vmem:[#allocation61_spill] sm:$0xff] }
 0x401   : > { %4635 = vmatmul.bf16.gmra.mxu1 %v9497_v25  ;;  %v9504_v25 = vld [vmem:[#allocation164_spill] sm:$0xff] }
 0x402   : > { %v2230_v8 = vpop.f32.mrf.mxu3 }
 0x403   : > { %v3471_v23 = vpop.f32.mrf.mxu2  ;;  %v2276_v12 = vadd.f32 %v2230_v8, %v9500_v48 }
 0x404   : > { %v8589_v17 = vadd.f32 %v3471_v23, %v3109_v44  ;;  %v8601_v23 = vpop.f32.mrf.mxu1 }
 0x405   : > { %v2851_v49 = vadd.f32 %v9507_v36, %v2276_v12  ;;  %v8618_v12 = vld [vmem:[%s6421_s19] ss:$0 sm:$0xff] }
 0x406   : > { %9498 = vst [vmem:[#allocation91_spill] sm:$0xff] %v8589_v17  ;;  %v9505_v17 = vld [vmem:[#allocation109_spill] sm:$0xff] }
 0x407   : > { %3966 = vmatmul.bf16.gmra.mxu3 %v9501_v56  ;;  %v9508_v56 = vld [vmem:[#allocation111_spill] sm:$0xff] }
 0x40a   : > { %v2233_v18 = vpop.f32.mrf.mxu3 }
 0x40b   : > { %v3473_v9 = vpop.f32.mrf.mxu2  ;;  %v2277_v44 = vadd.f32 %v2233_v18, %v9504_v25 }
 0x40c   : > { %v8597_v47 = vadd.f32 %v3473_v9, %v3110_v53  ;;  %v3112_v53 = vadd.f32 %v8407_v46, %v2851_v49  ;;  %v8609_v9 = vpop.f32.mrf.mxu1 }
 0x40d   : > { %v2852_v31 = vadd.f32 %v9510_v3, %v2277_v44 }
 0x40e   : > { %9502 = vst [vmem:[#allocation71_spill] sm:$0xff] %v8597_v47  ;;  %v4382_v47 = vunpack.c.l.b16 %v4363_v4 }
 0x40f   : > { %v3113_v46 = vadd.f32 %v8420_v59, %v2852_v31  ;;  %v9514_v59 = vld [vmem:[#allocation54_spill] sm:$0xff] }
 0x410   : > { %v4383_v36 = vpack.c.b16 %v4382_v47, %v4382_v47 }
 0x411   : > { %4640 = vmatmul.bf16.gmra.mxu1 %v9505_v17  ;;  %v9511_v17 = vld [vmem:[#allocation53_spill] sm:$0xff] }
 0x412   : > { %v2235_v48 = vpop.f32.mrf.mxu3  ;;  %v4470_v3 = vshrl.u32 %v4383_v36, 16 }
 0x413   : > { %v3476_v16 = vpop.f32.mrf.mxu2 }
 0x414   : > { %v8605_v8 = vadd.f32 %v3476_v16, %v3111_v34 }
 0x416   : > { %9506 = vst [vmem:[#allocation92_spill] sm:$0xff] %v8605_v8 }
 0x417   : > { %3971 = vmatmul.bf16.gmra.mxu3 %v9508_v56  ;;  %v9512_v56 = vld [vmem:[#allocation112_spill] sm:$0xff] }
 0x41a   : > { %v3932_v25 = vpop.f32.mrf.mxu3 }
 0x41b   : > { %v3478_v29 = vpop.f32.mrf.mxu2  ;;  %v4036_v34 = vadd.f32 %v3932_v25, %v9511_v17 }
 0x41c   : > { %v8612_v18 = vadd.f32 %v3478_v29, %v3112_v53  ;;  %v8625_v29 = vpop.f32.mrf.mxu1 }
 0x41d   : > { %v4322_v16 = vadd.f32 %v8244_v60, %v4036_v34  ;;  %v4473_v60 = vshll.u32 %v4383_v36, 16  ;;  %v9516_v34 = vld [vmem:[#allocation3_spill] sm:$0xff] }
 0x41e   : > { %9509 = vst [vmem:[#allocation98_spill] sm:$0xff] %v8612_v18  ;;  %v9517_v18 = vld [vmem:[#allocation114_spill] sm:$0xff] }
 0x41f   : > { %v4660_v49 = vadd.f32 %v8469_v6, %v4322_v16  ;;  %v9515_v6 = vld [vmem:[#allocation58_spill] sm:$0xff] }
 0x421   : > { %4645 = vmatmul.bf16.gmra.mxu1 %v9512_v56  ;;  %v4705_v44 = vadd.f32 %v8618_v12, %v4660_v49  ;;  %v6250_v49 = vld [vmem:[%s6426_s7] sm:$0xff] }
 0x422   : > { %v3934_v4 = vpop.f32.mrf.mxu3 }
 0x423   : > { %v3481_v48 = vpop.f32.mrf.mxu2  ;;  %vm4746_vm6 = vcmp.gt.f32.partialorder %v4705_v44, 0.0  ;;  %v4787_v25 = vmul.f32 0.1, %v4705_v44  ;;  %v4037_v47 = vadd.f32 %v3934_v4, %v9514_v59 }
 0x424   : > { %v8623_v53 = vadd.f32 %v3481_v48, %v3113_v46  ;;  %v4472_v46 = vrot.slane %v4470_v3, 1  ;;  %v4475_v48 = vrot.slane %v4473_v60, 2  ;;  %v9518_v3 = vld [vmem:[#allocation55_spill] sm:$0xff] }
 0x425   : > { %v4828_v31 = vsel %vm4746_vm6, %v4705_v44, %v4787_v25  ;;  %v4323_v17 = vadd.f32 %v9515_v6, %v4037_v47  ;;  %v8636_v25 = vpop.f32.mrf.mxu1  ;;  %v9521_v6 = vld [vmem:[#allocation110_spill] sm:$0xff] }
 0x426   : > { %9513 = vst [vmem:[#allocation99_spill] sm:$0xff] %v8623_v53  ;;  %v4869_v16 = vmul.f32 %v4828_v31, %v9516_v34  ;;  %v4476_v44 = vor.u32 %v4475_v48, %v4472_v46  ;;  %v9520_v31 = vld [vmem:[#allocation8_spill] sm:$0xff] }
 0x427   : > { %v4661_v56 = vadd.f32 %v8482_v42, %v4323_v17  ;;  %3976 = vmatmul.bf16.gmra.mxu3 %v9517_v18  ;;  %v9519_v42 = vld [vmem:[#allocation65_spill] sm:$0xff] }
 0x428   : > { %v4910_v8 = vadd.f32 %v6250_v49, %v4869_v16  ;;  %v4477_v17 = vsel %vm4384_vm12, %v9521_v6, %v4476_v44  ;;  %v9522_v49 = vld [vmem:[#allocation64_spill] sm:$0xff] }
 0x429   : > { %v4706_v36 = vadd.f32 %v8618_v12, %v4661_v56 }
 0x42a   : > { %4951 = vst [vmem:[%s6426_s7] sm:$0xff] %v4910_v8  ;;  %v3937_v4 = vpop.f32.mrf.mxu3  ;;  %v6251_v8 = vld [vmem:[%s6426_s7 + $0x8] sm:$0xff] }
 0x42b   : > { %v3483_v53 = vpop.f32.mrf.mxu2  ;;  %vm4747_vm7 = vcmp.gt.f32.partialorder %v4706_v36, 0.0  ;;  %v4788_v59 = vmul.f32 0.1, %v4706_v36  ;;  %v4038_v60 = vadd.f32 %v3937_v4, %v9518_v3  ;;  %v9523_v3 = vld [vmem:[#allocation67_spill] sm:$0xff] }
 0x42d   : > { %v4829_v47 = vsel %vm4747_vm7, %v4706_v36, %v4788_v59  ;;  %v4324_v53 = vadd.f32 %v9519_v42, %v4038_v60  ;;  %v8648_v4 = vpop.f32.mrf.mxu1 }
 0x42e   : > { %v4870_v18 = vmul.f32 %v4829_v47, %v9520_v31  ;;  %v9524_v47 = vld [vmem:[#allocation9_spill] sm:$0xff] }
 0x42f   : > { %v4662_v34 = vadd.f32 %v8495_v38, %v4324_v53  ;;  %v9525_v53 = vld [vmem:[#allocation115_spill] sm:$0xff]  ;;  %v6252_v31 = vld [vmem:[%s6426_s7 + $0x10] sm:$0xff] }
 0x430   : > { %v4911_v16 = vadd.f32 %v6251_v8, %v4870_v18  ;;  %v9526_v8 = vld [vmem:[#allocation56_spill] sm:$0xff] }
 0x431   : > { %4650 = vmatmul.bf16.gmra.mxu1 %v4477_v17  ;;  %v4707_v46 = vadd.f32 %v8618_v12, %v4662_v34 }
 0x432   : > { %4952 = vst [vmem:[%s6426_s7 + $0x8] sm:$0xff] %v4911_v16  ;;  %v3939_v48 = vpop.f32.mrf.mxu3 }
 0x433   : > { %vm4748_vm9 = vcmp.gt.f32.partialorder %v4707_v46, 0.0  ;;  %v4789_v56 = vmul.f32 0.1, %v4707_v46  ;;  %v4039_v36 = vadd.f32 %v3939_v48, %v9522_v49 }
 0x435   : > { %v4830_v59 = vsel %vm4748_vm9, %v4707_v46, %v4789_v56  ;;  %v4325_v60 = vadd.f32 %v9523_v3, %v4039_v36  ;;  %v9527_v56 = vld [vmem:[#allocation12_spill] sm:$0xff] }
 0x436   : > { %v4871_v38 = vmul.f32 %v4830_v59, %v9524_v47  ;;  %v6253_v59 = vld [vmem:[%s6426_s7 + $0x18] sm:$0xff] }
 0x437   : > { %v4663_v42 = vadd.f32 %v8508_v26, %v4325_v60  ;;  %3981 = vmatmul.bf16.gmra.mxu3 %v9525_v53  ;;  %v8660_v26 = vpop.f32.mrf.mxu1 }
 0x438   : > { %v4912_v18 = vadd.f32 %v6252_v31, %v4871_v38 }
 0x439   : > { %v4708_v6 = vadd.f32 %v8618_v12, %v4663_v42  ;;  %v9528_v42 = vld [vmem:[#allocation57_spill] sm:$0xff] }
 0x43a   : > { %4953 = vst [vmem:[%s6426_s7 + $0x10] sm:$0xff] %v4912_v18  ;;  %v3942_v17 = vpop.f32.mrf.mxu3  ;;  %v9529_v18 = vld [vmem:[#allocation13_spill] sm:$0xff] }
 0x43b   : > { %vm4749_vm12 = vcmp.gt.f32.partialorder %v4708_v6, 0.0  ;;  %v4790_v34 = vmul.f32 0.1, %v4708_v6  ;;  %v4040_v16 = vadd.f32 %v3942_v17, %v9526_v8  ;;  %v6254_v17 = vld [vmem:[%s6426_s7 + $0x20] sm:$0xff] }
 0x43d   : > { %v4831_v46 = vsel %vm4749_vm12, %v4708_v6, %v4790_v34  ;;  %v4326_v48 = vadd.f32 %v8316_v1, %v4040_v16 }
 0x43e   : > { %v4872_v49 = vmul.f32 %v4831_v46, %v9527_v56 }
 0x43f   : > { %v4664_v36 = vadd.f32 %v8518_v22, %v4326_v48  ;;  %v9531_v48 = vld [vmem:[#allocation62_spill] sm:$0xff] }
 0x440   : > { %v4913_v3 = vadd.f32 %v6253_v59, %v4872_v49 }
 0x441   : > { %4655 = vmatmul.bf16.gmra.mxu1 %v4476_v44  ;;  %v4709_v60 = vadd.f32 %v8618_v12, %v4664_v36  ;;  %v9530_v44 = vld [vmem:[#allocation113_spill] sm:$0xff]  ;;  %v9532_v36 = vld [vmem:[#allocation16_spill] sm:$0xff] }
 0x442   : > { %4954 = vst [vmem:[%s6426_s7 + $0x18] sm:$0xff] %v4913_v3  ;;  %v3944_v47 = vpop.f32.mrf.mxu3  ;;  %v6255_v3 = vld [vmem:[%s6426_s7 + $0x28] sm:$0xff] }
 0x443   : > { %vm4750_vm10 = vcmp.gt.f32.partialorder %v4709_v60, 0.0  ;;  %v4791_v38 = vmul.f32 0.1, %v4709_v60  ;;  %v4041_v53 = vadd.f32 %v3944_v47, %v9528_v42 }
 0x445   : > { %v4832_v1 = vsel %vm4750_vm10, %v4709_v60, %v4791_v38  ;;  %v4327_v31 = vadd.f32 %v8331_v39, %v4041_v53  ;;  %v9533_v53 = vld [vmem:[#allocation63_spill] sm:$0xff] }
 0x446   : > { %v4873_v6 = vmul.f32 %v4832_v1, %v9529_v18 }
 0x447   : > { %v4665_v22 = vadd.f32 %v8532_v62, %v4327_v31  ;;  %3986 = vmatmul.bf16.gmra.mxu3 %v9530_v44  ;;  %v6256_v44 = vld [vmem:[%s6426_s7 + $0x30] sm:$0xff] }
 0x448   : > { %v4914_v34 = vadd.f32 %v6254_v17, %v4873_v6 }
 0x449   : > { %v4710_v8 = vadd.f32 %v8618_v12, %v4665_v22 }
 0x44a   : > { %4955 = vst [vmem:[%s6426_s7 + $0x20] sm:$0xff] %v4914_v34  ;;  %v3947_v16 = vpop.f32.mrf.mxu3 }
 0x44b   : > { %vm4751_vm11 = vcmp.gt.f32.partialorder %v4710_v8, 0.0  ;;  %v4792_v46 = vmul.f32 0.1, %v4710_v8  ;;  %v4042_v56 = vadd.f32 %v3947_v16, %v9531_v48 }
 0x44d   : > { %v4833_v49 = vsel %vm4751_vm11, %v4710_v8, %v4792_v46  ;;  %v4328_v39 = vadd.f32 %v8350_v50, %v4042_v56  ;;  %v9534_v50 = vld [vmem:[#allocation17_spill] sm:$0xff]  ;;  %v9536_v46 = vld [vmem:[#allocation28_spill] sm:$0xff] }
 0x44e   : > { %v4874_v59 = vmul.f32 %v4833_v49, %v9532_v36  ;;  %v9537_v49 = vld [vmem:[#allocation20_spill] sm:$0xff]  ;;  %v6257_v36 = vld [vmem:[%s6426_s7 + $0x38] sm:$0xff] }
 0x44f   : > { %v4666_v62 = vadd.f32 %v8542_v2, %v4328_v39  ;;  %v9535_v2 = vld [vmem:[#allocation116_spill] sm:$0xff] }
 0x450   : > { %v4915_v60 = vadd.f32 %v6255_v3, %v4874_v59 }
 0x451   : > { %v4711_v47 = vadd.f32 %v8618_v12, %v4666_v62 }
 0x452   : > { %4956 = vst [vmem:[%s6426_s7 + $0x28] sm:$0xff] %v4915_v60  ;;  %v3949_v38 = vpop.f32.mrf.mxu3 }
 0x453   : > { %vm4752_vm13 = vcmp.gt.f32.partialorder %v4711_v47, 0.0  ;;  %v4793_v42 = vmul.f32 0.1, %v4711_v47  ;;  %v4043_v1 = vadd.f32 %v3949_v38, %v9533_v53 }
 0x455   : > { %v4834_v31 = vsel %vm4752_vm13, %v4711_v47, %v4793_v42  ;;  %v4329_v18 = vadd.f32 %v8364_v28, %v4043_v1  ;;  %v9538_v47 = vld [vmem:[#allocation68_spill] sm:$0xff] }
 0x456   : > { %v4875_v6 = vmul.f32 %v4834_v31, %v9534_v50  ;;  %v6258_v50 = vld [vmem:[%s6426_s7 + $0x40] sm:$0xff] }
 0x457   : > { %v4667_v22 = vadd.f32 %v8554_v61, %v4329_v18  ;;  %3991 = vmatmul.bf16.gmra.mxu3 %v9535_v2  ;;  %v9540_v18 = vld [vmem:[#allocation117_spill] sm:$0xff] }
 0x458   : > { %v4916_v17 = vadd.f32 %v6256_v44, %v4875_v6 }
 0x459   : > { %v4712_v34 = vadd.f32 %v8618_v12, %v4667_v22  ;;  %v8704_v22 = vpop.f32.mrf.mxu1 }
 0x45a   : > { %4957 = vst [vmem:[%s6426_s7 + $0x30] sm:$0xff] %v4916_v17  ;;  %v3952_v8 = vpop.f32.mrf.mxu3  ;;  %v9541_v17 = vld [vmem:[#allocation72_spill] sm:$0xff] }
 0x45b   : > { %vm4753_vm14 = vcmp.gt.f32.partialorder %v4712_v34, 0.0  ;;  %v4794_v16 = vmul.f32 0.1, %v4712_v34  ;;  %v4044_v48 = vadd.f32 %v3952_v8, %v9536_v46 }
 0x45d   : > { %v4835_v56 = vsel %vm4753_vm14, %v4712_v34, %v4794_v16  ;;  %v4330_v28 = vadd.f32 %v8380_v55, %v4044_v48  ;;  %v9539_v55 = vld [vmem:[#allocation21_spill] sm:$0xff]  ;;  %v9542_v16 = vld [vmem:[#allocation24_spill] sm:$0xff] }
 0x45e   : > { %v4876_v39 = vmul.f32 %v4835_v56, %v9537_v49  ;;  %v6259_v56 = vld [vmem:[%s6426_s7 + $0x48] sm:$0xff] }
 0x45f   : > { %v4668_v61 = vadd.f32 %v8563_v41, %v4330_v28  ;;  %v8701_v41 = vpop.f32.mrf.mxu0 }
 0x460   : > { %v4917_v59 = vadd.f32 %v6257_v36, %v4876_v39 }
 0x461   : > { %v4713_v62 = vadd.f32 %v8618_v12, %v4668_v61  ;;  %v8717_v36 = vpop.f32.mrf.mxu1 }
 0x462   : > { %4958 = vst [vmem:[%s6426_s7 + $0x38] sm:$0xff] %v4917_v59  ;;  %v3954_v3 = vpop.f32.mrf.mxu3 }
 0x463   : > { %vm4754_vm15 = vcmp.gt.f32.partialorder %v4713_v62, 0.0  ;;  %v4795_v60 = vmul.f32 0.1, %v4713_v62  ;;  %v4045_v38 = vadd.f32 %v3954_v3, %v9538_v47 }
 0x465   : > { %v4836_v42 = vsel %vm4754_vm15, %v4713_v62, %v4795_v60  ;;  %v4331_v53 = vadd.f32 %v8396_v35, %v4045_v38  ;;  %v9544_v38 = vld [vmem:[#allocation118_spill] sm:$0xff] }
 0x466   : > { %v4877_v1 = vmul.f32 %v4836_v42, %v9539_v55  ;;  %v6260_v42 = vld [vmem:[%s6426_s7 + $0x50] sm:$0xff] }
 0x467   : > { %v4669_v31 = vadd.f32 %v8572_v30, %v4331_v53  ;;  %3996 = vmatmul.bf16.gmra.mxu3 %v9540_v18  ;;  %v8714_v39 = vpop.f32.mrf.mxu0 }
 0x468   : > { %v4918_v6 = vadd.f32 %v6258_v50, %v4877_v1 }
 0x469   : > { %v4714_v2 = vadd.f32 %v8618_v12, %v4669_v31 }
 0x46a   : > { %4959 = vst [vmem:[%s6426_s7 + $0x40] sm:$0xff] %v4918_v6  ;;  %v3957_v44 = vpop.f32.mrf.mxu3  ;;  %v9545_v6 = vld [vmem:[#allocation29_spill] sm:$0xff] }
 0x46b   : > { %vm4755_vm0 = vcmp.gt.f32.partialorder %v4714_v2, 0.0  ;;  %v4796_v35 = vmul.f32 0.1, %v4714_v2  ;;  %v4046_v34 = vadd.f32 %v3957_v44, %v9541_v17 }
 0x46d   : > { %v4837_v8 = vsel %vm4755_vm0, %v4714_v2, %v4796_v35  ;;  %v4332_v30 = vadd.f32 %v8410_v58, %v4046_v34  ;;  %v6261_v35 = vld [vmem:[%s6426_s7 + $0x58] sm:$0xff] }
 0x46e   : > { %v4878_v46 = vmul.f32 %v4837_v8, %v9542_v16 }
 0x46f   : > { %v4670_v48 = vadd.f32 %v8583_v57, %v4332_v30  ;;  %v9543_v57 = vld [vmem:[#allocation25_spill] sm:$0xff]  ;;  %v8728_v18 = vpop.f32.mrf.mxu0 }
 0x470   : > { %v4919_v28 = vadd.f32 %v6259_v56, %v4878_v46 }
 0x471   : > { %v4715_v49 = vadd.f32 %v8618_v12, %v4670_v48  ;;  %v9546_v48 = vld [vmem:[#allocation30_spill] sm:$0xff] }
 0x472   : > { %4960 = vst [vmem:[%s6426_s7 + $0x48] sm:$0xff] %v4919_v28  ;;  %v3959_v61 = vpop.f32.mrf.mxu3 }
 0x473   : > { %vm4756_vm1 = vcmp.gt.f32.partialorder %v4715_v49, 0.0  ;;  %v4797_v59 = vmul.f32 0.1, %v4715_v49  ;;  %v4047_v58 = vadd.f32 %v3959_v61, %v8342_v63  ;;  %v6262_v61 = vld [vmem:[%s6426_s7 + $0x60] sm:$0xff] }
 0x475   : > { %v4838_v62 = vsel %vm4756_vm1, %v4715_v49, %v4797_v59  ;;  %v4333_v3 = vadd.f32 %v8424_v32, %v4047_v58  ;;  %v8730_v32 = vpop.f32.mrf.mxu1  ;;  %v9547_v49 = vld [vmem:[#allocation119_spill] sm:$0xff] }
 0x476   : > { %v4879_v60 = vmul.f32 %v4838_v62, %v9543_v57 }
 0x477   : > { %v4671_v47 = vadd.f32 %v8592_v13, %v4333_v3  ;;  %4001 = vmatmul.bf16.gmra.mxu3 %v9544_v38 }
 0x478   : > { %v4920_v53 = vadd.f32 %v6260_v42, %v4879_v60  ;;  %v9548_v60 = vld [vmem:[#allocation35_spill] sm:$0xff]  ;;  %v6263_v42 = vld [vmem:[%s6426_s7 + $0x68] sm:$0xff] }
 0x479   : > { %v4716_v55 = vadd.f32 %v8618_v12, %v4671_v47 }
 0x47a   : > { %4961 = vst [vmem:[%s6426_s7 + $0x50] sm:$0xff] %v4920_v53  ;;  %v3962_v1 = vpop.f32.mrf.mxu3 }
 0x47b   : > { %vm4757_vm2 = vcmp.gt.f32.partialorder %v4716_v55, 0.0  ;;  %v4798_v31 = vmul.f32 0.1, %v4716_v55  ;;  %v4048_v63 = vadd.f32 %v3962_v1, %v8354_v14 }
 0x47d   : > { %v4839_v50 = vsel %vm4757_vm2, %v4716_v55, %v4798_v31  ;;  %v4334_v13 = vadd.f32 %v8436_v54, %v4048_v63  ;;  %v8740_v54 = vpop.f32.mrf.mxu0 }
 0x47e   : > { %v4880_v2 = vmul.f32 %v4839_v50, %v9545_v6 }
 0x47f   : > { %v4672_v44 = vadd.f32 %v8601_v23, %v4334_v13  ;;  %v8743_v23 = vpop.f32.mrf.mxu1 }
 0x480   : > { %v4921_v17 = vadd.f32 %v6261_v35, %v4880_v2  ;;  %v9550_v2 = vld [vmem:[#allocation120_spill] sm:$0xff] }
 0x481   : > { %v4717_v34 = vadd.f32 %v8618_v12, %v4672_v44  ;;  %v6264_v44 = vld [vmem:[%s6426_s7 + $0x70] sm:$0xff] }
 0x482   : > { %4962 = vst [vmem:[%s6426_s7 + $0x58] sm:$0xff] %v4921_v17  ;;  %v3964_v8 = vpop.f32.mrf.mxu3 }
 0x483   : > { %vm4758_vm4 = vcmp.gt.f32.partialorder %v4717_v34, 0.0  ;;  %v4799_v14 = vmul.f32 0.1, %v4717_v34  ;;  %v4049_v30 = vadd.f32 %v3964_v8, %v8366_v5 }
 0x485   : > { %v4840_v16 = vsel %vm4758_vm4, %v4717_v34, %v4799_v14  ;;  %v4335_v46 = vadd.f32 %v8449_v0, %v4049_v30  ;;  %v8754_v38 = vpop.f32.mrf.mxu0 }
 0x486   : > { %v4881_v56 = vmul.f32 %v4840_v16, %v9546_v48  ;;  %v9551_v16 = vld [vmem:[#allocation39_spill] sm:$0xff] }
 0x487   : > { %v4673_v28 = vadd.f32 %v8609_v9, %v4335_v46  ;;  %4006 = vmatmul.bf16.gmra.mxu3 %v9547_v49  ;;  %v8757_v55 = vpop.f32.mrf.mxu1 }
 0x488   : > { %v4922_v59 = vadd.f32 %v6262_v61, %v4881_v56  ;;  %v6265_v56 = vld [vmem:[%s6426_s7 + $0x78] sm:$0xff] }
 0x489   : > { %v4718_v58 = vadd.f32 %v8618_v12, %v4673_v28 }
 0x48a   : > { %4963 = vst [vmem:[%s6426_s7 + $0x60] sm:$0xff] %v4922_v59  ;;  %v3967_v5 = vpop.f32.mrf.mxu3 }
 0x48b   : > { %vm4759_vm5 = vcmp.gt.f32.partialorder %v4718_v58, 0.0  ;;  %v4800_v0 = vmul.f32 0.1, %v4718_v58  ;;  %v4050_v62 = vadd.f32 %v3967_v5, %v8378_v7 }
 0x48d   : > { %v4841_v3 = vsel %vm4759_vm5, %v4718_v58, %v4800_v0  ;;  %v4336_v57 = vadd.f32 %v8459_v10, %v4050_v62  ;;  %v8768_v34 = vpop.f32.mrf.mxu0 }
 0x48e   : > { %v4882_v47 = vmul.f32 %v4841_v3, %v9548_v60  ;;  %v6266_v60 = vld [vmem:[%s6426_s7 + $0x80] sm:$0xff] }
 0x48f   : > { %v4674_v9 = vadd.f32 %v8625_v29, %v4336_v57  ;;  %v9549_v29 = vld [vmem:[#allocation36_spill] sm:$0xff]  ;;  %v9553_v57 = vld [vmem:[#allocation122_spill] sm:$0xff] }
 0x490   : > { %v4923_v53 = vadd.f32 %v6263_v42, %v4882_v47 }
 0x491   : > { %v4719_v1 = vadd.f32 %v8618_v12, %v4674_v9 }
 0x492   : > { %4964 = vst [vmem:[%s6426_s7 + $0x68] sm:$0xff] %v4923_v53  ;;  %v3969_v31 = vpop.f32.mrf.mxu3 }
 0x493   : > { %vm4760_vm3 = vcmp.gt.f32.partialorder %v4719_v1, 0.0  ;;  %v4801_v7 = vmul.f32 0.1, %v4719_v1  ;;  %v4051_v10 = vadd.f32 %v3969_v31, %v8390_v20  ;;  %v8771_v20 = vpop.f32.mrf.mxu1 }
 0x495   : > { %v4842_v63 = vsel %vm4760_vm3, %v4719_v1, %v4801_v7  ;;  %v4337_v50 = vadd.f32 %v8474_v24, %v4051_v10 }
 0x496   : > { %v4883_v13 = vmul.f32 %v4842_v63, %v9549_v29 }
 0x497   : > { %v4675_v6 = vadd.f32 %v8636_v25, %v4337_v50  ;;  %4011 = vmatmul.bf16.gmra.mxu3 %v9550_v2  ;;  %v6267_v50 = vld [vmem:[%s6426_s7 + $0x88] sm:$0xff] }
 0x498   : > { %v4924_v35 = vadd.f32 %v6264_v44, %v4883_v13 }
 0x499   : > { %v4720_v17 = vadd.f32 %v8618_v12, %v4675_v6 }
 0x49a   : > { %4965 = vst [vmem:[%s6426_s7 + $0x70] sm:$0xff] %v4924_v35  ;;  %v3972_v8 = vpop.f32.mrf.mxu3  ;;  %v9555_v35 = vld [vmem:[#allocation48_spill] sm:$0xff] }
 0x49b   : > { %vm4761_vm6 = vcmp.gt.f32.partialorder %v4720_v17, 0.0  ;;  %v4802_v24 = vmul.f32 0.1, %v4720_v17  ;;  %v4052_v14 = vadd.f32 %v3972_v8, %v8402_v21  ;;  %v8781_v21 = vpop.f32.mrf.mxu0  ;;  %v8783_v5 = vpop.f32.mrf.mxu1 }
 0x49d   : > { %v4843_v30 = vsel %vm4761_vm6, %v4720_v17, %v4802_v24  ;;  %v4338_v25 = vadd.f32 %v8487_v15, %v4052_v14  ;;  %v9556_v24 = vld [vmem:[#allocation123_spill] sm:$0xff]  ;;  %v6268_v14 = vld [vmem:[%s6426_s7 + $0x90] sm:$0xff] }
 0x49e   : > { %v4884_v46 = vmul.f32 %v4843_v30, %v9551_v16 }
 0x49f   : > { %v4676_v48 = vadd.f32 %v8648_v4, %v4338_v25  ;;  %v9552_v4 = vld [vmem:[#allocation41_spill] sm:$0xff] }
 0x4a0   : > { %v4925_v28 = vadd.f32 %v6265_v56, %v4884_v46  ;;  %v9557_v46 = vld [vmem:[#allocation66_spill] sm:$0xff] }
 0x4a1   : > { %v4721_v49 = vadd.f32 %v8618_v12, %v4676_v48 }
 0x4a2   : > { %4966 = vst [vmem:[%s6426_s7 + $0x78] sm:$0xff] %v4925_v28  ;;  %v3974_v61 = vpop.f32.mrf.mxu3  ;;  %v9558_v28 = vld [vmem:[#allocation6_spill] sm:$0xff] }
 0x4a3   : > { %vm4762_vm7 = vcmp.gt.f32.partialorder %v4721_v49, 0.0  ;;  %v4803_v59 = vmul.f32 0.1, %v4721_v49  ;;  %v4053_v58 = vadd.f32 %v3974_v61, %v8414_v11  ;;  %v8794_v31 = vpop.f32.mrf.mxu0  ;;  %v8797_v10 = vpop.f32.mrf.mxu1  ;;  %v3847_v61 = vshll.u32 %v8467_v27, 16 }
 0x4a5   : > { %v4844_v15 = vsel %vm4762_vm7, %v4721_v49, %v4803_v59  ;;  %v4339_v0 = vadd.f32 %v8499_v45, %v4053_v58  ;;  %v6269_v58 = vld [vmem:[%s6426_s7 + $0x98] sm:$0xff] }
 0x4a6   : > { %v4885_v62 = vmul.f32 %v4844_v15, %v9552_v4 }
 0x4a7   : > { %v4677_v3 = vadd.f32 %v8660_v26, %v4339_v0  ;;  %4016 = vmatmul.bf16.gmra.mxu3 %v9553_v57  ;;  %v9554_v26 = vld [vmem:[#allocation44_spill] sm:$0xff] }
 0x4a8   : > { %v4926_v47 = vadd.f32 %v6266_v60, %v4885_v62  ;;  %v9559_v60 = vld [vmem:[#allocation74_spill] sm:$0xff] }
 0x4a9   : > { %v4722_v9 = vadd.f32 %v8618_v12, %v4677_v3  ;;  %v3849_v3 = vrot.slane %v3847_v61, 1 }
 0x4aa   : > { %4967 = vst [vmem:[%s6426_s7 + $0x80] sm:$0xff] %v4926_v47  ;;  %v3977_v11 = vpop.f32.mrf.mxu3 }
 0x4ab   : > { %vm4763_vm9 = vcmp.gt.f32.partialorder %v4722_v9, 0.0  ;;  %v4804_v42 = vmul.f32 0.1, %v4722_v9  ;;  %v4054_v53 = vadd.f32 %v3977_v11, %v8426_v40  ;;  %v8811_v25 = vpop.f32.mrf.mxu1  ;;  %v9560_v11 = vld [vmem:[#allocation4_spill] sm:$0xff] }
 0x4ad   : > { %v4845_v1 = vsel %vm4763_vm9, %v4722_v9, %v4804_v42  ;;  %v4340_v45 = vadd.f32 %v8701_v41, %v4054_v53  ;;  %v9561_v53 = vld [vmem:[#allocation121_spill] sm:$0xff] }
 0x4ae   : > { %v4886_v7 = vmul.f32 %v4845_v1, %v9554_v26  ;;  %v3850_v1 = vsel %vm3135_vm8, %v9561_v53, %v3849_v3  ;;  %v6270_v26 = vld [vmem:[%s6426_s7 + $0xa0] sm:$0xff] }
 0x4af   : > { %v4678_v63 = vadd.f32 %v8704_v22, %v4340_v45  ;;  %v8808_v22 = vpop.f32.mrf.mxu0 }
 0x4b0   : > { %v4927_v29 = vadd.f32 %v6267_v50, %v4886_v7 }
 0x4b1   : > { %v4723_v13 = vadd.f32 %v8618_v12, %v4678_v63 }
 0x4b2   : > { %4968 = vst [vmem:[%s6426_s7 + $0x88] sm:$0xff] %v4927_v29  ;;  %v3979_v6 = vpop.f32.mrf.mxu3 }
 0x4b3   : > { %vm4764_vm12 = vcmp.gt.f32.partialorder %v4723_v13, 0.0  ;;  %v4805_v40 = vmul.f32 0.1, %v4723_v13  ;;  %v4055_v41 = vadd.f32 %v3979_v6, %v8434_v51  ;;  %v8825_v57 = vpop.f32.mrf.mxu1 }
 0x4b5   : > { %v4846_v2 = vsel %vm4764_vm12, %v4723_v13, %v4805_v40  ;;  %v4341_v44 = vadd.f32 %v8714_v39, %v4055_v41  ;;  %v9562_v13 = vld [vmem:[#allocation77_spill] sm:$0xff] }
 0x4b6   : > { %v4887_v17 = vmul.f32 %v4846_v2, %v9555_v35  ;;  %v9563_v2 = vld [vmem:[#allocation7_spill] sm:$0xff] }
 0x4b7   : > { %v4679_v8 = vadd.f32 %v8717_v36, %v4341_v44  ;;  %4021 = vmatmul.bf16.gmra.mxu3 %v9556_v24  ;;  %v8822_v4 = vpop.f32.mrf.mxu0 }
 0x4b8   : > { %v4928_v30 = vadd.f32 %v6268_v14, %v4887_v17  ;;  %v3851_v17 = vshrl.u32 %v8467_v27, 16 }
 0x4b9   : > { %v4724_v16 = vadd.f32 %v8618_v12, %v4679_v8  ;;  %v6271_v8 = vld [vmem:[%s6426_s7 + $0xa8] sm:$0xff] }
 0x4ba   : > { %4969 = vst [vmem:[%s6426_s7 + $0x90] sm:$0xff] %v4928_v30  ;;  %v3982_v51 = vpop.f32.mrf.mxu3 }
 0x4bb   : > { %vm4765_vm10 = vcmp.gt.f32.partialorder %v4724_v16, 0.0  ;;  %v4806_v39 = vmul.f32 0.1, %v4724_v16  ;;  %v4056_v48 = vadd.f32 %v3982_v51, %v9557_v46  ;;  %v8839_v40 = vpop.f32.mrf.mxu1  ;;  %v9564_v51 = vld [vmem:[#allocation34_spill] sm:$0xff]  ;;  %v3853_v46 = vor.u32 %v3851_v17, %v3849_v3 }
 0x4bd   : > { %v4847_v56 = vsel %vm4765_vm10, %v4724_v16, %v4806_v39  ;;  %v4342_v36 = vadd.f32 %v8728_v18, %v4056_v48 }
 0x4be   : > { %v4888_v49 = vmul.f32 %v4847_v56, %v9558_v28 }
 0x4bf   : > { %v4680_v59 = vadd.f32 %v8730_v32, %v4342_v36  ;;  %v8837_v6 = vpop.f32.mrf.mxu0 }
 0x4c0   : > { %v4929_v15 = vadd.f32 %v6269_v58, %v4888_v49  ;;  %v6272_v49 = vld [vmem:[%s6426_s7 + $0xb0] sm:$0xff] }
 0x4c1   : > { %v4725_v0 = vadd.f32 %v8618_v12, %v4680_v59 }
 0x4c2   : > { %4970 = vst [vmem:[%s6426_s7 + $0x98] sm:$0xff] %v4929_v15  ;;  %v3984_v62 = vpop.f32.mrf.mxu3 }
 0x4c3   : > { %vm4766_vm11 = vcmp.gt.f32.partialorder %v4725_v0, 0.0  ;;  %v4807_v18 = vmul.f32 0.1, %v4725_v0  ;;  %v4057_v47 = vadd.f32 %v3984_v62, %v9559_v60  ;;  %v8853_v36 = vpop.f32.mrf.mxu1 }
 0x4c5   : > { %v4848_v9 = vsel %vm4766_vm11, %v4725_v0, %v4807_v18  ;;  %v4343_v32 = vadd.f32 %v8740_v54, %v4057_v47  ;;  %v9567_v18 = vld [vmem:[#allocation10_spill] sm:$0xff] }
 0x4c6   : > { %v4889_v42 = vmul.f32 %v4848_v9, %v9560_v11  ;;  %v6273_v9 = vld [vmem:[%s6426_s7 + $0xb8] sm:$0xff] }
 0x4c7   : > { %v4681_v45 = vadd.f32 %v8743_v23, %v4343_v32  ;;  %4026 = vmatmul.bf16.gmra.mxu3 %v3850_v1  ;;  %v8850_v56 = vpop.f32.mrf.mxu0 }
 0x4c8   : > { %v4930_v7 = vadd.f32 %v6270_v26, %v4889_v42 }
 0x4c9   : > { %v4726_v63 = vadd.f32 %v8618_v12, %v4681_v45  ;;  %v9568_v45 = vld [vmem:[#allocation80_spill] sm:$0xff] }
 0x4ca   : > { %4971 = vst [vmem:[%s6426_s7 + $0xa0] sm:$0xff] %v4930_v7  ;;  %v3987_v50 = vpop.f32.mrf.mxu3 }
 0x4cb   : > { %vm4767_vm13 = vcmp.gt.f32.partialorder %v4726_v63, 0.0  ;;  %v4808_v29 = vmul.f32 0.1, %v4726_v63  ;;  %v4058_v54 = vadd.f32 %v3987_v50, %v9562_v13  ;;  %v8866_v11 = vpop.f32.mrf.mxu1 }
 0x4cd   : > { %v4849_v41 = vsel %vm4767_vm13, %v4726_v63, %v4808_v29  ;;  %v4344_v23 = vadd.f32 %v8754_v38, %v4058_v54  ;;  %v9569_v63 = vld [vmem:[#allocation11_spill] sm:$0xff] }
 0x4ce   : > { %v4890_v44 = vmul.f32 %v4849_v41, %v9563_v2  ;;  %v6274_v29 = vld [vmem:[%s6426_s7 + $0xc0] sm:$0xff] }
 0x4cf   : > { %v4682_v35 = vadd.f32 %v8757_v55, %v4344_v23  ;;  %v9565_v55 = vld [vmem:[#allocation5_spill] sm:$0xff]  ;;  %v8863_v47 = vpop.f32.mrf.mxu0 }
 0x4d0   : > { %v4931_v24 = vadd.f32 %v6271_v8, %v4890_v44 }
 0x4d1   : > { %v4727_v14 = vadd.f32 %v8618_v12, %v4682_v35  ;;  %v9570_v35 = vld [vmem:[#allocation69_spill] sm:$0xff] }
 0x4d2   : > { %4972 = vst [vmem:[%s6426_s7 + $0xa8] sm:$0xff] %v4931_v24  ;;  %v3989_v30 = vpop.f32.mrf.mxu3  ;;  %v9571_v24 = vld [vmem:[#allocation14_spill] sm:$0xff] }
 0x4d3   : > { %vm4768_vm8 = vcmp.gt.f32.partialorder %v4727_v14, 0.0  ;;  %v4809_v16 = vmul.f32 0.1, %v4727_v14  ;;  %v4059_v39 = vadd.f32 %v3989_v30, %v9564_v51  ;;  %v8879_v2 = vpop.f32.mrf.mxu1  ;;  %v6275_v30 = vld [vmem:[%s6426_s7 + $0xc8] sm:$0xff] }
 0x4d5   : > { %v4850_v38 = vsel %vm4768_vm8, %v4727_v14, %v4809_v16  ;;  %v4345_v48 = vadd.f32 %v8768_v34, %v4059_v39  ;;  %v9566_v34 = vld [vmem:[#allocation79_spill] sm:$0xff] }
 0x4d6   : > { %v4891_v27 = vmul.f32 %v4850_v38, %v9565_v55 }
 0x4d7   : > { %v4683_v28 = vadd.f32 %v8771_v20, %v4345_v48  ;;  %4031 = vmatmul.bf16.gmra.mxu3 %v3853_v46  ;;  %v8876_v41 = vpop.f32.mrf.mxu0 }
 0x4d8   : > { %v4932_v61 = vadd.f32 %v6272_v49, %v4891_v27 }
 0x4d9   : > { %v4728_v59 = vadd.f32 %v8618_v12, %v4683_v28  ;;  %v9572_v28 = vld [vmem:[#allocation15_spill] sm:$0xff] }
 0x4da   : > { %4973 = vst [vmem:[%s6426_s7 + $0xb0] sm:$0xff] %v4932_v61  ;;  %v3992_v58 = vpop.f32.mrf.mxu3  ;;  %v6276_v61 = vld [vmem:[%s6426_s7 + $0xd0] sm:$0xff] }
 0x4db   : > { %vm4769_vm14 = vcmp.gt.f32.partialorder %v4728_v59, 0.0  ;;  %v4810_v15 = vmul.f32 0.1, %v4728_v59  ;;  %v4060_v0 = vadd.f32 %v3992_v58, %v9566_v34  ;;  %v8891_v55 = vpop.f32.mrf.mxu1  ;;  %v9573_v34 = vld [vmem:[#allocation81_spill] sm:$0xff] }
 0x4dd   : > { %v4851_v62 = vsel %vm4769_vm14, %v4728_v59, %v4810_v15  ;;  %v4346_v3 = vadd.f32 %v8781_v21, %v4060_v0 }
 0x4de   : > { %v4892_v60 = vmul.f32 %v4851_v62, %v9567_v18  ;;  %v9574_v18 = vld [vmem:[#allocation18_spill] sm:$0xff] }
 0x4df   : > { %v4684_v20 = vadd.f32 %v8783_v5, %v4346_v3  ;;  %v8889_v48 = vpop.f32.mrf.mxu0 }
 0x4e0   : > { %v4933_v32 = vadd.f32 %v6273_v9, %v4892_v60  ;;  %v6277_v9 = vld [vmem:[%s6426_s7 + $0xd8] sm:$0xff] }
 0x4e1   : > { %v4729_v42 = vadd.f32 %v8618_v12, %v4684_v20 }
 0x4e2   : > { %4974 = vst [vmem:[%s6426_s7 + $0xb8] sm:$0xff] %v4933_v32  ;;  %v3994_v53 = vpop.f32.mrf.mxu3 }
 0x4e3   : > { %vm4770_vm15 = vcmp.gt.f32.partialorder %v4729_v42, 0.0  ;;  %v4811_v1 = vmul.f32 0.1, %v4729_v42  ;;  %v4061_v21 = vadd.f32 %v3994_v53, %v9568_v45 }
 0x4e5   : > { %v4852_v26 = vsel %vm4770_vm15, %v4729_v42, %v4811_v1  ;;  %v4347_v7 = vadd.f32 %v8794_v31, %v4061_v21 }
 0x4e6   : > { %v4893_v5 = vmul.f32 %v4852_v26, %v9569_v63  ;;  %v9575_v26 = vld [vmem:[#allocation19_spill] sm:$0xff] }
 0x4e7   : > { %v4685_v50 = vadd.f32 %v8797_v10, %v4347_v7 }
 0x4e8   : > { %v4934_v13 = vadd.f32 %v6274_v29, %v4893_v5  ;;  %v6278_v5 = vld [vmem:[%s6426_s7 + $0xe0] sm:$0xff] }
 0x4e9   : > { %v4730_v54 = vadd.f32 %v8618_v12, %v4685_v50 }
 0x4ea   : > { %4975 = vst [vmem:[%s6426_s7 + $0xc0] sm:$0xff] %v4934_v13  ;;  %v3997_v23 = vpop.f32.mrf.mxu3 }
 0x4eb   : > { %vm4771_vm0 = vcmp.gt.f32.partialorder %v4730_v54, 0.0  ;;  %v4812_v44 = vmul.f32 0.1, %v4730_v54  ;;  %v4062_v31 = vadd.f32 %v3997_v23, %v9570_v35  ;;  %v9576_v23 = vld [vmem:[#allocation85_spill] sm:$0xff] }
 0x4ed   : > { %v4853_v17 = vsel %vm4771_vm0, %v4730_v54, %v4812_v44  ;;  %v4348_v8 = vadd.f32 %v8808_v22, %v4062_v31  ;;  %v9577_v31 = vld [vmem:[#allocation22_spill] sm:$0xff] }
 0x4ee   : > { %v4894_v10 = vmul.f32 %v4853_v17, %v9571_v24 }
 0x4ef   : > { %v4686_v14 = vadd.f32 %v8811_v25, %v4348_v8  ;;  %v6279_v8 = vld [vmem:[%s6426_s7 + $0xe8] sm:$0xff] }
 0x4f0   : > { %v4935_v16 = vadd.f32 %v6275_v30, %v4894_v10 }
 0x4f1   : > { %v4731_v51 = vadd.f32 %v8618_v12, %v4686_v14 }
 0x4f2   : > { %4976 = vst [vmem:[%s6426_s7 + $0xc8] sm:$0xff] %v4935_v16  ;;  %v3999_v39 = vpop.f32.mrf.mxu3 }
 0x4f3   : > { %vm4772_vm1 = vcmp.gt.f32.partialorder %v4731_v51, 0.0  ;;  %v4813_v46 = vmul.f32 0.1, %v4731_v51  ;;  %v4063_v38 = vadd.f32 %v3999_v39, %v8514_v37 }
 0x4f5   : > { %v4854_v22 = vsel %vm4772_vm1, %v4731_v51, %v4813_v46  ;;  %v4349_v27 = vadd.f32 %v8822_v4, %v4063_v38  ;;  %v8901_v4 = vpop.f32.mrf.mxu0  ;;  %v9578_v38 = vld [vmem:[#allocation23_spill] sm:$0xff] }
 0x4f6   : > { %v4895_v25 = vmul.f32 %v4854_v22, %v9572_v28 }
 0x4f7   : > { %v4687_v49 = vadd.f32 %v8825_v57, %v4349_v27  ;;  %v8904_v57 = vpop.f32.mrf.mxu1  ;;  %v6280_v27 = vld [vmem:[%s6426_s7 + $0xf0] sm:$0xff] }
 0x4f8   : > { %v4936_v59 = vadd.f32 %v6276_v61, %v4895_v25 }
 0x4f9   : > { %v4732_v58 = vadd.f32 %v8618_v12, %v4687_v49 }
 0x4fa   : > { %4977 = vst [vmem:[%s6426_s7 + $0xd0] sm:$0xff] %v4936_v59  ;;  %v4002_v15 = vpop.f32.mrf.mxu3 }
 0x4fb   : > { %vm4773_vm2 = vcmp.gt.f32.partialorder %v4732_v58, 0.0  ;;  %v4814_v37 = vmul.f32 0.1, %v4732_v58  ;;  %v4064_v0 = vadd.f32 %v4002_v15, %v9573_v34 }
 0x4fd   : > { %v4855_v62 = vsel %vm4773_vm2, %v4732_v58, %v4814_v37  ;;  %v4350_v3 = vadd.f32 %v8837_v6, %v4064_v0  ;;  %v9579_v37 = vld [vmem:[#allocation26_spill] sm:$0xff] }
 0x4fe   : > { %v4896_v60 = vmul.f32 %v4855_v62, %v9574_v18  ;;  %v6281_v0 = vld [vmem:[%s6426_s7 + $0xf8] sm:$0xff] }
 0x4ff   : > { %v4688_v20 = vadd.f32 %v8839_v40, %v4350_v3  ;;  %v8914_v40 = vpop.f32.mrf.mxu0  ;;  %v8917_v29 = vpop.f32.mrf.mxu1 }
 0x500   : > { %v4937_v32 = vadd.f32 %v6277_v9, %v4896_v60 }
 0x501   : > { %v4733_v42 = vadd.f32 %v8618_v12, %v4688_v20 }
 0x502   : > { %4978 = vst [vmem:[%s6426_s7 + $0xd8] sm:$0xff] %v4937_v32  ;;  %v4004_v53 = vpop.f32.mrf.mxu3 }
 0x503   : > { %vm4774_vm4 = vcmp.gt.f32.partialorder %v4733_v42, 0.0  ;;  %v4815_v1 = vmul.f32 0.1, %v4733_v42  ;;  %v4065_v6 = vadd.f32 %v4004_v53, %v8534_v52 }
 0x505   : > { %v4856_v45 = vsel %vm4774_vm4, %v4733_v42, %v4815_v1  ;;  %v4351_v21 = vadd.f32 %v8850_v56, %v4065_v6  ;;  %v9581_v42 = vld [vmem:[#allocation27_spill] sm:$0xff] }
 0x506   : > { %v4897_v7 = vmul.f32 %v4856_v45, %v9575_v26  ;;  %v6282_v6 = vld [vmem:[%s6426_s7 + $0x100] sm:$0xff] }
 0x507   : > { %v4689_v63 = vadd.f32 %v8853_v36, %v4351_v21  ;;  %v8927_v14 = vpop.f32.mrf.mxu0  ;;  %v4643_v16 = vpop.f32.mrf.mxu1 }
 0x508   : > { %v4938_v50 = vadd.f32 %v6278_v5, %v4897_v7 }
 0x509   : > { %v4734_v13 = vadd.f32 %v8618_v12, %v4689_v63 }
 0x50a   : > { %4979 = vst [vmem:[%s6426_s7 + $0xe0] sm:$0xff] %v4938_v50  ;;  %v4007_v54 = vpop.f32.mrf.mxu3  ;;  %v9582_v50 = vld [vmem:[#allocation31_spill] sm:$0xff] }
 0x50b   : > { %vm4775_vm5 = vcmp.gt.f32.partialorder %v4734_v13, 0.0  ;;  %v4816_v52 = vmul.f32 0.1, %v4734_v13  ;;  %v4066_v56 = vadd.f32 %v4007_v54, %v9576_v23 }
 0x50d   : > { %v4857_v44 = vsel %vm4775_vm5, %v4734_v13, %v4816_v52  ;;  %v4352_v35 = vadd.f32 %v8863_v47, %v4066_v56  ;;  %v6283_v52 = vld [vmem:[%s6426_s7 + $0x108] sm:$0xff] }
 0x50e   : > { %v4898_v36 = vmul.f32 %v4857_v44, %v9577_v31 }
 0x50f   : > { %v4690_v17 = vadd.f32 %v8866_v11, %v4352_v35  ;;  %v4646_v58 = vpop.f32.mrf.mxu1 }
 0x510   : > { %v4939_v24 = vadd.f32 %v6279_v8, %v4898_v36  ;;  %v9584_v8 = vld [vmem:[#allocation32_spill] sm:$0xff] }
 0x511   : > { %v4735_v10 = vadd.f32 %v8618_v12, %v4690_v17 }
 0x512   : > { %4980 = vst [vmem:[%s6426_s7 + $0xe8] sm:$0xff] %v4939_v24  ;;  %v4009_v30 = vpop.f32.mrf.mxu3 }
 0x513   : > { %vm4776_vm3 = vcmp.gt.f32.partialorder %v4735_v10, 0.0  ;;  %v4817_v51 = vmul.f32 0.1, %v4735_v10  ;;  %v4067_v39 = vadd.f32 %v4009_v30, %v8551_v33  ;;  %v4308_v33 = vpop.f32.mrf.mxu0 }
 0x515   : > { %v4858_v47 = vsel %vm4776_vm3, %v4735_v10, %v4817_v51  ;;  %v4353_v46 = vadd.f32 %v8876_v41, %v4067_v39  ;;  %v6284_v10 = vld [vmem:[%s6426_s7 + $0x110] sm:$0xff] }
 0x516   : > { %v4899_v22 = vmul.f32 %v4858_v47, %v9578_v38 }
 0x517   : > { %v4691_v11 = vadd.f32 %v8879_v2, %v4353_v46  ;;  %v4648_v1 = vpop.f32.mrf.mxu1 }
 0x518   : > { %v4940_v28 = vadd.f32 %v6280_v27, %v4899_v22  ;;  %v9585_v22 = vld [vmem:[#allocation91_spill] sm:$0xff] }
 0x519   : > { %v4736_v25 = vadd.f32 %v8618_v12, %v4691_v11 }
 0x51a   : > { %4981 = vst [vmem:[%s6426_s7 + $0xf0] sm:$0xff] %v4940_v28  ;;  %v4012_v49 = vpop.f32.mrf.mxu3 }
 0x51b   : > { %vm4777_vm6 = vcmp.gt.f32.partialorder %v4736_v25, 0.0  ;;  %v4818_v61 = vmul.f32 0.1, %v4736_v25  ;;  %v4068_v59 = vadd.f32 %v4012_v49, %v8559_v19  ;;  %v9580_v19 = vld [vmem:[#allocation33_spill] sm:$0xff] }
 0x51d   : > { %v4859_v15 = vsel %vm4777_vm6, %v4736_v25, %v4818_v61  ;;  %v4354_v41 = vadd.f32 %v8889_v48, %v4068_v59  ;;  %v4310_v48 = vpop.f32.mrf.mxu0 }
 0x51e   : > { %v4900_v34 = vmul.f32 %v4859_v15, %v9579_v37 }
 0x51f   : > { %v4692_v2 = vadd.f32 %v8891_v55, %v4354_v41  ;;  %v4651_v56 = vpop.f32.mrf.mxu1 }
 0x520   : > { %v4941_v62 = vadd.f32 %v6281_v0, %v4900_v34  ;;  %v9587_v34 = vld [vmem:[#allocation71_spill] sm:$0xff] }
 0x521   : > { %v4737_v3 = vadd.f32 %v8618_v12, %v4692_v2 }
 0x522   : > { %4982 = vst [vmem:[%s6426_s7 + $0xf8] sm:$0xff] %v4941_v62  ;;  %v4014_v18 = vpop.f32.mrf.mxu3 }
 0x523   : > { %vm4778_vm7 = vcmp.gt.f32.partialorder %v4737_v3, 0.0  ;;  %v4819_v60 = vmul.f32 0.1, %v4737_v3  ;;  %v4069_v20 = vadd.f32 %v4014_v18, %v9580_v19 }
 0x525   : > { %v4860_v9 = vsel %vm4778_vm7, %v4737_v3, %v4819_v60  ;;  %v4355_v32 = vadd.f32 %v8901_v4, %v4069_v20 }
 0x526   : > { %v4901_v53 = vmul.f32 %v4860_v9, %v9581_v42 }
 0x527   : > { %v4693_v55 = vadd.f32 %v8904_v57, %v4355_v32  ;;  %v4313_v57 = vpop.f32.mrf.mxu0  ;;  %v4653_v46 = vpop.f32.mrf.mxu1 }
 0x528   : > { %v4942_v45 = vadd.f32 %v6282_v6, %v4901_v53  ;;  %v9589_v53 = vld [vmem:[#allocation92_spill] sm:$0xff] }
 0x529   : > { %v4738_v21 = vadd.f32 %v8618_v12, %v4693_v55 }
 0x52a   : > { %4983 = vst [vmem:[%s6426_s7 + $0x100] sm:$0xff] %v4942_v45  ;;  %v4017_v26 = vpop.f32.mrf.mxu3 }
 0x52b   : > { %vm4779_vm9 = vcmp.gt.f32.partialorder %v4738_v21, 0.0  ;;  %v4820_v7 = vmul.f32 0.1, %v4738_v21  ;;  %v4070_v63 = vadd.f32 %v4017_v26, %v8575_v43  ;;  %v9583_v43 = vld [vmem:[#allocation86_spill] sm:$0xff] }
 0x52d   : > { %v4861_v5 = vsel %vm4779_vm9, %v4738_v21, %v4820_v7  ;;  %v4356_v4 = vadd.f32 %v8914_v40, %v4070_v63  ;;  %v9590_v21 = vld [vmem:[#allocation43_spill] sm:$0xff]  ;;  %v6287_v7 = vld [vmem:[%s6426_s7 + $0x128] sm:$0xff] }
 0x52e   : > { %v4902_v13 = vmul.f32 %v4861_v5, %v9582_v50 }
 0x52f   : > { %v4694_v54 = vadd.f32 %v8917_v29, %v4356_v4  ;;  %v4315_v39 = vpop.f32.mrf.mxu0  ;;  %v4656_v0 = vpop.f32.mrf.mxu1 }
 0x530   : > { %v4943_v23 = vadd.f32 %v6283_v52, %v4902_v13  ;;  %v9591_v13 = vld [vmem:[#allocation98_spill] sm:$0xff] }
 0x531   : > { %v4739_v44 = vadd.f32 %v8618_v12, %v4694_v54 }
 0x532   : > { %4984 = vst [vmem:[%s6426_s7 + $0x108] sm:$0xff] %v4943_v23  ;;  %v4019_v35 = vpop.f32.mrf.mxu3 }
 0x533   : > { %vm4780_vm12 = vcmp.gt.f32.partialorder %v4739_v44, 0.0  ;;  %v4821_v31 = vmul.f32 0.1, %v4739_v44  ;;  %v4071_v36 = vadd.f32 %v4019_v35, %v9583_v43  ;;  %v6289_v43 = vld [vmem:[%s6421_s19] ss:$0 sm:$0xff] }
 0x535   : > { %v4862_v17 = vsel %vm4780_vm12, %v4739_v44, %v4821_v31  ;;  %v4357_v40 = vadd.f32 %v8927_v14, %v4071_v36  ;;  %v9586_v14 = vld [vmem:[#allocation37_spill] sm:$0xff]  ;;  %v9592_v44 = vld [vmem:[#allocation42_spill] sm:$0xff] }
 0x536   : > { %v4903_v24 = vmul.f32 %v4862_v17, %v9584_v8  ;;  %v6288_v31 = vld [vmem:[%s6426_s7 + $0x130] sm:$0xff] }
 0x537   : > { %v4695_v29 = vadd.f32 %v4643_v16, %v4357_v40  ;;  %v6285_v16 = vld [vmem:[%s6426_s7 + $0x118] sm:$0xff]  ;;  %v4318_v41 = vpop.f32.mrf.mxu0  ;;  %v4658_v6 = vpop.f32.mrf.mxu1 }
 0x538   : > { %v4944_v30 = vadd.f32 %v6284_v10, %v4903_v24  ;;  %v9593_v40 = vld [vmem:[#allocation99_spill] sm:$0xff]  ;;  %v9594_v10 = vld [vmem:[#allocation45_spill] sm:$0xff] }
 0x539   : > { %v4740_v51 = vadd.f32 %v8618_v12, %v4695_v29 }
 0x53a   : > { %4985 = vst [vmem:[%s6426_s7 + $0x110] sm:$0xff] %v4944_v30  ;;  %v4022_v47 = vpop.f32.mrf.mxu3 }
 0x53b   : > { %vm4781_vm10 = vcmp.gt.f32.partialorder %v4740_v51, 0.0  ;;  %v4822_v38 = vmul.f32 0.1, %v4740_v51  ;;  %v4072_v11 = vadd.f32 %v4022_v47, %v9585_v22 }
 0x53d   : > { %v4863_v27 = vsel %vm4781_vm10, %v4740_v51, %v4822_v38  ;;  %v4358_v28 = vadd.f32 %v4308_v33, %v4072_v11  ;;  %v9588_v33 = vld [vmem:[#allocation38_spill] sm:$0xff] }
 0x53e   : > { %v4904_v25 = vmul.f32 %v4863_v27, %v9586_v14  ;;  %v9595_v27 = vld [vmem:[#allocation49_spill] sm:$0xff]  ;;  %v6291_v14 = vld [vmem:[%s6426_s7 + $0x140] sm:$0xf] }
 0x53f   : > { %v4696_v49 = vadd.f32 %v4646_v58, %v4358_v28  ;;  %v6286_v58 = vld [vmem:[%s6426_s7 + $0x120] sm:$0xff]  ;;  %v4320_v32 = vpop.f32.mrf.mxu0 }
 0x540   : > { %v4945_v61 = vadd.f32 %v6285_v16, %v4904_v25 }
 0x541   : > { %v4741_v59 = vadd.f32 %v8618_v12, %v4696_v49 }
 0x542   : > { %4986 = vst [vmem:[%s6426_s7 + $0x118] sm:$0xff] %v4945_v61  ;;  %v4024_v15 = vpop.f32.mrf.mxu3 }
 0x543   : > { %vm4782_vm11 = vcmp.gt.f32.partialorder %v4741_v59, 0.0  ;;  %v4823_v37 = vmul.f32 0.1, %v4741_v59  ;;  %v4073_v2 = vadd.f32 %v4024_v15, %v9587_v34 }
 0x545   : > { %v4864_v62 = vsel %vm4782_vm11, %v4741_v59, %v4823_v37  ;;  %v4359_v3 = vadd.f32 %v4310_v48, %v4073_v2 }
 0x546   : > { %v4905_v18 = vmul.f32 %v4864_v62, %v9588_v33 }
 0x547   : > { %v4697_v60 = vadd.f32 %v4648_v1, %v4359_v3 }
 0x548   : > { %v4946_v19 = vadd.f32 %v6286_v58, %v4905_v18 }
 0x549   : > { %v4742_v20 = vadd.f32 %v8618_v12, %v4697_v60 }
 0x54a   : > { %4987 = vst [vmem:[%s6426_s7 + $0x120] sm:$0xff] %v4946_v19  ;;  %v4027_v9 = vpop.f32.mrf.mxu3 }
 0x54b   : > { %vm4783_vm13 = vcmp.gt.f32.partialorder %v4742_v20, 0.0  ;;  %v4824_v42 = vmul.f32 0.1, %v4742_v20  ;;  %v4074_v55 = vadd.f32 %v4027_v9, %v9589_v53 }
 0x54d   : > { %v4865_v45 = vsel %vm4783_vm13, %v4742_v20, %v4824_v42  ;;  %v4360_v48 = vadd.f32 %v4313_v57, %v4074_v55 }
 0x54e   : > { %v4906_v26 = vmul.f32 %v4865_v45, %v9590_v21 }
 0x54f   : > { %v4698_v1 = vadd.f32 %v4651_v56, %v4360_v48 }
 0x550   : > { %v4947_v63 = vadd.f32 %v6287_v7, %v4906_v26 }
 0x551   : > { %v4743_v5 = vadd.f32 %v8618_v12, %v4698_v1 }
 0x552   : > { %4988 = vst [vmem:[%s6426_s7 + $0x128] sm:$0xff] %v4947_v63  ;;  %v4029_v4 = vpop.f32.mrf.mxu3 }
 0x553   : > { %vm4784_vm8 = vcmp.gt.f32.partialorder %v4743_v5, 0.0  ;;  %v4825_v50 = vmul.f32 0.1, %v4743_v5  ;;  %v4075_v54 = vadd.f32 %v4029_v4, %v9591_v13 }
 0x555   : > { %v4866_v52 = vsel %vm4784_vm8, %v4743_v5, %v4825_v50  ;;  %v4361_v23 = vadd.f32 %v4315_v39, %v4075_v54  ;;  %v6290_v39 = vld [vmem:[%s6426_s7 + $0x138] sm:$0xff] }
 0x556   : > { %v4907_v57 = vmul.f32 %v4866_v52, %v9592_v44 }
 0x557   : > { %v4699_v35 = vadd.f32 %v4653_v46, %v4361_v23 }
 0x558   : > { %v4948_v56 = vadd.f32 %v6288_v31, %v4907_v57 }
 0x559   : > { %v4744_v36 = vadd.f32 %v6289_v43, %v4699_v35 }
 0x55a   : > { %4989 = vst [vmem:[%s6426_s7 + $0x130] sm:$0xff] %v4948_v56  ;;  %v4032_v17 = vpop.f32.mrf.mxu3 }
 0x55b   : > { %vm4785_vm14 = vcmp.gt.f32.partialorder %v4744_v36, 0.0  ;;  %v4826_v12 = vmul.f32 0.1, %v4744_v36  ;;  %v4076_v8 = vadd.f32 %v4032_v17, %v9593_v40 }
 0x55d   : > { %v4867_v24 = vsel %vm4785_vm14, %v4744_v36, %v4826_v12  ;;  %v4362_v29 = vadd.f32 %v4318_v41, %v4076_v8 }
 0x55e   : > { %v4908_v30 = vmul.f32 %v4867_v24, %v9594_v10 }
 0x55f   : > { %v4700_v51 = vadd.f32 %v4656_v0, %v4362_v29 }
 0x560   : > { %v4949_v47 = vadd.f32 %v6290_v39, %v4908_v30 }
 0x561   : > { %v4745_v46 = vadd.f32 %v6289_v43, %v4700_v51 }
 0x562   : > { %4990 = vst [vmem:[%s6426_s7 + $0x138] sm:$0xff] %v4949_v47  ;;  %v4034_v38 = vpop.f32.mrf.mxu3 }
 0x563   : > { %vm4786_vm15 = vcmp.gt.f32.partialorder %v4745_v46, 0.0  ;;  %v4827_v22 = vmul.f32 0.1, %v4745_v46 }
 0x565   : > { %v4868_v11 = vsel %vm4786_vm15, %v4745_v46, %v4827_v22 }
 0x566   : > { %v4909_v28 = vmul.f32 %v4868_v11, %v9595_v27 }
 0x568   : > { %v4950_v25 = vadd.f32 %v6291_v14, %v4909_v28 }
 0x56a   : > { %4991 = vst [vmem:[%s6426_s7 + $0x140] sm:$0xf] %v4950_v25 }
 0x56b PF: > { %s16_s25 = sadd.s32 1, %s6330_s25   ;;  %s9596_s21 = smov %s6322_s23 }
 0x56c   : > { %p13_p8 = scmp.ge.s32.totalorder %s16_s25, 6   ;;  %s9597_s22 = smov %s6326_s24 }
 0x56d   : > { %s9598_s23 = smov %s9601_s26  ;;  %s9599_s24 = smov %s9605_s27 }
 0x56e   :  { %15 = sbr.rel (!%p13_p8) target bundleno = 3 (0x3), region = 98 }

</bundles_post_ra>
